<compile_context>
chip_gen: v7x
topology: tpu7x:2x2x1
jax: 0.10.0
libtpu: 0.0.40
codegen_flags: <defaults>
</compile_context>

<pallas_src>
import functools

import jax
import jax.numpy as jnp
from jax import lax
from jax.experimental import pallas as pl
from jax.experimental.pallas import tpu as pltpu  # noqa: F401  (TPU backend)

LRELU_SLOPE = 0.2
LANE = 128       # TPU lane width: conv out-channels / FC head blocks padded to this
SUBLANE = 8      # sublane granule: FC batch dim padded to a multiple of this


# ----------------------------- Pallas kernels ------------------------------

def _matmul_bias_lrelu_kernel(x_ref, w_ref, b_ref, o_ref):
    # (M, K) @ (K, N) + (1, N), fused LeakyReLU(0.2).  MXU matmul, VPU epilogue.
    acc = jnp.dot(x_ref[...], w_ref[...], preferred_element_type=jnp.float32)
    acc = acc + b_ref[...]
    o_ref[...] = jnp.where(acc >= 0, acc, LRELU_SLOPE * acc).astype(o_ref.dtype)


def matmul_bias_lrelu(x, w, b):
    """x: (M, K), w: (K, N), b: (1, N) -> (M, N) f32.  Single-block call:
    M is a multiple of 8 and K, N are multiples of 128 -> dense loads/stores."""
    M, K = x.shape
    N = w.shape[1]
    return pl.pallas_call(
        _matmul_bias_lrelu_kernel,
        out_shape=jax.ShapeDtypeStruct((M, N), jnp.float32),
        in_specs=[
            pl.BlockSpec((M, K), lambda: (0, 0)),
            pl.BlockSpec((K, N), lambda: (0, 0)),
            pl.BlockSpec((1, N), lambda: (0, 0)),
        ],
        out_specs=pl.BlockSpec((M, N), lambda: (0, 0)),
    )(x, w, b)


def _fc_reparam_kernel(x_ref, w_ref, b_ref, eps_ref,
                       z_ref, mean_ref, logvar_ref, *, npad):
    # Fused [fc1 | fc2] matmul + bias + LeakyReLU, then z = mean + eps*exp(logvar).
    y = jnp.dot(x_ref[...], w_ref[...], preferred_element_type=jnp.float32)
    y = y + b_ref[...]
    y = jnp.where(y >= 0, y, LRELU_SLOPE * y)
    mean = y[:, :npad]            # lane-aligned slice (npad is a multiple of 128)
    logvar = y[:, npad:]
    z = mean + eps_ref[...] * jnp.exp(logvar)   # exp(logvar): faithful to torch code
    z_ref[...] = z
    mean_ref[...] = mean
    logvar_ref[...] = logvar


def fc_reparam_fused(flat_p, w_cat, b_cat, eps_p, npad):
    """flat_p: (MP, K), w_cat: (K, 2*npad), b_cat: (1, 2*npad), eps_p: (MP, npad)
    -> (z, mean, logvar), each (MP, npad) f32, in one pallas_call."""
    MP, K = flat_p.shape
    kern = functools.partial(_fc_reparam_kernel, npad=npad)
    out = jax.ShapeDtypeStruct((MP, npad), jnp.float32)
    o_spec = pl.BlockSpec((MP, npad), lambda: (0, 0))
    return pl.pallas_call(
        kern,
        out_shape=(out, out, out),
        in_specs=[
            pl.BlockSpec((MP, K), lambda: (0, 0)),
            pl.BlockSpec((K, 2 * npad), lambda: (0, 0)),
            pl.BlockSpec((1, 2 * npad), lambda: (0, 0)),
            pl.BlockSpec((MP, npad), lambda: (0, 0)),
        ],
        out_specs=(o_spec, o_spec, o_spec),
    )(flat_p, w_cat, b_cat, eps_p)


# ------------------------------ conv lowering -------------------------------

def im2col3d_cl(x, k=4, s=2, p=1):
    """x: (B, D, H, W, C) channels-last -> patches (B*Do*Ho*Wo, k^3*C), with
    the reduction dim flattened in (kd, kh, kw, c) order (weights are
    flattened to match).  Thin XLA glue: pure data movement, fused by XLA."""
    B, D, H, W, C = x.shape
    Do = (D + 2 * p - k) // s + 1
    Ho = (H + 2 * p - k) // s + 1
    Wo = (W + 2 * p - k) // s + 1
    xp = jnp.pad(x, ((0, 0), (p, p), (p, p), (p, p), (0, 0)))
    cols = []
    for kd in range(k):
        for kh in range(k):
            for kw in range(k):
                cols.append(xp[:,
                               kd:kd + s * Do:s,
                               kh:kh + s * Ho:s,
                               kw:kw + s * Wo:s, :])
    pat = jnp.stack(cols, axis=4)                       # (B, Do, Ho, Wo, k^3, C)
    return pat.reshape(B * Do * Ho * Wo, k * k * k * C), (B, Do, Ho, Wo)


def conv3d_lrelu_cl(x_cl, w, b):
    """Conv3d(k=4, s=2, p=1) + LeakyReLU(0.2), channels-last activations.
    w: (O, C, 4, 4, 4) torch OIDHW layout, b: (O,).
    Returns the lane-dense matmul result (B*Do*Ho*Wo, 128) (columns >= O are
    zero) plus the output geometry (B, Do, Ho, Wo, O)."""
    O = w.shape[0]
    patches, (B, Do, Ho, Wo) = im2col3d_cl(x_cl)
    wf = w.transpose(2, 3, 4, 1, 0).reshape(-1, O)      # ((kd,kh,kw,c), O)
    wf = jnp.pad(wf, ((0, 0), (0, LANE - O)))           # lane-dense output cols
    bf = jnp.pad(b, (0, LANE - O)).reshape(1, LANE)
    out2d = matmul_bias_lrelu(patches, wf, bf)          # (M, 128)
    return out2d, (B, Do, Ho, Wo, O)


# ------------------------------ encoder model -------------------------------

def init_params(key, z_dim, latent):
    conv_shapes = [(4, 2, 4, 4, 4), (8, 4, 4, 4, 4), (16, 8, 4, 4, 4)]
    fc_in = 16 * z_dim * z_dim * z_dim
    keys = jax.random.split(key, 2 * len(conv_shapes) + 4)

    def uinit(k, shape, fan_in):
        bound = 1.0 / jnp.sqrt(jnp.float32(fan_in))
        return jax.random.uniform(k, shape, jnp.float32, -bound, bound)

    conv = []
    for i, shp in enumerate(conv_shapes):
        fan_in = shp[1] * shp[2] * shp[3] * shp[4]
        conv.append((uinit(keys[2 * i], shp, fan_in),
                     uinit(keys[2 * i + 1], (shp[0],), fan_in)))
    fc1_w = uinit(keys[-4], (fc_in, latent), fc_in)
    fc1_b = uinit(keys[-3], (1, latent), fc_in)
    fc2_w = uinit(keys[-2], (fc_in, latent), fc_in)
    fc2_b = uinit(keys[-1], (1, latent), fc_in)
    return {"conv": conv, "fc1_w": fc1_w, "fc1_b": fc1_b,
            "fc2_w": fc2_w, "fc2_b": fc2_b}


def _prep_fc_weight(w, b, latent, spatial, c_real, npad):
    """Fold torch's NCDHW .view(B, -1) flatten order (c-major) and the
    channel padding (c_real -> 128 lanes) into the FC weight/bias.
    Returns ((spatial*128, npad), (1, npad))."""
    wr = w.reshape(c_real, spatial, latent).transpose(1, 0, 2)   # (s, c, n)
    wr = jnp.pad(wr, ((0, 0), (0, LANE - c_real), (0, 0)))       # (s, 128, n)
    wr = wr.reshape(spatial * LANE, latent)
    wr = jnp.pad(wr, ((0, 0), (0, npad - latent)))
    bp = jnp.pad(b, ((0, 0), (0, npad - latent)))
    return wr, bp


def encoder_forward(params, x, c, eps, z_dim, batch_size):
    S = z_dim * 8
    latent = params["fc1_b"].shape[1]

    # torch: c.reshape(B,1,1,1,1).repeat(1,1,S,S,S); cat([x, c], dim=1).
    # Channels-last internally: channel 0 = x, channel 1 = c.
    x_cl = x.reshape(batch_size, S, S, S, 1)        # NCDHW with C=1 -> NDHWC
    c_cl = jnp.broadcast_to(c.reshape(batch_size, 1, 1, 1, 1),
                            (batch_size, S, S, S, 1))
    h = jnp.concatenate([x_cl, c_cl], axis=-1)      # (B, S, S, S, 2)

    # torch runs encoder_conv twice on the same input with shared weights, so
    # out1 == out2; a single pass is semantically identical.
    n_layers = len(params["conv"])
    out2d, geom = None, None
    for li, (w, b) in enumerate(params["conv"]):
        out2d, geom = conv3d_lrelu_cl(h, w, b)
        if li + 1 < n_layers:
            B_, Do, Ho, Wo, O = geom
            h = out2d.reshape(B_, Do, Ho, Wo, LANE)[..., :O]

    B_, Do, Ho, Wo, O = geom
    spatial = Do * Ho * Wo                          # == z_dim**3
    npad = ((latent + LANE - 1) // LANE) * LANE
    mpad = ((B_ + SUBLANE - 1) // SUBLANE) * SUBLANE

    # Flatten (rows of out2d are already grouped per batch); pad batch -> 8.
    flat = out2d.reshape(B_, spatial * LANE)
    flat_p = jnp.pad(flat, ((0, mpad - B_), (0, 0)))

    w1, b1 = _prep_fc_weight(params["fc1_w"], params["fc1_b"], latent, spatial, O, npad)
    w2, b2 = _prep_fc_weight(params["fc2_w"], params["fc2_b"], latent, spatial, O, npad)
    w_cat = jnp.concatenate([w1, w2], axis=1)       # (spatial*128, 2*npad)
    b_cat = jnp.concatenate([b1, b2], axis=1)       # (1, 2*npad)

    eps_p = jnp.pad(eps, ((0, mpad - B_), (0, npad - latent)))

    z_p, mean_p, logvar_p = fc_reparam_fused(flat_p, w_cat, b_cat, eps_p, npad)
    z = z_p[:batch_size, :latent]
    mean = mean_p[:batch_size, :latent]
    logvar = logvar_p[:batch_size, :latent]
    return z, mean, logvar


# ------------------------------ pure-JAX reference ---------------------------

def ref_forward(params, x, c, eps, z_dim, batch_size):
    S = z_dim * 8
    cmap = jnp.broadcast_to(c.reshape(batch_size, 1, 1, 1, 1),
                            (batch_size, 1, S, S, S))
    h = jnp.concatenate([x, cmap], axis=1)
    for w, b in params["conv"]:
        h = lax.conv_general_dilated(
            h, w, (2, 2, 2), [(1, 1)] * 3,
            dimension_numbers=("NCDHW", "OIDHW", "NCDHW"))
        h = h + b.reshape(1, -1, 1, 1, 1)
        h = jnp.where(h >= 0, h, LRELU_SLOPE * h)
    flat = h.reshape(batch_size, -1)

    def fc(xf, w, b):
        y = xf @ w + b
        return jnp.where(y >= 0, y, LRELU_SLOPE * y)

    mean = fc(flat, params["fc1_w"], params["fc1_b"])
    logvar = fc(flat, params["fc2_w"], params["fc2_b"])
    z = mean + eps * jnp.exp(logvar)
    return z, mean, logvar


# ---------------------------------- main ------------------------------------

if __name__ == "__main__":
    z_dim, batch_size, latent = 2, 2, 32
    S = z_dim * 8                                   # input spatial size = 16

    key = jax.random.PRNGKey(0)
    kp, kx, kc, ke = jax.random.split(key, 4)

    params = init_params(kp, z_dim, latent)
    x = jax.random.normal(kx, (batch_size, 1, S, S, S), jnp.float32)
    c = jax.random.normal(kc, (batch_size,), jnp.float32)
    eps = jax.random.normal(ke, (batch_size, latent), jnp.float32)   # torch.randn equivalent

    fwd = jax.jit(encoder_forward, static_argnums=(4, 5))
    z, mean, logvar = jax.block_until_ready(
        fwd(params, x, c, eps, z_dim, batch_size))

    z_r, mean_r, logvar_r = ref_forward(params, x, c, eps, z_dim, batch_size)
    assert jnp.allclose(mean, mean_r, atol=1e-4, rtol=1e-4)
    assert jnp.allclose(logvar, logvar_r, atol=1e-4, rtol=1e-4)
    assert jnp.allclose(z, z_r, atol=1e-4, rtol=1e-4)

    print("KERNEL_OK")
</pallas_src>

<mosaic_0001>
module attributes {stable_mosaic.version = 11 : i64} {
  func.func @_matmul_bias_lrelu_kernel(%arg0: memref<1024x128xf32, #tpu.memory_space<vmem>>, %arg1: memref<128x128xf32, #tpu.memory_space<vmem>>, %arg2: memref<1x128xf32, #tpu.memory_space<vmem>>, %arg3: memref<1024x128xf32, #tpu.memory_space<vmem>>) attributes {dimension_semantics = [], scalar_prefetch = 0 : i64, scratch_operands = 0 : i64, tpu.core_type = #tpu.core_type<tc>} {
    %c0 = arith.constant 0 : index
    %c0_0 = arith.constant 0 : index
    %0 = vector.load %arg0[%c0, %c0_0] : memref<1024x128xf32, #tpu.memory_space<vmem>>, vector<1024x128xf32>
    %c0_1 = arith.constant 0 : index
    %c0_2 = arith.constant 0 : index
    %1 = vector.load %arg1[%c0_1, %c0_2] : memref<128x128xf32, #tpu.memory_space<vmem>>, vector<128x128xf32>
    %cst = arith.constant dense<0.000000e+00> : vector<1024x128xf32>
    %2 = tpu.matmul %0, %1, %cst {dimension_numbers = #tpu.dot_dimension_numbers<[1], [0], [0], [1], [0, 0, 1, 1], [], []>} : vector<1024x128xf32>, vector<128x128xf32>, vector<1024x128xf32> -> vector<1024x128xf32>
    %c0_3 = arith.constant 0 : index
    %c0_4 = arith.constant 0 : index
    %3 = vector.load %arg2[%c0_3, %c0_4] : memref<1x128xf32, #tpu.memory_space<vmem>>, vector<1x128xf32>
    %4 = vector.broadcast %3 : vector<1x128xf32> to vector<1024x128xf32>
    %5 = arith.addf %2, %4 : vector<1024x128xf32>
    %cst_5 = arith.constant 0.000000e+00 : f32
    %6 = vector.broadcast %cst_5 : f32 to vector<1024x128xf32>
    %7 = arith.cmpf oge, %5, %6 : vector<1024x128xf32>
    %cst_6 = arith.constant 2.000000e-01 : f32
    %8 = vector.broadcast %cst_6 : f32 to vector<1024x128xf32>
    %9 = arith.mulf %8, %5 : vector<1024x128xf32>
    %10 = arith.select %7, %5, %9 : vector<1024x128xi1>, vector<1024x128xf32>
    %c0_7 = arith.constant 0 : index
    %c0_8 = arith.constant 0 : index
    %11 = vector.load %arg3[%c0_7, %c0_8] : memref<1024x128xf32, #tpu.memory_space<vmem>>, vector<1024x128xf32>
    tpu.vector_store %arg3[%c0_7, %c0_8], %10 {strides = array<i32>} : memref<1024x128xf32, #tpu.memory_space<vmem>>, vector<1024x128xf32>,
    return
  }
}

module attributes {stable_mosaic.version = 11 : i64} {
  func.func @_matmul_bias_lrelu_kernel(%arg0: memref<128x256xf32, #tpu.memory_space<vmem>>, %arg1: memref<256x128xf32, #tpu.memory_space<vmem>>, %arg2: memref<1x128xf32, #tpu.memory_space<vmem>>, %arg3: memref<128x128xf32, #tpu.memory_space<vmem>>) attributes {dimension_semantics = [], scalar_prefetch = 0 : i64, scratch_operands = 0 : i64, tpu.core_type = #tpu.core_type<tc>} {
    %c0 = arith.constant 0 : index
    %c0_0 = arith.constant 0 : index
    %0 = vector.load %arg0[%c0, %c0_0] : memref<128x256xf32, #tpu.memory_space<vmem>>, vector<128x256xf32>
    %c0_1 = arith.constant 0 : index
    %c0_2 = arith.constant 0 : index
    %1 = vector.load %arg1[%c0_1, %c0_2] : memref<256x128xf32, #tpu.memory_space<vmem>>, vector<256x128xf32>
    %cst = arith.constant dense<0.000000e+00> : vector<128x128xf32>
    %2 = tpu.matmul %0, %1, %cst {dimension_numbers = #tpu.dot_dimension_numbers<[1], [0], [0], [1], [0, 0, 1, 1], [], []>} : vector<128x256xf32>, vector<256x128xf32>, vector<128x128xf32> -> vector<128x128xf32>
    %c0_3 = arith.constant 0 : index
    %c0_4 = arith.constant 0 : index
    %3 = vector.load %arg2[%c0_3, %c0_4] : memref<1x128xf32, #tpu.memory_space<vmem>>, vector<1x128xf32>
    %4 = vector.broadcast %3 : vector<1x128xf32> to vector<128x128xf32>
    %5 = arith.addf %2, %4 : vector<128x128xf32>
    %cst_5 = arith.constant 0.000000e+00 : f32
    %6 = vector.broadcast %cst_5 : f32 to vector<128x128xf32>
    %7 = arith.cmpf oge, %5, %6 : vector<128x128xf32>
    %cst_6 = arith.constant 2.000000e-01 : f32
    %8 = vector.broadcast %cst_6 : f32 to vector<128x128xf32>
    %9 = arith.mulf %8, %5 : vector<128x128xf32>
    %10 = arith.select %7, %5, %9 : vector<128x128xi1>, vector<128x128xf32>
    %c0_7 = arith.constant 0 : index
    %c0_8 = arith.constant 0 : index
    %11 = vector.load %arg3[%c0_7, %c0_8] : memref<128x128xf32, #tpu.memory_space<vmem>>, vector<128x128xf32>
    tpu.vector_store %arg3[%c0_7, %c0_8], %10 {strides = array<i32>} : memref<128x128xf32, #tpu.memory_space<vmem>>, vector<128x128xf32>,
    return
  }
}

module attributes {stable_mosaic.version = 11 : i64} {
  func.func @_matmul_bias_lrelu_kernel(%arg0: memref<16x512xf32, #tpu.memory_space<vmem>>, %arg1: memref<512x128xf32, #tpu.memory_space<vmem>>, %arg2: memref<1x128xf32, #tpu.memory_space<vmem>>, %arg3: memref<16x128xf32, #tpu.memory_space<vmem>>) attributes {dimension_semantics = [], scalar_prefetch = 0 : i64, scratch_operands = 0 : i64, tpu.core_type = #tpu.core_type<tc>} {
    %c0 = arith.constant 0 : index
    %c0_0 = arith.constant 0 : index
    %0 = vector.load %arg0[%c0, %c0_0] : memref<16x512xf32, #tpu.memory_space<vmem>>, vector<16x512xf32>
    %c0_1 = arith.constant 0 : index
    %c0_2 = arith.constant 0 : index
    %1 = vector.load %arg1[%c0_1, %c0_2] : memref<512x128xf32, #tpu.memory_space<vmem>>, vector<512x128xf32>
    %cst = arith.constant dense<0.000000e+00> : vector<16x128xf32>
    %2 = tpu.matmul %0, %1, %cst {dimension_numbers = #tpu.dot_dimension_numbers<[1], [0], [0], [1], [0, 0, 1, 1], [], []>} : vector<16x512xf32>, vector<512x128xf32>, vector<16x128xf32> -> vector<16x128xf32>
    %c0_3 = arith.constant 0 : index
    %c0_4 = arith.constant 0 : index
    %3 = vector.load %arg2[%c0_3, %c0_4] : memref<1x128xf32, #tpu.memory_space<vmem>>, vector<1x128xf32>
    %4 = vector.broadcast %3 : vector<1x128xf32> to vector<16x128xf32>
    %5 = arith.addf %2, %4 : vector<16x128xf32>
    %cst_5 = arith.constant 0.000000e+00 : f32
    %6 = vector.broadcast %cst_5 : f32 to vector<16x128xf32>
    %7 = arith.cmpf oge, %5, %6 : vector<16x128xf32>
    %cst_6 = arith.constant 2.000000e-01 : f32
    %8 = vector.broadcast %cst_6 : f32 to vector<16x128xf32>
    %9 = arith.mulf %8, %5 : vector<16x128xf32>
    %10 = arith.select %7, %5, %9 : vector<16x128xi1>, vector<16x128xf32>
    %c0_7 = arith.constant 0 : index
    %c0_8 = arith.constant 0 : index
    %11 = vector.load %arg3[%c0_7, %c0_8] : memref<16x128xf32, #tpu.memory_space<vmem>>, vector<16x128xf32>
    tpu.vector_store %arg3[%c0_7, %c0_8], %10 {strides = array<i32>} : memref<16x128xf32, #tpu.memory_space<vmem>>, vector<16x128xf32>,
    return
  }
}

module attributes {stable_mosaic.version = 11 : i64} {
  func.func @_fc_reparam_kernel(%arg0: memref<8x1024xf32, #tpu.memory_space<vmem>>, %arg1: memref<1024x256xf32, #tpu.memory_space<vmem>>, %arg2: memref<1x256xf32, #tpu.memory_space<vmem>>, %arg3: memref<8x128xf32, #tpu.memory_space<vmem>>, %arg4: memref<8x128xf32, #tpu.memory_space<vmem>>, %arg5: memref<8x128xf32, #tpu.memory_space<vmem>>, %arg6: memref<8x128xf32, #tpu.memory_space<vmem>>) attributes {dimension_semantics = [], scalar_prefetch = 0 : i64, scratch_operands = 0 : i64, tpu.core_type = #tpu.core_type<tc>} {
    %c0 = arith.constant 0 : index
    %c0_0 = arith.constant 0 : index
    %0 = vector.load %arg0[%c0, %c0_0] : memref<8x1024xf32, #tpu.memory_space<vmem>>, vector<8x1024xf32>
    %c0_1 = arith.constant 0 : index
    %c0_2 = arith.constant 0 : index
    %1 = vector.load %arg1[%c0_1, %c0_2] : memref<1024x256xf32, #tpu.memory_space<vmem>>, vector<1024x256xf32>
    %cst = arith.constant dense<0.000000e+00> : vector<8x256xf32>
    %2 = tpu.matmul %0, %1, %cst {dimension_numbers = #tpu.dot_dimension_numbers<[1], [0], [0], [1], [0, 0, 1, 1], [], []>} : vector<8x1024xf32>, vector<1024x256xf32>, vector<8x256xf32> -> vector<8x256xf32>
    %c0_3 = arith.constant 0 : index
    %c0_4 = arith.constant 0 : index
    %3 = vector.load %arg2[%c0_3, %c0_4] : memref<1x256xf32, #tpu.memory_space<vmem>>, vector<1x256xf32>
    %4 = vector.broadcast %3 : vector<1x256xf32> to vector<8x256xf32>
    %5 = arith.addf %2, %4 : vector<8x256xf32>
    %cst_5 = arith.constant 0.000000e+00 : f32
    %6 = vector.broadcast %cst_5 : f32 to vector<8x256xf32>
    %7 = arith.cmpf oge, %5, %6 : vector<8x256xf32>
    %cst_6 = arith.constant 2.000000e-01 : f32
    %8 = vector.broadcast %cst_6 : f32 to vector<8x256xf32>
    %9 = arith.mulf %8, %5 : vector<8x256xf32>
    %10 = arith.select %7, %5, %9 : vector<8x256xi1>, vector<8x256xf32>
    %11 = vector.extract_strided_slice %10 {offsets = [0, 0], sizes = [8, 128], strides = [1, 1]} : vector<8x256xf32> to vector<8x128xf32>
    %12 = vector.extract_strided_slice %10 {offsets = [0, 128], sizes = [8, 128], strides = [1, 1]} : vector<8x256xf32> to vector<8x128xf32>
    %c0_7 = arith.constant 0 : index
    %c0_8 = arith.constant 0 : index
    %13 = vector.load %arg3[%c0_7, %c0_8] : memref<8x128xf32, #tpu.memory_space<vmem>>, vector<8x128xf32>
    %14 = math.exp %12 : vector<8x128xf32>
    %15 = arith.mulf %13, %14 : vector<8x128xf32>
    %16 = arith.addf %11, %15 : vector<8x128xf32>
    %c0_9 = arith.constant 0 : index
    %c0_10 = arith.constant 0 : index
    %17 = vector.load %arg4[%c0_9, %c0_10] : memref<8x128xf32, #tpu.memory_space<vmem>>, vector<8x128xf32>
    tpu.vector_store %arg4[%c0_9, %c0_10], %16 {strides = array<i32>} : memref<8x128xf32, #tpu.memory_space<vmem>>, vector<8x128xf32>,
    %c0_11 = arith.constant 0 : index
    %c0_12 = arith.constant 0 : index
    %18 = vector.load %arg5[%c0_11, %c0_12] : memref<8x128xf32, #tpu.memory_space<vmem>>, vector<8x128xf32>
    tpu.vector_store %arg5[%c0_11, %c0_12], %11 {strides = array<i32>} : memref<8x128xf32, #tpu.memory_space<vmem>>, vector<8x128xf32>,
    %c0_13 = arith.constant 0 : index
    %c0_14 = arith.constant 0 : index
    %19 = vector.load %arg6[%c0_13, %c0_14] : memref<8x128xf32, #tpu.memory_space<vmem>>, vector<8x128xf32>
    tpu.vector_store %arg6[%c0_13, %c0_14], %12 {strides = array<i32>} : memref<8x128xf32, #tpu.memory_space<vmem>>, vector<8x128xf32>,
    return
  }
}

</mosaic_0001>

<bundles_post_ra>
// kernel: encoder_forward.4
= control target key start
LH: loop header
LB: loop body
LE: loop exit
PB: predicated region body
PF: predicated region fallthrough
CT: control target
= control target key end

     0   :  { %s2778_s1 = inlined_call_operand.vmem [shape: f32[128,128], index: 1, kind: input, shape index: {}]   ;;  %s2779_s0 = inlined_call_operand.vmem [shape: f32[1024,128], index: 0, kind: input, shape index: {}]   ;;  %s2780_s2 = inlined_call_operand.vmem [shape: f32[1,128], index: 2, kind: input, shape index: {}]   ;;  %s2781_s3 = inlined_call_operand.vmem [shape: f32[1024,128], index: 3, kind: output, shape index: {}]  }
   0x1   :  { %v142_v0 = vld [vmem:[%s2778_s1] sm:$0xff]  ;;  %v143_v1 = vld [vmem:[%s2778_s1 + $0x8] sm:$0xff]  ;;  %v144_v2 = vld [vmem:[%s2778_s1 + $0x10] sm:$0xff] }
   0x2   :  { %v1755_v3 = vpack.c.bf16 %v143_v1, %v142_v0  ;;  %v145_v4 = vld [vmem:[%s2778_s1 + $0x18] sm:$0xff]  ;;  %v146_v6 = vld [vmem:[%s2778_s1 + $0x20] sm:$0xff]  ;;  %v147_v7 = vld [vmem:[%s2778_s1 + $0x28] sm:$0xff] }
   0x3   :  { %v1759_v5 = vpack.c.bf16 %v145_v4, %v144_v2  ;;  %v1763_v8 = vpack.c.bf16 %v147_v7, %v146_v6  ;;  %v14_v9 = vld [vmem:[%s2779_s0] sm:$0xff]  ;;  %v148_v11 = vld [vmem:[%s2778_s1 + $0x30] sm:$0xff]  ;;  %v149_v12 = vld [vmem:[%s2778_s1 + $0x38] sm:$0xff] }
   0x4   :  { %1756 = vmatprep.subr.bf16.mxu0 %v1755_v3  ;;  %1787 = vmatprep.subr.bf16.mxu1 %v1755_v3  ;;  %v78_v10 = vld [vmem:[%s2779_s0 + $0x200] sm:$0xff]  ;;  %v1767_v13 = vpack.c.bf16 %v149_v12, %v148_v11  ;;  %v151_v15 = vld [vmem:[%s2778_s1 + $0x48] sm:$0xff]  ;;  %v152_v17 = vld [vmem:[%s2778_s1 + $0x50] sm:$0xff] }
   0x5   :  { %1758 = vmatpush3.bf16.msra.mxu0 %v1755_v3  ;;  %1795 = vmatpush3.bf16.msra.mxu1 %v1755_v3  ;;  %v150_v14 = vld [vmem:[%s2778_s1 + $0x40] sm:$0xff]  ;;  %v153_v18 = vld [vmem:[%s2778_s1 + $0x58] sm:$0xff]  ;;  %v155_v21 = vld [vmem:[%s2778_s1 + $0x68] sm:$0xff] }
   0x6   :  { %1760 = vmatprep.subr.bf16.mxu0 %v1759_v5  ;;  %1788 = vmatprep.subr.bf16.mxu1 %v1759_v5  ;;  %v1771_v16 = vpack.c.bf16 %v151_v15, %v150_v14  ;;  %v1775_v19 = vpack.c.bf16 %v153_v18, %v152_v17  ;;  %v154_v20 = vld [vmem:[%s2778_s1 + $0x60] sm:$0xff]  ;;  %v156_v23 = vld [vmem:[%s2778_s1 + $0x70] sm:$0xff]  ;;  %v157_v24 = vld [vmem:[%s2778_s1 + $0x78] sm:$0xff] }
   0x7   :  { %1563 = vmatprep.mubr.f32.mxu0 %v14_v9  ;;  %1659 = vmatprep.mubr.f32.mxu1 %v78_v10  ;;  %v1779_v22 = vpack.c.bf16 %v155_v21, %v154_v20  ;;  %v1783_v25 = vpack.c.bf16 %v157_v24, %v156_v23  ;;  %v15_v26 = vld [vmem:[%s2779_s0 + $0x8] sm:$0xff]  ;;  %v16_v28 = vld [vmem:[%s2779_s0 + $0x10] sm:$0xff]  ;;  %v17_v30 = vld [vmem:[%s2779_s0 + $0x18] sm:$0xff] }
   0x8   :  { %v79_v27 = vld [vmem:[%s2779_s0 + $0x208] sm:$0xff]  ;;  %v80_v29 = vld [vmem:[%s2779_s0 + $0x210] sm:$0xff]  ;;  %v81_v31 = vld [vmem:[%s2779_s0 + $0x218] sm:$0xff] }
   0x9   :  { %1762 = vmatpush3.bf16.msra.mxu0 %v1759_v5  ;;  %1796 = vmatpush3.bf16.msra.mxu1 %v1759_v5  ;;  %v18_v32 = vld [vmem:[%s2779_s0 + $0x20] sm:$0xff]  ;;  %v19_v34 = vld [vmem:[%s2779_s0 + $0x28] sm:$0xff]  ;;  %v20_v36 = vld [vmem:[%s2779_s0 + $0x30] sm:$0xff] }
   0xa   :  { %1764 = vmatprep.subr.bf16.mxu0 %v1763_v8  ;;  %1789 = vmatprep.subr.bf16.mxu1 %v1763_v8  ;;  %v82_v33 = vld [vmem:[%s2779_s0 + $0x220] sm:$0xff]  ;;  %v83_v35 = vld [vmem:[%s2779_s0 + $0x228] sm:$0xff]  ;;  %v84_v37 = vld [vmem:[%s2779_s0 + $0x230] sm:$0xff] }
   0xb   :  { %v21_v38 = vld [vmem:[%s2779_s0 + $0x38] sm:$0xff]  ;;  %v22_v40 = vld [vmem:[%s2779_s0 + $0x40] sm:$0xff]  ;;  %v23_v42 = vld [vmem:[%s2779_s0 + $0x48] sm:$0xff] }
   0xc   :  { %v85_v39 = vld [vmem:[%s2779_s0 + $0x238] sm:$0xff]  ;;  %v86_v41 = vld [vmem:[%s2779_s0 + $0x240] sm:$0xff]  ;;  %v87_v43 = vld [vmem:[%s2779_s0 + $0x248] sm:$0xff] }
   0xd   :  { %1766 = vmatpush3.bf16.msra.mxu0 %v1763_v8  ;;  %1797 = vmatpush3.bf16.msra.mxu1 %v1763_v8  ;;  %v24_v44 = vld [vmem:[%s2779_s0 + $0x50] sm:$0xff]  ;;  %v25_v46 = vld [vmem:[%s2779_s0 + $0x58] sm:$0xff]  ;;  %v26_v48 = vld [vmem:[%s2779_s0 + $0x60] sm:$0xff] }
   0xe   :  { %1768 = vmatprep.subr.bf16.mxu0 %v1767_v13  ;;  %1790 = vmatprep.subr.bf16.mxu1 %v1767_v13  ;;  %v88_v45 = vld [vmem:[%s2779_s0 + $0x250] sm:$0xff]  ;;  %v89_v47 = vld [vmem:[%s2779_s0 + $0x258] sm:$0xff]  ;;  %v90_v49 = vld [vmem:[%s2779_s0 + $0x260] sm:$0xff] }
   0xf   :  { %v27_v50 = vld [vmem:[%s2779_s0 + $0x68] sm:$0xff]  ;;  %v28_v52 = vld [vmem:[%s2779_s0 + $0x70] sm:$0xff]  ;;  %v29_v54 = vld [vmem:[%s2779_s0 + $0x78] sm:$0xff] }
  0x10   :  { %v91_v51 = vld [vmem:[%s2779_s0 + $0x268] sm:$0xff]  ;;  %v92_v53 = vld [vmem:[%s2779_s0 + $0x270] sm:$0xff]  ;;  %v93_v55 = vld [vmem:[%s2779_s0 + $0x278] sm:$0xff] }
  0x11   :  { %1770 = vmatpush3.bf16.msra.mxu0 %v1767_v13  ;;  %1798 = vmatpush3.bf16.msra.mxu1 %v1767_v13  ;;  %v30_v56 = vld [vmem:[%s2779_s0 + $0x80] sm:$0xff]  ;;  %v31_v58 = vld [vmem:[%s2779_s0 + $0x88] sm:$0xff]  ;;  %v32_v60 = vld [vmem:[%s2779_s0 + $0x90] sm:$0xff] }
  0x12   :  { %1772 = vmatprep.subr.bf16.mxu0 %v1771_v16  ;;  %1791 = vmatprep.subr.bf16.mxu1 %v1771_v16  ;;  %v94_v57 = vld [vmem:[%s2779_s0 + $0x280] sm:$0xff]  ;;  %v95_v59 = vld [vmem:[%s2779_s0 + $0x288] sm:$0xff]  ;;  %v96_v61 = vld [vmem:[%s2779_s0 + $0x290] sm:$0xff] }
  0x13   :  { %v33_v62 = vld [vmem:[%s2779_s0 + $0x98] sm:$0xff]  ;;  %v34_v0 = vld [vmem:[%s2779_s0 + $0xa0] sm:$0xff]  ;;  %v35_v2 = vld [vmem:[%s2779_s0 + $0xa8] sm:$0xff] }
  0x14   :  { %v97_v63 = vld [vmem:[%s2779_s0 + $0x298] sm:$0xff]  ;;  %v98_v1 = vld [vmem:[%s2779_s0 + $0x2a0] sm:$0xff]  ;;  %v99_v3 = vld [vmem:[%s2779_s0 + $0x2a8] sm:$0xff] }
  0x15   :  { %1774 = vmatpush3.bf16.msra.mxu0 %v1771_v16  ;;  %1799 = vmatpush3.bf16.msra.mxu1 %v1771_v16  ;;  %v36_v4 = vld [vmem:[%s2779_s0 + $0xb0] sm:$0xff]  ;;  %v37_v6 = vld [vmem:[%s2779_s0 + $0xb8] sm:$0xff]  ;;  %v38_v8 = vld [vmem:[%s2779_s0 + $0xc0] sm:$0xff] }
  0x16   :  { %1776 = vmatprep.subr.bf16.mxu0 %v1775_v19  ;;  %1792 = vmatprep.subr.bf16.mxu1 %v1775_v19  ;;  %v100_v5 = vld [vmem:[%s2779_s0 + $0x2b0] sm:$0xff]  ;;  %v101_v7 = vld [vmem:[%s2779_s0 + $0x2b8] sm:$0xff]  ;;  %v102_v9 = vld [vmem:[%s2779_s0 + $0x2c0] sm:$0xff] }
  0x17   :  { %v39_v10 = vld [vmem:[%s2779_s0 + $0xc8] sm:$0xff]  ;;  %v40_v12 = vld [vmem:[%s2779_s0 + $0xd0] sm:$0xff]  ;;  %v41_v14 = vld [vmem:[%s2779_s0 + $0xd8] sm:$0xff] }
  0x18   :  { %v103_v11 = vld [vmem:[%s2779_s0 + $0x2c8] sm:$0xff]  ;;  %v104_v13 = vld [vmem:[%s2779_s0 + $0x2d0] sm:$0xff]  ;;  %v105_v15 = vld [vmem:[%s2779_s0 + $0x2d8] sm:$0xff] }
  0x19   :  { %1778 = vmatpush3.bf16.msra.mxu0 %v1775_v19  ;;  %1800 = vmatpush3.bf16.msra.mxu1 %v1775_v19  ;;  %v42_v16 = vld [vmem:[%s2779_s0 + $0xe0] sm:$0xff]  ;;  %v43_v18 = vld [vmem:[%s2779_s0 + $0xe8] sm:$0xff]  ;;  %v44_v20 = vld [vmem:[%s2779_s0 + $0xf0] sm:$0xff] }
  0x1a   :  { %1780 = vmatprep.subr.bf16.mxu0 %v1779_v22  ;;  %1793 = vmatprep.subr.bf16.mxu1 %v1779_v22  ;;  %v106_v17 = vld [vmem:[%s2779_s0 + $0x2e0] sm:$0xff]  ;;  %v107_v19 = vld [vmem:[%s2779_s0 + $0x2e8] sm:$0xff]  ;;  %v108_v21 = vld [vmem:[%s2779_s0 + $0x2f0] sm:$0xff] }
  0x1b   :  { %v109_v23 = vld [vmem:[%s2779_s0 + $0x2f8] sm:$0xff]  ;;  %v46_v24 = vld [vmem:[%s2779_s0 + $0x100] sm:$0xff] }
  0x1d   :  { %1782 = vmatpush3.bf16.msra.mxu0 %v1779_v22  ;;  %1801 = vmatpush3.bf16.msra.mxu1 %v1779_v22  ;;  %v45_v22 = vld [vmem:[%s2779_s0 + $0xf8] sm:$0xff] }
  0x1e   :  { %1784 = vmatprep.subr.bf16.mxu0 %v1783_v25  ;;  %1794 = vmatprep.subr.bf16.mxu1 %v1783_v25 }
  0x21   :  { %1786 = vmatpush3.bf16.msra.mxu0 %v1783_v25  ;;  %1802 = vmatpush3.bf16.msra.mxu1 %v1783_v25  ;;  %v110_v25 = vld [vmem:[%s2779_s0 + $0x300] sm:$0xff] }
  0x24   :  { %1564 = vmatmul.mubr.f32.vlgmr.msra.gmra.mrb[0].mxu0 %v15_v26  ;;  %1660 = vmatmul.mubr.f32.vlgmr.msra.gmra.mrb[0].mxu1 %v79_v27  ;;  %v47_v26 = vld [vmem:[%s2779_s0 + $0x108] sm:$0xff] }
  0x25   :  { %1566 = vmatprep.mubr.f32.mxu0 %v16_v28  ;;  %1662 = vmatprep.mubr.f32.mxu1 %v80_v29  ;;  %v111_v27 = vld [vmem:[%s2779_s0 + $0x308] sm:$0xff]  ;;  %v48_v28 = vld [vmem:[%s2779_s0 + $0x110] sm:$0xff] }
  0x26   :  { %v112_v29 = vld [vmem:[%s2779_s0 + $0x310] sm:$0xff] }
  0x28   :  { %1567 = vmatmul.mubr.f32.gmra.mrb[2].mxu0 %v17_v30  ;;  %1663 = vmatmul.mubr.f32.gmra.mrb[2].mxu1 %v81_v31  ;;  %v49_v30 = vld [vmem:[%s2779_s0 + $0x118] sm:$0xff] }
  0x29   :  { %1569 = vmatprep.mubr.f32.mxu0 %v18_v32  ;;  %1665 = vmatprep.mubr.f32.mxu1 %v82_v33  ;;  %v113_v31 = vld [vmem:[%s2779_s0 + $0x318] sm:$0xff]  ;;  %v50_v32 = vld [vmem:[%s2779_s0 + $0x120] sm:$0xff] }
  0x2a   :  { %v114_v33 = vld [vmem:[%s2779_s0 + $0x320] sm:$0xff] }
  0x2c   :  { %1570 = vmatmul.mubr.f32.gmra.mrb[4].mxu0 %v19_v34  ;;  %1666 = vmatmul.mubr.f32.gmra.mrb[4].mxu1 %v83_v35  ;;  %v51_v34 = vld [vmem:[%s2779_s0 + $0x128] sm:$0xff] }
  0x2d   :  { %1572 = vmatprep.mubr.f32.mxu0 %v20_v36  ;;  %1668 = vmatprep.mubr.f32.mxu1 %v84_v37  ;;  %v115_v35 = vld [vmem:[%s2779_s0 + $0x328] sm:$0xff]  ;;  %v52_v36 = vld [vmem:[%s2779_s0 + $0x130] sm:$0xff] }
  0x2e   :  { %v116_v37 = vld [vmem:[%s2779_s0 + $0x330] sm:$0xff] }
  0x30   :  { %1573 = vmatmul.mubr.f32.gmra.mrb[6].mxu0 %v21_v38  ;;  %1669 = vmatmul.mubr.f32.gmra.mrb[6].mxu1 %v85_v39  ;;  %v53_v38 = vld [vmem:[%s2779_s0 + $0x138] sm:$0xff] }
  0x31   :  { %1575 = vmatprep.mubr.f32.mxu0 %v22_v40  ;;  %1671 = vmatprep.mubr.f32.mxu1 %v86_v41  ;;  %v117_v39 = vld [vmem:[%s2779_s0 + $0x338] sm:$0xff]  ;;  %v54_v40 = vld [vmem:[%s2779_s0 + $0x140] sm:$0xff] }
  0x32   :  { %v118_v41 = vld [vmem:[%s2779_s0 + $0x340] sm:$0xff] }
  0x34   :  { %1576 = vmatmul.mubr.f32.gmra.mrb[8].mxu0 %v23_v42  ;;  %1672 = vmatmul.mubr.f32.gmra.mrb[8].mxu1 %v87_v43  ;;  %v55_v42 = vld [vmem:[%s2779_s0 + $0x148] sm:$0xff] }
  0x35   :  { %1578 = vmatprep.mubr.f32.mxu0 %v24_v44  ;;  %1674 = vmatprep.mubr.f32.mxu1 %v88_v45  ;;  %v119_v43 = vld [vmem:[%s2779_s0 + $0x348] sm:$0xff]  ;;  %v56_v44 = vld [vmem:[%s2779_s0 + $0x150] sm:$0xff] }
  0x36   :  { %v120_v45 = vld [vmem:[%s2779_s0 + $0x350] sm:$0xff] }
  0x38   :  { %1579 = vmatmul.mubr.f32.gmra.mrb[10].mxu0 %v25_v46  ;;  %1675 = vmatmul.mubr.f32.gmra.mrb[10].mxu1 %v89_v47  ;;  %v57_v46 = vld [vmem:[%s2779_s0 + $0x158] sm:$0xff] }
  0x39   :  { %1581 = vmatprep.mubr.f32.mxu0 %v26_v48  ;;  %1677 = vmatprep.mubr.f32.mxu1 %v90_v49  ;;  %v121_v47 = vld [vmem:[%s2779_s0 + $0x358] sm:$0xff]  ;;  %v58_v48 = vld [vmem:[%s2779_s0 + $0x160] sm:$0xff] }
  0x3a   :  { %v122_v49 = vld [vmem:[%s2779_s0 + $0x360] sm:$0xff] }
  0x3c   :  { %1582 = vmatmul.mubr.f32.gmra.mrb[12].mxu0 %v27_v50  ;;  %1678 = vmatmul.mubr.f32.gmra.mrb[12].mxu1 %v91_v51  ;;  %v59_v50 = vld [vmem:[%s2779_s0 + $0x168] sm:$0xff] }
  0x3d   :  { %1584 = vmatprep.mubr.f32.mxu0 %v28_v52  ;;  %1680 = vmatprep.mubr.f32.mxu1 %v92_v53  ;;  %v123_v51 = vld [vmem:[%s2779_s0 + $0x368] sm:$0xff]  ;;  %v60_v52 = vld [vmem:[%s2779_s0 + $0x170] sm:$0xff] }
  0x3e   :  { %v124_v53 = vld [vmem:[%s2779_s0 + $0x370] sm:$0xff] }
  0x40   :  { %1585 = vmatmul.mubr.f32.gmra.mrb[14].mxu0 %v29_v54  ;;  %1681 = vmatmul.mubr.f32.gmra.mrb[14].mxu1 %v93_v55  ;;  %v61_v54 = vld [vmem:[%s2779_s0 + $0x178] sm:$0xff] }
  0x41   :  { %1587 = vmatprep.mubr.f32.mxu0 %v30_v56  ;;  %1683 = vmatprep.mubr.f32.mxu1 %v94_v57  ;;  %v125_v55 = vld [vmem:[%s2779_s0 + $0x378] sm:$0xff]  ;;  %v62_v56 = vld [vmem:[%s2779_s0 + $0x180] sm:$0xff] }
  0x42   :  { %v126_v57 = vld [vmem:[%s2779_s0 + $0x380] sm:$0xff] }
  0x44   :  { %1588 = vmatmul.mubr.f32.gmra.mrb[16].mxu0 %v31_v58  ;;  %1684 = vmatmul.mubr.f32.gmra.mrb[16].mxu1 %v95_v59  ;;  %v63_v58 = vld [vmem:[%s2779_s0 + $0x188] sm:$0xff] }
  0x45   :  { %1590 = vmatprep.mubr.f32.mxu0 %v32_v60  ;;  %1686 = vmatprep.mubr.f32.mxu1 %v96_v61  ;;  %v127_v59 = vld [vmem:[%s2779_s0 + $0x388] sm:$0xff]  ;;  %v64_v60 = vld [vmem:[%s2779_s0 + $0x190] sm:$0xff] }
  0x46   :  { %v128_v61 = vld [vmem:[%s2779_s0 + $0x390] sm:$0xff] }
  0x48   :  { %1591 = vmatmul.mubr.f32.gmra.mrb[18].mxu0 %v33_v62  ;;  %1687 = vmatmul.mubr.f32.gmra.mrb[18].mxu1 %v97_v63  ;;  %v65_v62 = vld [vmem:[%s2779_s0 + $0x198] sm:$0xff] }
  0x49   :  { %1593 = vmatprep.mubr.f32.mxu0 %v34_v0  ;;  %1689 = vmatprep.mubr.f32.mxu1 %v98_v1  ;;  %v129_v63 = vld [vmem:[%s2779_s0 + $0x398] sm:$0xff]  ;;  %v66_v0 = vld [vmem:[%s2779_s0 + $0x1a0] sm:$0xff] }
  0x4a   :  { %v130_v1 = vld [vmem:[%s2779_s0 + $0x3a0] sm:$0xff] }
  0x4c   :  { %1594 = vmatmul.mubr.f32.gmra.mrb[20].mxu0 %v35_v2  ;;  %1690 = vmatmul.mubr.f32.gmra.mrb[20].mxu1 %v99_v3  ;;  %v67_v2 = vld [vmem:[%s2779_s0 + $0x1a8] sm:$0xff] }
  0x4d   :  { %1596 = vmatprep.mubr.f32.mxu0 %v36_v4  ;;  %1692 = vmatprep.mubr.f32.mxu1 %v100_v5  ;;  %v131_v3 = vld [vmem:[%s2779_s0 + $0x3a8] sm:$0xff]  ;;  %v68_v4 = vld [vmem:[%s2779_s0 + $0x1b0] sm:$0xff] }
  0x4e   :  { %v132_v5 = vld [vmem:[%s2779_s0 + $0x3b0] sm:$0xff] }
  0x50   :  { %1597 = vmatmul.mubr.f32.gmra.mrb[22].mxu0 %v37_v6  ;;  %1693 = vmatmul.mubr.f32.gmra.mrb[22].mxu1 %v101_v7  ;;  %v69_v6 = vld [vmem:[%s2779_s0 + $0x1b8] sm:$0xff] }
  0x51   :  { %1599 = vmatprep.mubr.f32.mxu0 %v38_v8  ;;  %1695 = vmatprep.mubr.f32.mxu1 %v102_v9  ;;  %v133_v7 = vld [vmem:[%s2779_s0 + $0x3b8] sm:$0xff]  ;;  %v70_v8 = vld [vmem:[%s2779_s0 + $0x1c0] sm:$0xff] }
  0x52   :  { %v134_v9 = vld [vmem:[%s2779_s0 + $0x3c0] sm:$0xff] }
  0x54   :  { %1600 = vmatmul.mubr.f32.gmra.mrb[24].mxu0 %v39_v10  ;;  %1696 = vmatmul.mubr.f32.gmra.mrb[24].mxu1 %v103_v11  ;;  %v71_v10 = vld [vmem:[%s2779_s0 + $0x1c8] sm:$0xff] }
  0x55   :  { %1602 = vmatprep.mubr.f32.mxu0 %v40_v12  ;;  %1698 = vmatprep.mubr.f32.mxu1 %v104_v13  ;;  %v135_v11 = vld [vmem:[%s2779_s0 + $0x3c8] sm:$0xff]  ;;  %v72_v12 = vld [vmem:[%s2779_s0 + $0x1d0] sm:$0xff] }
  0x56   :  { %v136_v13 = vld [vmem:[%s2779_s0 + $0x3d0] sm:$0xff] }
  0x58   :  { %1603 = vmatmul.mubr.f32.gmra.mrb[26].mxu0 %v41_v14  ;;  %1699 = vmatmul.mubr.f32.gmra.mrb[26].mxu1 %v105_v15  ;;  %v73_v14 = vld [vmem:[%s2779_s0 + $0x1d8] sm:$0xff] }
  0x59   :  { %1605 = vmatprep.mubr.f32.mxu0 %v42_v16  ;;  %1701 = vmatprep.mubr.f32.mxu1 %v106_v17  ;;  %v137_v15 = vld [vmem:[%s2779_s0 + $0x3d8] sm:$0xff]  ;;  %v74_v16 = vld [vmem:[%s2779_s0 + $0x1e0] sm:$0xff] }
  0x5a   :  { %v138_v17 = vld [vmem:[%s2779_s0 + $0x3e0] sm:$0xff] }
  0x5c   :  { %1606 = vmatmul.mubr.f32.gmra.mrb[28].mxu0 %v43_v18  ;;  %1702 = vmatmul.mubr.f32.gmra.mrb[28].mxu1 %v107_v19  ;;  %v75_v18 = vld [vmem:[%s2779_s0 + $0x1e8] sm:$0xff] }
  0x5d   :  { %1608 = vmatprep.mubr.f32.mxu0 %v44_v20  ;;  %1704 = vmatprep.mubr.f32.mxu1 %v108_v21  ;;  %v139_v19 = vld [vmem:[%s2779_s0 + $0x3e8] sm:$0xff]  ;;  %v76_v20 = vld [vmem:[%s2779_s0 + $0x1f0] sm:$0xff] }
  0x5e   :  { %v140_v21 = vld [vmem:[%s2779_s0 + $0x3f0] sm:$0xff] }
  0x60   :  { %1609 = vmatmul.mubr.f32.gmra.mrb[30].mxu0 %v45_v22  ;;  %1705 = vmatmul.mubr.f32.gmra.mrb[30].mxu1 %v109_v23  ;;  %v77_v22 = vld [vmem:[%s2779_s0 + $0x1f8] sm:$0xff] }
  0x61   :  { %1611 = vmatprep.mubr.f32.mxu0 %v46_v24  ;;  %1707 = vmatprep.mubr.f32.mxu1 %v110_v25  ;;  %v141_v23 = vld [vmem:[%s2779_s0 + $0x3f8] sm:$0xff]  ;;  %v2259_v24 = vld [vmem:[%s2780_s2] ss:$0 sm:$0xff] }
  0x64   :  { %1612 = vmatmul.mubr.f32.gmra.mrb[32].mxu0 %v47_v26  ;;  %1708 = vmatmul.mubr.f32.gmra.mrb[32].mxu1 %v111_v27 }
  0x65   :  { %1614 = vmatprep.mubr.f32.mxu0 %v48_v28  ;;  %1710 = vmatprep.mubr.f32.mxu1 %v112_v29 }
  0x68   :  { %1615 = vmatmul.mubr.f32.gmra.mrb[34].mxu0 %v49_v30  ;;  %1711 = vmatmul.mubr.f32.gmra.mrb[34].mxu1 %v113_v31 }
  0x69   :  { %1617 = vmatprep.mubr.f32.mxu0 %v50_v32  ;;  %1713 = vmatprep.mubr.f32.mxu1 %v114_v33 }
  0x6c   :  { %1618 = vmatmul.mubr.f32.gmra.mrb[36].mxu0 %v51_v34  ;;  %1714 = vmatmul.mubr.f32.gmra.mrb[36].mxu1 %v115_v35 }
  0x6d   :  { %1620 = vmatprep.mubr.f32.mxu0 %v52_v36  ;;  %1716 = vmatprep.mubr.f32.mxu1 %v116_v37 }
  0x70   :  { %1621 = vmatmul.mubr.f32.gmra.mrb[38].mxu0 %v53_v38  ;;  %1717 = vmatmul.mubr.f32.gmra.mrb[38].mxu1 %v117_v39 }
  0x71   :  { %1623 = vmatprep.mubr.f32.mxu0 %v54_v40  ;;  %1719 = vmatprep.mubr.f32.mxu1 %v118_v41 }
  0x74   :  { %1624 = vmatmul.mubr.f32.gmra.mrb[40].mxu0 %v55_v42  ;;  %1720 = vmatmul.mubr.f32.gmra.mrb[40].mxu1 %v119_v43 }
  0x75   :  { %1626 = vmatprep.mubr.f32.mxu0 %v56_v44  ;;  %1722 = vmatprep.mubr.f32.mxu1 %v120_v45 }
  0x78   :  { %1627 = vmatmul.mubr.f32.gmra.mrb[42].mxu0 %v57_v46  ;;  %1723 = vmatmul.mubr.f32.gmra.mrb[42].mxu1 %v121_v47 }
  0x79   :  { %1629 = vmatprep.mubr.f32.mxu0 %v58_v48  ;;  %1725 = vmatprep.mubr.f32.mxu1 %v122_v49 }
  0x7c   :  { %1630 = vmatmul.mubr.f32.gmra.mrb[44].mxu0 %v59_v50  ;;  %1726 = vmatmul.mubr.f32.gmra.mrb[44].mxu1 %v123_v51 }
  0x7d   :  { %1632 = vmatprep.mubr.f32.mxu0 %v60_v52  ;;  %1728 = vmatprep.mubr.f32.mxu1 %v124_v53 }
  0x80   :  { %1633 = vmatmul.mubr.f32.gmra.mrb[46].mxu0 %v61_v54  ;;  %1729 = vmatmul.mubr.f32.gmra.mrb[46].mxu1 %v125_v55 }
  0x81   :  { %1635 = vmatprep.mubr.f32.mxu0 %v62_v56  ;;  %1731 = vmatprep.mubr.f32.mxu1 %v126_v57 }
  0x84   :  { %1636 = vmatmul.mubr.f32.gmra.mrb[48].mxu0 %v63_v58  ;;  %1732 = vmatmul.mubr.f32.gmra.mrb[48].mxu1 %v127_v59 }
  0x85   :  { %1638 = vmatprep.mubr.f32.mxu0 %v64_v60  ;;  %1734 = vmatprep.mubr.f32.mxu1 %v128_v61 }
  0x88   :  { %1639 = vmatmul.mubr.f32.gmra.mrb[50].mxu0 %v65_v62  ;;  %1735 = vmatmul.mubr.f32.gmra.mrb[50].mxu1 %v129_v63 }
  0x89   :  { %1641 = vmatprep.mubr.f32.mxu0 %v66_v0  ;;  %1737 = vmatprep.mubr.f32.mxu1 %v130_v1 }
  0x8c   :  { %1642 = vmatmul.mubr.f32.gmra.mrb[52].mxu0 %v67_v2  ;;  %1738 = vmatmul.mubr.f32.gmra.mrb[52].mxu1 %v131_v3 }
  0x8d   :  { %1644 = vmatprep.mubr.f32.mxu0 %v68_v4  ;;  %1740 = vmatprep.mubr.f32.mxu1 %v132_v5 }
  0x90   :  { %1645 = vmatmul.mubr.f32.gmra.mrb[54].mxu0 %v69_v6  ;;  %1741 = vmatmul.mubr.f32.gmra.mrb[54].mxu1 %v133_v7 }
  0x91   :  { %1647 = vmatprep.mubr.f32.mxu0 %v70_v8  ;;  %1743 = vmatprep.mubr.f32.mxu1 %v134_v9 }
  0x94   :  { %1648 = vmatmul.mubr.f32.gmra.mrb[56].mxu0 %v71_v10  ;;  %1744 = vmatmul.mubr.f32.gmra.mrb[56].mxu1 %v135_v11 }
  0x95   :  { %1650 = vmatprep.mubr.f32.mxu0 %v72_v12  ;;  %1746 = vmatprep.mubr.f32.mxu1 %v136_v13 }
  0x98   :  { %1651 = vmatmul.mubr.f32.gmra.mrb[58].mxu0 %v73_v14  ;;  %1747 = vmatmul.mubr.f32.gmra.mrb[58].mxu1 %v137_v15 }
  0x99   :  { %1653 = vmatprep.mubr.f32.mxu0 %v74_v16  ;;  %1749 = vmatprep.mubr.f32.mxu1 %v138_v17 }
  0x9c   :  { %1654 = vmatmul.mubr.f32.gmra.mrb[60].mxu0 %v75_v18  ;;  %1750 = vmatmul.mubr.f32.gmra.mrb[60].mxu1 %v139_v19 }
  0x9d   :  { %1656 = vmatprep.mubr.f32.mxu0 %v76_v20  ;;  %1752 = vmatprep.mubr.f32.mxu1 %v140_v21 }
  0xa0   :  { %1657 = vmatmul.mubr.f32.gmra.mrb[62].mxu0 %v77_v22  ;;  %1753 = vmatmul.mubr.f32.gmra.mrb[62].mxu1 %v141_v23 }
  0xf7   :  { %v1565_v25 = vpop.f32.mrb[0].mxu0  ;;  %v1661_v26 = vpop.f32.mrb[0].mxu1 }
  0xf8   :  { %v237_v27 = vadd.f32 %v1565_v25, %v2259_v24  ;;  %v557_v28 = vadd.f32 %v1661_v26, %v2259_v24  ;;  %v231_v29 = vpop.f32.mrb[1].mxu0  ;;  %v551_v30 = vpop.f32.mrb[1].mxu1 }
  0xf9   :  { %v232_v31 = vadd.f32 %v2259_v24, %v231_v29  ;;  %v552_v32 = vadd.f32 %v2259_v24, %v551_v30 }
  0xfa   :  { %vm871_vm0 = vcmp.ge.f32.partialorder %v237_v27, 0.0  ;;  %v999_v33 = vmul.f32 0.2, %v237_v27  ;;  %vm935_vm1 = vcmp.ge.f32.partialorder %v557_v28, 0.0  ;;  %v1063_v34 = vmul.f32 0.2, %v557_v28 }
  0xfb   :  { %vm870_vm2 = vcmp.ge.f32.partialorder %v232_v31, 0.0  ;;  %v998_v35 = vmul.f32 0.2, %v232_v31  ;;  %vm934_vm3 = vcmp.ge.f32.partialorder %v552_v32, 0.0  ;;  %v1062_v36 = vmul.f32 0.2, %v552_v32 }
  0xfc   :  { %v1127_v37 = vsel %vm871_vm0, %v237_v27, %v999_v33  ;;  %v1191_v38 = vsel %vm935_vm1, %v557_v28, %v1063_v34  ;;  %v1568_v39 = vpop.f32.mrb[2].mxu0  ;;  %v1664_v40 = vpop.f32.mrb[2].mxu1 }
  0xfd   :  { %1255 = vst [vmem:[%s2781_s3 + $0x8] sm:$0xff] %v1127_v37  ;;  %1319 = vst [vmem:[%s2781_s3 + $0x208] sm:$0xff] %v1191_v38  ;;  %v1126_v41 = vsel %vm870_vm2, %v232_v31, %v998_v35  ;;  %v1190_v42 = vsel %vm934_vm3, %v552_v32, %v1062_v36  ;;  %v247_v43 = vadd.f32 %v1568_v39, %v2259_v24  ;;  %v241_v45 = vpop.f32.mrb[3].mxu0  ;;  %v561_v46 = vpop.f32.mrb[3].mxu1 }
  0xfe   :  { %v567_v44 = vadd.f32 %v1664_v40, %v2259_v24  ;;  %1254 = vst [vmem:[%s2781_s3] sm:$0xff] %v1126_v41  ;;  %1318 = vst [vmem:[%s2781_s3 + $0x200] sm:$0xff] %v1190_v42  ;;  %v242_v47 = vadd.f32 %v2259_v24, %v241_v45  ;;  %v562_v48 = vadd.f32 %v2259_v24, %v561_v46 }
  0xff   :  { %vm873_vm4 = vcmp.ge.f32.partialorder %v247_v43, 0.0  ;;  %v1001_v49 = vmul.f32 0.2, %v247_v43  ;;  %v1571_v55 = vpop.f32.mrb[4].mxu0  ;;  %v1667_v56 = vpop.f32.mrb[4].mxu1 }
 0x100   :  { %vm937_vm5 = vcmp.ge.f32.partialorder %v567_v44, 0.0  ;;  %v1065_v50 = vmul.f32 0.2, %v567_v44  ;;  %vm872_vm6 = vcmp.ge.f32.partialorder %v242_v47, 0.0  ;;  %v1000_v51 = vmul.f32 0.2, %v242_v47 }
 0x101   :  { %vm936_vm7 = vcmp.ge.f32.partialorder %v562_v48, 0.0  ;;  %v1064_v52 = vmul.f32 0.2, %v562_v48  ;;  %v1129_v53 = vsel %vm873_vm4, %v247_v43, %v1001_v49  ;;  %v257_v59 = vadd.f32 %v1571_v55, %v2259_v24  ;;  %v251_v61 = vpop.f32.mrb[5].mxu0  ;;  %v571_v62 = vpop.f32.mrb[5].mxu1 }
 0x102   :  { %v1193_v54 = vsel %vm937_vm5, %v567_v44, %v1065_v50  ;;  %1257 = vst [vmem:[%s2781_s3 + $0x18] sm:$0xff] %v1129_v53  ;;  %v1128_v57 = vsel %vm872_vm6, %v242_v47, %v1000_v51  ;;  %v577_v60 = vadd.f32 %v1667_v56, %v2259_v24  ;;  %v252_v63 = vadd.f32 %v2259_v24, %v251_v61 }
 0x103   :  { %1321 = vst [vmem:[%s2781_s3 + $0x218] sm:$0xff] %v1193_v54  ;;  %v1192_v58 = vsel %vm936_vm7, %v562_v48, %v1064_v52  ;;  %1256 = vst [vmem:[%s2781_s3 + $0x10] sm:$0xff] %v1128_v57  ;;  %v572_v0 = vadd.f32 %v2259_v24, %v571_v62  ;;  %v1574_v1 = vpop.f32.mrb[6].mxu0  ;;  %v1670_v2 = vpop.f32.mrb[6].mxu1  ;;  %vm875_vm8 = vcmp.ge.f32.partialorder %v257_v59, 0.0 }
 0x104   :  { %1320 = vst [vmem:[%s2781_s3 + $0x210] sm:$0xff] %v1192_v58  ;;  %v1003_v3 = vmul.f32 0.2, %v257_v59  ;;  %vm939_vm9 = vcmp.ge.f32.partialorder %v577_v60, 0.0  ;;  %v1067_v4 = vmul.f32 0.2, %v577_v60  ;;  %v267_v9 = vadd.f32 %v1574_v1, %v2259_v24 }
 0x105   :  { %vm874_vm10 = vcmp.ge.f32.partialorder %v252_v63, 0.0  ;;  %v1002_v5 = vmul.f32 0.2, %v252_v63  ;;  %vm938_vm11 = vcmp.ge.f32.partialorder %v572_v0, 0.0  ;;  %v1066_v6 = vmul.f32 0.2, %v572_v0 }
 0x106   :  { %v1131_v7 = vsel %vm875_vm8, %v257_v59, %v1003_v3  ;;  %v1195_v8 = vsel %vm939_vm9, %v577_v60, %v1067_v4  ;;  %v587_v10 = vadd.f32 %v1670_v2, %v2259_v24  ;;  %v261_v11 = vpop.f32.mrb[7].mxu0  ;;  %v581_v12 = vpop.f32.mrb[7].mxu1  ;;  %vm877_vm12 = vcmp.ge.f32.partialorder %v267_v9, 0.0 }
 0x107   :  { %1259 = vst [vmem:[%s2781_s3 + $0x28] sm:$0xff] %v1131_v7  ;;  %1323 = vst [vmem:[%s2781_s3 + $0x228] sm:$0xff] %v1195_v8  ;;  %v1130_v13 = vsel %vm874_vm10, %v252_v63, %v1002_v5  ;;  %v1194_v14 = vsel %vm938_vm11, %v572_v0, %v1066_v6  ;;  %v262_v15 = vadd.f32 %v2259_v24, %v261_v11  ;;  %v1577_v17 = vpop.f32.mrb[8].mxu0  ;;  %v1673_v18 = vpop.f32.mrb[8].mxu1  ;;  %v1005_v19 = vmul.f32 0.2, %v267_v9 }
 0x108   :  { %v582_v16 = vadd.f32 %v2259_v24, %v581_v12  ;;  %1258 = vst [vmem:[%s2781_s3 + $0x20] sm:$0xff] %v1130_v13  ;;  %1322 = vst [vmem:[%s2781_s3 + $0x220] sm:$0xff] %v1194_v14  ;;  %vm941_vm13 = vcmp.ge.f32.partialorder %v587_v10, 0.0  ;;  %v1069_v20 = vmul.f32 0.2, %v587_v10  ;;  %v277_v26 = vadd.f32 %v1577_v17, %v2259_v24  ;;  %v271_v28 = vpop.f32.mrb[9].mxu0 }
 0x109   :  { %vm876_vm14 = vcmp.ge.f32.partialorder %v262_v15, 0.0  ;;  %v1004_v21 = vmul.f32 0.2, %v262_v15  ;;  %v1133_v23 = vsel %vm877_vm12, %v267_v9, %v1005_v19  ;;  %v597_v27 = vadd.f32 %v1673_v18, %v2259_v24  ;;  %v591_v29 = vpop.f32.mrb[9].mxu1 }
 0x10a   :  { %vm940_vm15 = vcmp.ge.f32.partialorder %v582_v16, 0.0  ;;  %v1068_v22 = vmul.f32 0.2, %v582_v16  ;;  %v1197_v25 = vsel %vm941_vm13, %v587_v10, %v1069_v20  ;;  %1261 = vst [vmem:[%s2781_s3 + $0x38] sm:$0xff] %v1133_v23  ;;  %v272_v32 = vadd.f32 %v2259_v24, %v271_v28 }
 0x10b   :  { %1325 = vst [vmem:[%s2781_s3 + $0x238] sm:$0xff] %v1197_v25  ;;  %v1132_v30 = vsel %vm876_vm14, %v262_v15, %v1004_v21  ;;  %v592_v33 = vadd.f32 %v2259_v24, %v591_v29  ;;  %v1580_v34 = vpop.f32.mrb[10].mxu0  ;;  %v1676_v35 = vpop.f32.mrb[10].mxu1  ;;  %vm879_vm0 = vcmp.ge.f32.partialorder %v277_v26, 0.0  ;;  %v1007_v36 = vmul.f32 0.2, %v277_v26 }
 0x10c   :  { %v1196_v31 = vsel %vm940_vm15, %v582_v16, %v1068_v22  ;;  %1260 = vst [vmem:[%s2781_s3 + $0x30] sm:$0xff] %v1132_v30  ;;  %vm943_vm1 = vcmp.ge.f32.partialorder %v597_v27, 0.0  ;;  %v1071_v37 = vmul.f32 0.2, %v597_v27  ;;  %vm878_vm2 = vcmp.ge.f32.partialorder %v272_v32, 0.0  ;;  %v281_v44 = vpop.f32.mrb[11].mxu0 }
 0x10d   :  { %1324 = vst [vmem:[%s2781_s3 + $0x230] sm:$0xff] %v1196_v31  ;;  %v1006_v38 = vmul.f32 0.2, %v272_v32  ;;  %vm942_vm3 = vcmp.ge.f32.partialorder %v592_v33, 0.0  ;;  %v1070_v39 = vmul.f32 0.2, %v592_v33  ;;  %v1135_v40 = vsel %vm879_vm0, %v277_v26, %v1007_v36 }
 0x10e   :  { %v1199_v41 = vsel %vm943_vm1, %v597_v27, %v1071_v37  ;;  %v287_v42 = vadd.f32 %v1580_v34, %v2259_v24  ;;  %v607_v43 = vadd.f32 %v1676_v35, %v2259_v24  ;;  %v601_v45 = vpop.f32.mrb[11].mxu1  ;;  %1263 = vst [vmem:[%s2781_s3 + $0x48] sm:$0xff] %v1135_v40  ;;  %v282_v48 = vadd.f32 %v2259_v24, %v281_v44 }
 0x10f   :  { %1327 = vst [vmem:[%s2781_s3 + $0x248] sm:$0xff] %v1199_v41  ;;  %v1134_v46 = vsel %vm878_vm2, %v272_v32, %v1006_v38  ;;  %v1198_v47 = vsel %vm942_vm3, %v592_v33, %v1070_v39  ;;  %v602_v49 = vadd.f32 %v2259_v24, %v601_v45  ;;  %v1583_v50 = vpop.f32.mrb[12].mxu0  ;;  %v1679_v51 = vpop.f32.mrb[12].mxu1 }
 0x110   :  { %1262 = vst [vmem:[%s2781_s3 + $0x40] sm:$0xff] %v1134_v46  ;;  %1326 = vst [vmem:[%s2781_s3 + $0x240] sm:$0xff] %v1198_v47  ;;  %vm881_vm4 = vcmp.ge.f32.partialorder %v287_v42, 0.0  ;;  %v1009_v52 = vmul.f32 0.2, %v287_v42  ;;  %vm945_vm5 = vcmp.ge.f32.partialorder %v607_v43, 0.0  ;;  %v297_v58 = vadd.f32 %v1583_v50, %v2259_v24 }
 0x111   :  { %v1073_v53 = vmul.f32 0.2, %v607_v43  ;;  %vm880_vm6 = vcmp.ge.f32.partialorder %v282_v48, 0.0  ;;  %v1008_v54 = vmul.f32 0.2, %v282_v48  ;;  %vm944_vm7 = vcmp.ge.f32.partialorder %v602_v49, 0.0 }
 0x112   :  { %v1072_v55 = vmul.f32 0.2, %v602_v49  ;;  %v1137_v56 = vsel %vm881_vm4, %v287_v42, %v1009_v52  ;;  %v617_v59 = vadd.f32 %v1679_v51, %v2259_v24  ;;  %v291_v60 = vpop.f32.mrb[13].mxu0  ;;  %v611_v61 = vpop.f32.mrb[13].mxu1  ;;  %vm883_vm8 = vcmp.ge.f32.partialorder %v297_v58, 0.0 }
 0x113   :  { %v1201_v57 = vsel %vm945_vm5, %v607_v43, %v1073_v53  ;;  %1265 = vst [vmem:[%s2781_s3 + $0x58] sm:$0xff] %v1137_v56  ;;  %v1136_v62 = vsel %vm880_vm6, %v282_v48, %v1008_v54  ;;  %v292_v0 = vadd.f32 %v2259_v24, %v291_v60  ;;  %v612_v1 = vadd.f32 %v2259_v24, %v611_v61  ;;  %v1586_v2 = vpop.f32.mrb[14].mxu0  ;;  %v1682_v3 = vpop.f32.mrb[14].mxu1 }
 0x114   :  { %1329 = vst [vmem:[%s2781_s3 + $0x258] sm:$0xff] %v1201_v57  ;;  %v1200_v63 = vsel %vm944_vm7, %v602_v49, %v1072_v55  ;;  %1264 = vst [vmem:[%s2781_s3 + $0x50] sm:$0xff] %v1136_v62  ;;  %v1011_v4 = vmul.f32 0.2, %v297_v58  ;;  %vm947_vm9 = vcmp.ge.f32.partialorder %v617_v59, 0.0  ;;  %v307_v10 = vadd.f32 %v1586_v2, %v2259_v24  ;;  %v301_v12 = vpop.f32.mrb[15].mxu0 }
 0x115   :  { %1328 = vst [vmem:[%s2781_s3 + $0x250] sm:$0xff] %v1200_v63  ;;  %v1075_v5 = vmul.f32 0.2, %v617_v59  ;;  %vm882_vm10 = vcmp.ge.f32.partialorder %v292_v0, 0.0  ;;  %v1010_v6 = vmul.f32 0.2, %v292_v0  ;;  %v627_v11 = vadd.f32 %v1682_v3, %v2259_v24 }
 0x116   :  { %vm946_vm11 = vcmp.ge.f32.partialorder %v612_v1, 0.0  ;;  %v1074_v7 = vmul.f32 0.2, %v612_v1  ;;  %v1139_v8 = vsel %vm883_vm8, %v297_v58, %v1011_v4  ;;  %v621_v13 = vpop.f32.mrb[15].mxu1  ;;  %v302_v16 = vadd.f32 %v2259_v24, %v301_v12 }
 0x117   :  { %v1203_v9 = vsel %vm947_vm9, %v617_v59, %v1075_v5  ;;  %1267 = vst [vmem:[%s2781_s3 + $0x68] sm:$0xff] %v1139_v8  ;;  %v1138_v14 = vsel %vm882_vm10, %v292_v0, %v1010_v6  ;;  %v622_v17 = vadd.f32 %v2259_v24, %v621_v13  ;;  %v1589_v18 = vpop.f32.mrb[16].mxu0  ;;  %v1685_v19 = vpop.f32.mrb[16].mxu1  ;;  %vm885_vm12 = vcmp.ge.f32.partialorder %v307_v10, 0.0 }
 0x118   :  { %1331 = vst [vmem:[%s2781_s3 + $0x268] sm:$0xff] %v1203_v9  ;;  %v1202_v15 = vsel %vm946_vm11, %v612_v1, %v1074_v7  ;;  %1266 = vst [vmem:[%s2781_s3 + $0x60] sm:$0xff] %v1138_v14  ;;  %v1013_v20 = vmul.f32 0.2, %v307_v10  ;;  %vm949_vm13 = vcmp.ge.f32.partialorder %v627_v11, 0.0  ;;  %vm884_vm14 = vcmp.ge.f32.partialorder %v302_v16, 0.0 }
 0x119   :  { %1330 = vst [vmem:[%s2781_s3 + $0x260] sm:$0xff] %v1202_v15  ;;  %v1077_v21 = vmul.f32 0.2, %v627_v11  ;;  %v1012_v22 = vmul.f32 0.2, %v302_v16  ;;  %vm948_vm15 = vcmp.ge.f32.partialorder %v622_v17, 0.0  ;;  %v317_v27 = vadd.f32 %v1589_v18, %v2259_v24 }
 0x11a   :  { %v1076_v23 = vmul.f32 0.2, %v622_v17  ;;  %v1141_v25 = vsel %vm885_vm12, %v307_v10, %v1013_v20  ;;  %v637_v28 = vadd.f32 %v1685_v19, %v2259_v24  ;;  %v311_v29 = vpop.f32.mrb[17].mxu0  ;;  %v631_v30 = vpop.f32.mrb[17].mxu1 }
 0x11b   :  { %v1205_v26 = vsel %vm949_vm13, %v627_v11, %v1077_v21  ;;  %1269 = vst [vmem:[%s2781_s3 + $0x78] sm:$0xff] %v1141_v25  ;;  %v1140_v31 = vsel %vm884_vm14, %v302_v16, %v1012_v22  ;;  %v312_v33 = vadd.f32 %v2259_v24, %v311_v29  ;;  %v632_v34 = vadd.f32 %v2259_v24, %v631_v30  ;;  %v1592_v35 = vpop.f32.mrb[18].mxu0  ;;  %v1688_v36 = vpop.f32.mrb[18].mxu1 }
 0x11c   :  { %1333 = vst [vmem:[%s2781_s3 + $0x278] sm:$0xff] %v1205_v26  ;;  %v1204_v32 = vsel %vm948_vm15, %v622_v17, %v1076_v23  ;;  %1268 = vst [vmem:[%s2781_s3 + $0x70] sm:$0xff] %v1140_v31  ;;  %vm887_vm0 = vcmp.ge.f32.partialorder %v317_v27, 0.0  ;;  %v1015_v37 = vmul.f32 0.2, %v317_v27  ;;  %vm951_vm1 = vcmp.ge.f32.partialorder %v637_v28, 0.0 }
 0x11d   :  { %1332 = vst [vmem:[%s2781_s3 + $0x270] sm:$0xff] %v1204_v32  ;;  %v1079_v38 = vmul.f32 0.2, %v637_v28  ;;  %vm886_vm2 = vcmp.ge.f32.partialorder %v312_v33, 0.0  ;;  %v1014_v39 = vmul.f32 0.2, %v312_v33  ;;  %v327_v43 = vadd.f32 %v1592_v35, %v2259_v24 }
 0x11e   :  { %vm950_vm3 = vcmp.ge.f32.partialorder %v632_v34, 0.0  ;;  %v1078_v40 = vmul.f32 0.2, %v632_v34  ;;  %v1143_v41 = vsel %vm887_vm0, %v317_v27, %v1015_v37  ;;  %v647_v44 = vadd.f32 %v1688_v36, %v2259_v24  ;;  %v321_v45 = vpop.f32.mrb[19].mxu0  ;;  %v641_v46 = vpop.f32.mrb[19].mxu1 }
 0x11f   :  { %v1207_v42 = vsel %vm951_vm1, %v637_v28, %v1079_v38  ;;  %1271 = vst [vmem:[%s2781_s3 + $0x88] sm:$0xff] %v1143_v41  ;;  %v1142_v47 = vsel %vm886_vm2, %v312_v33, %v1014_v39  ;;  %v322_v49 = vadd.f32 %v2259_v24, %v321_v45  ;;  %v642_v50 = vadd.f32 %v2259_v24, %v641_v46  ;;  %v1595_v51 = vpop.f32.mrb[20].mxu0  ;;  %v1691_v52 = vpop.f32.mrb[20].mxu1 }
 0x120   :  { %1335 = vst [vmem:[%s2781_s3 + $0x288] sm:$0xff] %v1207_v42  ;;  %v1206_v48 = vsel %vm950_vm3, %v632_v34, %v1078_v40  ;;  %1270 = vst [vmem:[%s2781_s3 + $0x80] sm:$0xff] %v1142_v47  ;;  %vm889_vm4 = vcmp.ge.f32.partialorder %v327_v43, 0.0  ;;  %v1017_v53 = vmul.f32 0.2, %v327_v43  ;;  %vm953_vm5 = vcmp.ge.f32.partialorder %v647_v44, 0.0 }
 0x121   :  { %1334 = vst [vmem:[%s2781_s3 + $0x280] sm:$0xff] %v1206_v48  ;;  %v1081_v54 = vmul.f32 0.2, %v647_v44  ;;  %vm888_vm6 = vcmp.ge.f32.partialorder %v322_v49, 0.0  ;;  %v1016_v55 = vmul.f32 0.2, %v322_v49  ;;  %v337_v59 = vadd.f32 %v1595_v51, %v2259_v24 }
 0x122   :  { %vm952_vm7 = vcmp.ge.f32.partialorder %v642_v50, 0.0  ;;  %v1080_v56 = vmul.f32 0.2, %v642_v50  ;;  %v1145_v57 = vsel %vm889_vm4, %v327_v43, %v1017_v53  ;;  %v657_v60 = vadd.f32 %v1691_v52, %v2259_v24  ;;  %v331_v61 = vpop.f32.mrb[21].mxu0  ;;  %v651_v62 = vpop.f32.mrb[21].mxu1 }
 0x123   :  { %v1209_v58 = vsel %vm953_vm5, %v647_v44, %v1081_v54  ;;  %1273 = vst [vmem:[%s2781_s3 + $0x98] sm:$0xff] %v1145_v57  ;;  %v1144_v63 = vsel %vm888_vm6, %v322_v49, %v1016_v55  ;;  %v332_v1 = vadd.f32 %v2259_v24, %v331_v61  ;;  %v652_v2 = vadd.f32 %v2259_v24, %v651_v62  ;;  %v1598_v3 = vpop.f32.mrb[22].mxu0  ;;  %v1694_v4 = vpop.f32.mrb[22].mxu1 }
 0x124   :  { %1337 = vst [vmem:[%s2781_s3 + $0x298] sm:$0xff] %v1209_v58  ;;  %v1208_v0 = vsel %vm952_vm7, %v642_v50, %v1080_v56  ;;  %1272 = vst [vmem:[%s2781_s3 + $0x90] sm:$0xff] %v1144_v63  ;;  %vm891_vm8 = vcmp.ge.f32.partialorder %v337_v59, 0.0  ;;  %v1019_v5 = vmul.f32 0.2, %v337_v59  ;;  %vm955_vm9 = vcmp.ge.f32.partialorder %v657_v60, 0.0 }
 0x125   :  { %1336 = vst [vmem:[%s2781_s3 + $0x290] sm:$0xff] %v1208_v0  ;;  %v1083_v6 = vmul.f32 0.2, %v657_v60  ;;  %vm890_vm10 = vcmp.ge.f32.partialorder %v332_v1, 0.0  ;;  %v1018_v7 = vmul.f32 0.2, %v332_v1  ;;  %v347_v11 = vadd.f32 %v1598_v3, %v2259_v24 }
 0x126   :  { %vm954_vm11 = vcmp.ge.f32.partialorder %v652_v2, 0.0  ;;  %v1082_v8 = vmul.f32 0.2, %v652_v2  ;;  %v1147_v9 = vsel %vm891_vm8, %v337_v59, %v1019_v5  ;;  %v667_v12 = vadd.f32 %v1694_v4, %v2259_v24  ;;  %v341_v13 = vpop.f32.mrb[23].mxu0  ;;  %v661_v14 = vpop.f32.mrb[23].mxu1 }
 0x127   :  { %v1211_v10 = vsel %vm955_vm9, %v657_v60, %v1083_v6  ;;  %1275 = vst [vmem:[%s2781_s3 + $0xa8] sm:$0xff] %v1147_v9  ;;  %v1146_v15 = vsel %vm890_vm10, %v332_v1, %v1018_v7  ;;  %v342_v17 = vadd.f32 %v2259_v24, %v341_v13  ;;  %v662_v18 = vadd.f32 %v2259_v24, %v661_v14  ;;  %v1601_v19 = vpop.f32.mrb[24].mxu0  ;;  %v1697_v20 = vpop.f32.mrb[24].mxu1 }
 0x128   :  { %1339 = vst [vmem:[%s2781_s3 + $0x2a8] sm:$0xff] %v1211_v10  ;;  %v1210_v16 = vsel %vm954_vm11, %v652_v2, %v1082_v8  ;;  %1274 = vst [vmem:[%s2781_s3 + $0xa0] sm:$0xff] %v1146_v15  ;;  %vm893_vm12 = vcmp.ge.f32.partialorder %v347_v11, 0.0  ;;  %v1021_v21 = vmul.f32 0.2, %v347_v11  ;;  %vm957_vm13 = vcmp.ge.f32.partialorder %v667_v12, 0.0 }
 0x129   :  { %1338 = vst [vmem:[%s2781_s3 + $0x2a0] sm:$0xff] %v1210_v16  ;;  %v1085_v22 = vmul.f32 0.2, %v667_v12  ;;  %vm892_vm14 = vcmp.ge.f32.partialorder %v342_v17, 0.0  ;;  %v1020_v23 = vmul.f32 0.2, %v342_v17  ;;  %v357_v28 = vadd.f32 %v1601_v19, %v2259_v24 }
 0x12a   :  { %vm956_vm15 = vcmp.ge.f32.partialorder %v662_v18, 0.0  ;;  %v1084_v25 = vmul.f32 0.2, %v662_v18  ;;  %v1149_v26 = vsel %vm893_vm12, %v347_v11, %v1021_v21  ;;  %v677_v29 = vadd.f32 %v1697_v20, %v2259_v24  ;;  %v351_v30 = vpop.f32.mrb[25].mxu0  ;;  %v671_v31 = vpop.f32.mrb[25].mxu1 }
 0x12b   :  { %v1213_v27 = vsel %vm957_vm13, %v667_v12, %v1085_v22  ;;  %1277 = vst [vmem:[%s2781_s3 + $0xb8] sm:$0xff] %v1149_v26  ;;  %v1148_v32 = vsel %vm892_vm14, %v342_v17, %v1020_v23  ;;  %v352_v34 = vadd.f32 %v2259_v24, %v351_v30  ;;  %v672_v35 = vadd.f32 %v2259_v24, %v671_v31  ;;  %v1604_v36 = vpop.f32.mrb[26].mxu0  ;;  %v1700_v37 = vpop.f32.mrb[26].mxu1 }
 0x12c   :  { %1341 = vst [vmem:[%s2781_s3 + $0x2b8] sm:$0xff] %v1213_v27  ;;  %v1212_v33 = vsel %vm956_vm15, %v662_v18, %v1084_v25  ;;  %1276 = vst [vmem:[%s2781_s3 + $0xb0] sm:$0xff] %v1148_v32  ;;  %vm895_vm0 = vcmp.ge.f32.partialorder %v357_v28, 0.0  ;;  %v1023_v38 = vmul.f32 0.2, %v357_v28  ;;  %vm959_vm1 = vcmp.ge.f32.partialorder %v677_v29, 0.0 }
 0x12d   :  { %1340 = vst [vmem:[%s2781_s3 + $0x2b0] sm:$0xff] %v1212_v33  ;;  %v1087_v39 = vmul.f32 0.2, %v677_v29  ;;  %vm894_vm2 = vcmp.ge.f32.partialorder %v352_v34, 0.0  ;;  %v1022_v40 = vmul.f32 0.2, %v352_v34  ;;  %v367_v44 = vadd.f32 %v1604_v36, %v2259_v24 }
 0x12e   :  { %vm958_vm3 = vcmp.ge.f32.partialorder %v672_v35, 0.0  ;;  %v1086_v41 = vmul.f32 0.2, %v672_v35  ;;  %v1151_v42 = vsel %vm895_vm0, %v357_v28, %v1023_v38  ;;  %v687_v45 = vadd.f32 %v1700_v37, %v2259_v24  ;;  %v361_v46 = vpop.f32.mrb[27].mxu0  ;;  %v681_v47 = vpop.f32.mrb[27].mxu1 }
 0x12f   :  { %v1215_v43 = vsel %vm959_vm1, %v677_v29, %v1087_v39  ;;  %1279 = vst [vmem:[%s2781_s3 + $0xc8] sm:$0xff] %v1151_v42  ;;  %v1150_v48 = vsel %vm894_vm2, %v352_v34, %v1022_v40  ;;  %v362_v50 = vadd.f32 %v2259_v24, %v361_v46  ;;  %v682_v51 = vadd.f32 %v2259_v24, %v681_v47  ;;  %v1607_v52 = vpop.f32.mrb[28].mxu0  ;;  %v1703_v53 = vpop.f32.mrb[28].mxu1 }
 0x130   :  { %1343 = vst [vmem:[%s2781_s3 + $0x2c8] sm:$0xff] %v1215_v43  ;;  %v1214_v49 = vsel %vm958_vm3, %v672_v35, %v1086_v41  ;;  %1278 = vst [vmem:[%s2781_s3 + $0xc0] sm:$0xff] %v1150_v48  ;;  %vm897_vm4 = vcmp.ge.f32.partialorder %v367_v44, 0.0  ;;  %v1025_v54 = vmul.f32 0.2, %v367_v44  ;;  %vm961_vm5 = vcmp.ge.f32.partialorder %v687_v45, 0.0 }
 0x131   :  { %1342 = vst [vmem:[%s2781_s3 + $0x2c0] sm:$0xff] %v1214_v49  ;;  %v1089_v55 = vmul.f32 0.2, %v687_v45  ;;  %vm896_vm6 = vcmp.ge.f32.partialorder %v362_v50, 0.0  ;;  %v1024_v56 = vmul.f32 0.2, %v362_v50  ;;  %v377_v60 = vadd.f32 %v1607_v52, %v2259_v24 }
 0x132   :  { %vm960_vm7 = vcmp.ge.f32.partialorder %v682_v51, 0.0  ;;  %v1088_v57 = vmul.f32 0.2, %v682_v51  ;;  %v1153_v58 = vsel %vm897_vm4, %v367_v44, %v1025_v54  ;;  %v697_v61 = vadd.f32 %v1703_v53, %v2259_v24  ;;  %v371_v62 = vpop.f32.mrb[29].mxu0  ;;  %v691_v63 = vpop.f32.mrb[29].mxu1 }
 0x133   :  { %v1217_v59 = vsel %vm961_vm5, %v687_v45, %v1089_v55  ;;  %1281 = vst [vmem:[%s2781_s3 + $0xd8] sm:$0xff] %v1153_v58  ;;  %v1152_v0 = vsel %vm896_vm6, %v362_v50, %v1024_v56  ;;  %v372_v2 = vadd.f32 %v2259_v24, %v371_v62  ;;  %v692_v3 = vadd.f32 %v2259_v24, %v691_v63  ;;  %v1610_v4 = vpop.f32.mrb[30].mxu0  ;;  %v1706_v5 = vpop.f32.mrb[30].mxu1 }
 0x134   :  { %1345 = vst [vmem:[%s2781_s3 + $0x2d8] sm:$0xff] %v1217_v59  ;;  %v1216_v1 = vsel %vm960_vm7, %v682_v51, %v1088_v57  ;;  %1280 = vst [vmem:[%s2781_s3 + $0xd0] sm:$0xff] %v1152_v0  ;;  %vm899_vm8 = vcmp.ge.f32.partialorder %v377_v60, 0.0  ;;  %v1027_v6 = vmul.f32 0.2, %v377_v60  ;;  %vm963_vm9 = vcmp.ge.f32.partialorder %v697_v61, 0.0 }
 0x135   :  { %1344 = vst [vmem:[%s2781_s3 + $0x2d0] sm:$0xff] %v1216_v1  ;;  %v1091_v7 = vmul.f32 0.2, %v697_v61  ;;  %vm898_vm10 = vcmp.ge.f32.partialorder %v372_v2, 0.0  ;;  %v1026_v8 = vmul.f32 0.2, %v372_v2  ;;  %v387_v12 = vadd.f32 %v1610_v4, %v2259_v24 }
 0x136   :  { %vm962_vm11 = vcmp.ge.f32.partialorder %v692_v3, 0.0  ;;  %v1090_v9 = vmul.f32 0.2, %v692_v3  ;;  %v1155_v10 = vsel %vm899_vm8, %v377_v60, %v1027_v6  ;;  %v707_v13 = vadd.f32 %v1706_v5, %v2259_v24  ;;  %v381_v14 = vpop.f32.mrb[31].mxu0  ;;  %v701_v15 = vpop.f32.mrb[31].mxu1 }
 0x137   :  { %v1219_v11 = vsel %vm963_vm9, %v697_v61, %v1091_v7  ;;  %1283 = vst [vmem:[%s2781_s3 + $0xe8] sm:$0xff] %v1155_v10  ;;  %v1154_v16 = vsel %vm898_vm10, %v372_v2, %v1026_v8  ;;  %v382_v18 = vadd.f32 %v2259_v24, %v381_v14  ;;  %v702_v19 = vadd.f32 %v2259_v24, %v701_v15  ;;  %v1613_v20 = vpop.f32.mrb[32].mxu0  ;;  %v1709_v21 = vpop.f32.mrb[32].mxu1 }
 0x138   :  { %1347 = vst [vmem:[%s2781_s3 + $0x2e8] sm:$0xff] %v1219_v11  ;;  %v1218_v17 = vsel %vm962_vm11, %v692_v3, %v1090_v9  ;;  %1282 = vst [vmem:[%s2781_s3 + $0xe0] sm:$0xff] %v1154_v16  ;;  %vm901_vm12 = vcmp.ge.f32.partialorder %v387_v12, 0.0  ;;  %v1029_v22 = vmul.f32 0.2, %v387_v12  ;;  %vm965_vm13 = vcmp.ge.f32.partialorder %v707_v13, 0.0 }
 0x139   :  { %1346 = vst [vmem:[%s2781_s3 + $0x2e0] sm:$0xff] %v1218_v17  ;;  %v1093_v23 = vmul.f32 0.2, %v707_v13  ;;  %vm900_vm14 = vcmp.ge.f32.partialorder %v382_v18, 0.0  ;;  %v1028_v25 = vmul.f32 0.2, %v382_v18  ;;  %v397_v29 = vadd.f32 %v1613_v20, %v2259_v24 }
 0x13a   :  { %vm964_vm15 = vcmp.ge.f32.partialorder %v702_v19, 0.0  ;;  %v1092_v26 = vmul.f32 0.2, %v702_v19  ;;  %v1157_v27 = vsel %vm901_vm12, %v387_v12, %v1029_v22  ;;  %v717_v30 = vadd.f32 %v1709_v21, %v2259_v24  ;;  %v391_v31 = vpop.f32.mrb[33].mxu0  ;;  %v711_v32 = vpop.f32.mrb[33].mxu1 }
 0x13b   :  { %v1221_v28 = vsel %vm965_vm13, %v707_v13, %v1093_v23  ;;  %1285 = vst [vmem:[%s2781_s3 + $0xf8] sm:$0xff] %v1157_v27  ;;  %v1156_v33 = vsel %vm900_vm14, %v382_v18, %v1028_v25  ;;  %v392_v35 = vadd.f32 %v2259_v24, %v391_v31  ;;  %v712_v36 = vadd.f32 %v2259_v24, %v711_v32  ;;  %v1616_v37 = vpop.f32.mrb[34].mxu0  ;;  %v1712_v38 = vpop.f32.mrb[34].mxu1 }
 0x13c   :  { %1349 = vst [vmem:[%s2781_s3 + $0x2f8] sm:$0xff] %v1221_v28  ;;  %v1220_v34 = vsel %vm964_vm15, %v702_v19, %v1092_v26  ;;  %1284 = vst [vmem:[%s2781_s3 + $0xf0] sm:$0xff] %v1156_v33  ;;  %vm903_vm0 = vcmp.ge.f32.partialorder %v397_v29, 0.0  ;;  %v1031_v39 = vmul.f32 0.2, %v397_v29  ;;  %vm967_vm1 = vcmp.ge.f32.partialorder %v717_v30, 0.0 }
 0x13d   :  { %1348 = vst [vmem:[%s2781_s3 + $0x2f0] sm:$0xff] %v1220_v34  ;;  %v1095_v40 = vmul.f32 0.2, %v717_v30  ;;  %vm902_vm2 = vcmp.ge.f32.partialorder %v392_v35, 0.0  ;;  %v1030_v41 = vmul.f32 0.2, %v392_v35  ;;  %v407_v45 = vadd.f32 %v1616_v37, %v2259_v24 }
 0x13e   :  { %vm966_vm3 = vcmp.ge.f32.partialorder %v712_v36, 0.0  ;;  %v1094_v42 = vmul.f32 0.2, %v712_v36  ;;  %v1159_v43 = vsel %vm903_vm0, %v397_v29, %v1031_v39  ;;  %v727_v46 = vadd.f32 %v1712_v38, %v2259_v24  ;;  %v401_v47 = vpop.f32.mrb[35].mxu0  ;;  %v721_v48 = vpop.f32.mrb[35].mxu1 }
 0x13f   :  { %v1223_v44 = vsel %vm967_vm1, %v717_v30, %v1095_v40  ;;  %1287 = vst [vmem:[%s2781_s3 + $0x108] sm:$0xff] %v1159_v43  ;;  %v1158_v49 = vsel %vm902_vm2, %v392_v35, %v1030_v41  ;;  %v402_v51 = vadd.f32 %v2259_v24, %v401_v47  ;;  %v722_v52 = vadd.f32 %v2259_v24, %v721_v48  ;;  %v1619_v53 = vpop.f32.mrb[36].mxu0  ;;  %v1715_v54 = vpop.f32.mrb[36].mxu1 }
 0x140   :  { %1351 = vst [vmem:[%s2781_s3 + $0x308] sm:$0xff] %v1223_v44  ;;  %v1222_v50 = vsel %vm966_vm3, %v712_v36, %v1094_v42  ;;  %1286 = vst [vmem:[%s2781_s3 + $0x100] sm:$0xff] %v1158_v49  ;;  %vm905_vm4 = vcmp.ge.f32.partialorder %v407_v45, 0.0  ;;  %v1033_v55 = vmul.f32 0.2, %v407_v45  ;;  %vm969_vm5 = vcmp.ge.f32.partialorder %v727_v46, 0.0 }
 0x141   :  { %1350 = vst [vmem:[%s2781_s3 + $0x300] sm:$0xff] %v1222_v50  ;;  %v1097_v56 = vmul.f32 0.2, %v727_v46  ;;  %vm904_vm6 = vcmp.ge.f32.partialorder %v402_v51, 0.0  ;;  %v1032_v57 = vmul.f32 0.2, %v402_v51  ;;  %v417_v61 = vadd.f32 %v1619_v53, %v2259_v24 }
 0x142   :  { %vm968_vm7 = vcmp.ge.f32.partialorder %v722_v52, 0.0  ;;  %v1096_v58 = vmul.f32 0.2, %v722_v52  ;;  %v1161_v59 = vsel %vm905_vm4, %v407_v45, %v1033_v55  ;;  %v737_v62 = vadd.f32 %v1715_v54, %v2259_v24  ;;  %v411_v63 = vpop.f32.mrb[37].mxu0  ;;  %v731_v0 = vpop.f32.mrb[37].mxu1 }
 0x143   :  { %v1225_v60 = vsel %vm969_vm5, %v727_v46, %v1097_v56  ;;  %1289 = vst [vmem:[%s2781_s3 + $0x118] sm:$0xff] %v1161_v59  ;;  %v1160_v1 = vsel %vm904_vm6, %v402_v51, %v1032_v57  ;;  %v412_v3 = vadd.f32 %v2259_v24, %v411_v63  ;;  %v732_v4 = vadd.f32 %v2259_v24, %v731_v0  ;;  %v1622_v5 = vpop.f32.mrb[38].mxu0  ;;  %v1718_v6 = vpop.f32.mrb[38].mxu1 }
 0x144   :  { %1353 = vst [vmem:[%s2781_s3 + $0x318] sm:$0xff] %v1225_v60  ;;  %v1224_v2 = vsel %vm968_vm7, %v722_v52, %v1096_v58  ;;  %1288 = vst [vmem:[%s2781_s3 + $0x110] sm:$0xff] %v1160_v1  ;;  %vm907_vm8 = vcmp.ge.f32.partialorder %v417_v61, 0.0  ;;  %v1035_v7 = vmul.f32 0.2, %v417_v61  ;;  %vm971_vm9 = vcmp.ge.f32.partialorder %v737_v62, 0.0 }
 0x145   :  { %1352 = vst [vmem:[%s2781_s3 + $0x310] sm:$0xff] %v1224_v2  ;;  %v1099_v8 = vmul.f32 0.2, %v737_v62  ;;  %vm906_vm10 = vcmp.ge.f32.partialorder %v412_v3, 0.0  ;;  %v1034_v9 = vmul.f32 0.2, %v412_v3  ;;  %v427_v13 = vadd.f32 %v1622_v5, %v2259_v24 }
 0x146   :  { %vm970_vm11 = vcmp.ge.f32.partialorder %v732_v4, 0.0  ;;  %v1098_v10 = vmul.f32 0.2, %v732_v4  ;;  %v1163_v11 = vsel %vm907_vm8, %v417_v61, %v1035_v7  ;;  %v747_v14 = vadd.f32 %v1718_v6, %v2259_v24  ;;  %v421_v15 = vpop.f32.mrb[39].mxu0  ;;  %v741_v16 = vpop.f32.mrb[39].mxu1 }
 0x147   :  { %v1227_v12 = vsel %vm971_vm9, %v737_v62, %v1099_v8  ;;  %1291 = vst [vmem:[%s2781_s3 + $0x128] sm:$0xff] %v1163_v11  ;;  %v1162_v17 = vsel %vm906_vm10, %v412_v3, %v1034_v9  ;;  %v422_v19 = vadd.f32 %v2259_v24, %v421_v15  ;;  %v742_v20 = vadd.f32 %v2259_v24, %v741_v16  ;;  %v1625_v21 = vpop.f32.mrb[40].mxu0  ;;  %v1721_v22 = vpop.f32.mrb[40].mxu1  ;;  %v2604_v61 = vld [vmem:[%s2780_s2] ss:$0 sm:$0xff] }
 0x148   :  { %1355 = vst [vmem:[%s2781_s3 + $0x328] sm:$0xff] %v1227_v12  ;;  %v1226_v18 = vsel %vm970_vm11, %v732_v4, %v1098_v10  ;;  %1290 = vst [vmem:[%s2781_s3 + $0x120] sm:$0xff] %v1162_v17  ;;  %vm909_vm12 = vcmp.ge.f32.partialorder %v427_v13, 0.0  ;;  %v1037_v23 = vmul.f32 0.2, %v427_v13  ;;  %vm973_vm13 = vcmp.ge.f32.partialorder %v747_v14, 0.0 }
 0x149   :  { %1354 = vst [vmem:[%s2781_s3 + $0x320] sm:$0xff] %v1226_v18  ;;  %v1101_v25 = vmul.f32 0.2, %v747_v14  ;;  %vm908_vm14 = vcmp.ge.f32.partialorder %v422_v19, 0.0  ;;  %v1036_v26 = vmul.f32 0.2, %v422_v19  ;;  %v437_v30 = vadd.f32 %v1625_v21, %v2259_v24 }
 0x14a   :  { %vm972_vm15 = vcmp.ge.f32.partialorder %v742_v20, 0.0  ;;  %v1100_v27 = vmul.f32 0.2, %v742_v20  ;;  %v1165_v28 = vsel %vm909_vm12, %v427_v13, %v1037_v23  ;;  %v757_v31 = vadd.f32 %v1721_v22, %v2259_v24  ;;  %v431_v32 = vpop.f32.mrb[41].mxu0  ;;  %v751_v33 = vpop.f32.mrb[41].mxu1 }
 0x14b   :  { %v1229_v29 = vsel %vm973_vm13, %v747_v14, %v1101_v25  ;;  %1293 = vst [vmem:[%s2781_s3 + $0x138] sm:$0xff] %v1165_v28  ;;  %v1164_v34 = vsel %vm908_vm14, %v422_v19, %v1036_v26  ;;  %v432_v36 = vadd.f32 %v2259_v24, %v431_v32  ;;  %v752_v37 = vadd.f32 %v2259_v24, %v751_v33  ;;  %v1628_v38 = vpop.f32.mrb[42].mxu0  ;;  %v1724_v39 = vpop.f32.mrb[42].mxu1 }
 0x14c   :  { %1357 = vst [vmem:[%s2781_s3 + $0x338] sm:$0xff] %v1229_v29  ;;  %v1228_v35 = vsel %vm972_vm15, %v742_v20, %v1100_v27  ;;  %1292 = vst [vmem:[%s2781_s3 + $0x130] sm:$0xff] %v1164_v34  ;;  %vm911_vm0 = vcmp.ge.f32.partialorder %v437_v30, 0.0  ;;  %v1039_v40 = vmul.f32 0.2, %v437_v30  ;;  %vm975_vm1 = vcmp.ge.f32.partialorder %v757_v31, 0.0 }
 0x14d   :  { %1356 = vst [vmem:[%s2781_s3 + $0x330] sm:$0xff] %v1228_v35  ;;  %v1103_v41 = vmul.f32 0.2, %v757_v31  ;;  %vm910_vm2 = vcmp.ge.f32.partialorder %v432_v36, 0.0  ;;  %v1038_v42 = vmul.f32 0.2, %v432_v36  ;;  %v447_v46 = vadd.f32 %v1628_v38, %v2259_v24 }
 0x14e   :  { %vm974_vm3 = vcmp.ge.f32.partialorder %v752_v37, 0.0  ;;  %v1102_v43 = vmul.f32 0.2, %v752_v37  ;;  %v1167_v44 = vsel %vm911_vm0, %v437_v30, %v1039_v40  ;;  %v767_v47 = vadd.f32 %v1724_v39, %v2259_v24  ;;  %v441_v48 = vpop.f32.mrb[43].mxu0  ;;  %v761_v49 = vpop.f32.mrb[43].mxu1 }
 0x14f   :  { %v1231_v45 = vsel %vm975_vm1, %v757_v31, %v1103_v41  ;;  %1295 = vst [vmem:[%s2781_s3 + $0x148] sm:$0xff] %v1167_v44  ;;  %v1166_v50 = vsel %vm910_vm2, %v432_v36, %v1038_v42  ;;  %v442_v52 = vadd.f32 %v2259_v24, %v441_v48  ;;  %v762_v53 = vadd.f32 %v2259_v24, %v761_v49  ;;  %v1631_v54 = vpop.f32.mrb[44].mxu0  ;;  %v1727_v55 = vpop.f32.mrb[44].mxu1 }
 0x150   :  { %1359 = vst [vmem:[%s2781_s3 + $0x348] sm:$0xff] %v1231_v45  ;;  %v1230_v51 = vsel %vm974_vm3, %v752_v37, %v1102_v43  ;;  %1294 = vst [vmem:[%s2781_s3 + $0x140] sm:$0xff] %v1166_v50  ;;  %vm913_vm4 = vcmp.ge.f32.partialorder %v447_v46, 0.0  ;;  %v1041_v56 = vmul.f32 0.2, %v447_v46  ;;  %vm977_vm5 = vcmp.ge.f32.partialorder %v767_v47, 0.0 }
 0x151   :  { %1358 = vst [vmem:[%s2781_s3 + $0x340] sm:$0xff] %v1230_v51  ;;  %v1105_v57 = vmul.f32 0.2, %v767_v47  ;;  %vm912_vm6 = vcmp.ge.f32.partialorder %v442_v52, 0.0  ;;  %v1040_v58 = vmul.f32 0.2, %v442_v52  ;;  %v457_v62 = vadd.f32 %v2604_v61, %v1631_v54 }
 0x152   :  { %vm976_vm7 = vcmp.ge.f32.partialorder %v762_v53, 0.0  ;;  %v1104_v59 = vmul.f32 0.2, %v762_v53  ;;  %v1169_v60 = vsel %vm913_vm4, %v447_v46, %v1041_v56  ;;  %v777_v63 = vadd.f32 %v2604_v61, %v1727_v55  ;;  %v451_v0 = vpop.f32.mrb[45].mxu0  ;;  %v771_v1 = vpop.f32.mrb[45].mxu1 }
 0x153   :  { %v1233_v24 = vsel %vm977_vm5, %v767_v47, %v1105_v57  ;;  %1297 = vst [vmem:[%s2781_s3 + $0x158] sm:$0xff] %v1169_v60  ;;  %v1168_v2 = vsel %vm912_vm6, %v442_v52, %v1040_v58  ;;  %v452_v4 = vadd.f32 %v2604_v61, %v451_v0  ;;  %v772_v5 = vadd.f32 %v2604_v61, %v771_v1  ;;  %v1634_v6 = vpop.f32.mrb[46].mxu0  ;;  %v1730_v7 = vpop.f32.mrb[46].mxu1 }
 0x154   :  { %1361 = vst [vmem:[%s2781_s3 + $0x358] sm:$0xff] %v1233_v24  ;;  %v1232_v3 = vsel %vm976_vm7, %v762_v53, %v1104_v59  ;;  %1296 = vst [vmem:[%s2781_s3 + $0x150] sm:$0xff] %v1168_v2  ;;  %vm915_vm8 = vcmp.ge.f32.partialorder %v457_v62, 0.0  ;;  %v1043_v8 = vmul.f32 0.2, %v457_v62  ;;  %vm979_vm9 = vcmp.ge.f32.partialorder %v777_v63, 0.0 }
 0x155   :  { %1360 = vst [vmem:[%s2781_s3 + $0x350] sm:$0xff] %v1232_v3  ;;  %v1107_v9 = vmul.f32 0.2, %v777_v63  ;;  %vm914_vm10 = vcmp.ge.f32.partialorder %v452_v4, 0.0  ;;  %v1042_v10 = vmul.f32 0.2, %v452_v4  ;;  %v467_v14 = vadd.f32 %v2604_v61, %v1634_v6 }
 0x156   :  { %vm978_vm11 = vcmp.ge.f32.partialorder %v772_v5, 0.0  ;;  %v1106_v11 = vmul.f32 0.2, %v772_v5  ;;  %v1171_v12 = vsel %vm915_vm8, %v457_v62, %v1043_v8  ;;  %v787_v15 = vadd.f32 %v2604_v61, %v1730_v7  ;;  %v461_v16 = vpop.f32.mrb[47].mxu0  ;;  %v781_v17 = vpop.f32.mrb[47].mxu1 }
 0x157   :  { %v1235_v13 = vsel %vm979_vm9, %v777_v63, %v1107_v9  ;;  %1299 = vst [vmem:[%s2781_s3 + $0x168] sm:$0xff] %v1171_v12  ;;  %v1170_v18 = vsel %vm914_vm10, %v452_v4, %v1042_v10  ;;  %v462_v20 = vadd.f32 %v2604_v61, %v461_v16  ;;  %v782_v21 = vadd.f32 %v2604_v61, %v781_v17  ;;  %v1637_v22 = vpop.f32.mrb[48].mxu0  ;;  %v1733_v23 = vpop.f32.mrb[48].mxu1 }
 0x158   :  { %1363 = vst [vmem:[%s2781_s3 + $0x368] sm:$0xff] %v1235_v13  ;;  %v1234_v19 = vsel %vm978_vm11, %v772_v5, %v1106_v11  ;;  %1298 = vst [vmem:[%s2781_s3 + $0x160] sm:$0xff] %v1170_v18  ;;  %vm917_vm12 = vcmp.ge.f32.partialorder %v467_v14, 0.0  ;;  %v1045_v25 = vmul.f32 0.2, %v467_v14  ;;  %vm981_vm13 = vcmp.ge.f32.partialorder %v787_v15, 0.0 }
 0x159   :  { %1362 = vst [vmem:[%s2781_s3 + $0x360] sm:$0xff] %v1234_v19  ;;  %v1109_v26 = vmul.f32 0.2, %v787_v15  ;;  %vm916_vm14 = vcmp.ge.f32.partialorder %v462_v20, 0.0  ;;  %v1044_v27 = vmul.f32 0.2, %v462_v20  ;;  %v477_v31 = vadd.f32 %v2604_v61, %v1637_v22 }
 0x15a   :  { %vm980_vm15 = vcmp.ge.f32.partialorder %v782_v21, 0.0  ;;  %v1108_v28 = vmul.f32 0.2, %v782_v21  ;;  %v1173_v29 = vsel %vm917_vm12, %v467_v14, %v1045_v25  ;;  %v797_v32 = vadd.f32 %v2604_v61, %v1733_v23  ;;  %v471_v33 = vpop.f32.mrb[49].mxu0  ;;  %v791_v34 = vpop.f32.mrb[49].mxu1 }
 0x15b   :  { %v1237_v30 = vsel %vm981_vm13, %v787_v15, %v1109_v26  ;;  %1301 = vst [vmem:[%s2781_s3 + $0x178] sm:$0xff] %v1173_v29  ;;  %v1172_v35 = vsel %vm916_vm14, %v462_v20, %v1044_v27  ;;  %v472_v37 = vadd.f32 %v2604_v61, %v471_v33  ;;  %v792_v38 = vadd.f32 %v2604_v61, %v791_v34  ;;  %v1640_v39 = vpop.f32.mrb[50].mxu0  ;;  %v1736_v40 = vpop.f32.mrb[50].mxu1 }
 0x15c   :  { %1365 = vst [vmem:[%s2781_s3 + $0x378] sm:$0xff] %v1237_v30  ;;  %v1236_v36 = vsel %vm980_vm15, %v782_v21, %v1108_v28  ;;  %1300 = vst [vmem:[%s2781_s3 + $0x170] sm:$0xff] %v1172_v35  ;;  %vm919_vm0 = vcmp.ge.f32.partialorder %v477_v31, 0.0  ;;  %v1047_v41 = vmul.f32 0.2, %v477_v31  ;;  %vm983_vm1 = vcmp.ge.f32.partialorder %v797_v32, 0.0 }
 0x15d   :  { %1364 = vst [vmem:[%s2781_s3 + $0x370] sm:$0xff] %v1236_v36  ;;  %v1111_v42 = vmul.f32 0.2, %v797_v32  ;;  %vm918_vm2 = vcmp.ge.f32.partialorder %v472_v37, 0.0  ;;  %v1046_v43 = vmul.f32 0.2, %v472_v37  ;;  %v487_v47 = vadd.f32 %v2604_v61, %v1640_v39 }
 0x15e   :  { %vm982_vm3 = vcmp.ge.f32.partialorder %v792_v38, 0.0  ;;  %v1110_v44 = vmul.f32 0.2, %v792_v38  ;;  %v1175_v45 = vsel %vm919_vm0, %v477_v31, %v1047_v41  ;;  %v807_v48 = vadd.f32 %v2604_v61, %v1736_v40  ;;  %v481_v49 = vpop.f32.mrb[51].mxu0  ;;  %v801_v50 = vpop.f32.mrb[51].mxu1 }
 0x15f   :  { %v1239_v46 = vsel %vm983_vm1, %v797_v32, %v1111_v42  ;;  %1303 = vst [vmem:[%s2781_s3 + $0x188] sm:$0xff] %v1175_v45  ;;  %v1174_v51 = vsel %vm918_vm2, %v472_v37, %v1046_v43  ;;  %v482_v53 = vadd.f32 %v2604_v61, %v481_v49  ;;  %v802_v54 = vadd.f32 %v2604_v61, %v801_v50  ;;  %v1643_v55 = vpop.f32.mrb[52].mxu0  ;;  %v1739_v56 = vpop.f32.mrb[52].mxu1 }
 0x160   :  { %1367 = vst [vmem:[%s2781_s3 + $0x388] sm:$0xff] %v1239_v46  ;;  %v1238_v52 = vsel %vm982_vm3, %v792_v38, %v1110_v44  ;;  %1302 = vst [vmem:[%s2781_s3 + $0x180] sm:$0xff] %v1174_v51  ;;  %vm921_vm4 = vcmp.ge.f32.partialorder %v487_v47, 0.0  ;;  %v1049_v57 = vmul.f32 0.2, %v487_v47  ;;  %vm985_vm5 = vcmp.ge.f32.partialorder %v807_v48, 0.0 }
 0x161   :  { %1366 = vst [vmem:[%s2781_s3 + $0x380] sm:$0xff] %v1238_v52  ;;  %v1113_v58 = vmul.f32 0.2, %v807_v48  ;;  %vm920_vm6 = vcmp.ge.f32.partialorder %v482_v53, 0.0  ;;  %v1048_v59 = vmul.f32 0.2, %v482_v53  ;;  %v497_v63 = vadd.f32 %v2604_v61, %v1643_v55 }
 0x162   :  { %vm984_vm7 = vcmp.ge.f32.partialorder %v802_v54, 0.0  ;;  %v1112_v60 = vmul.f32 0.2, %v802_v54  ;;  %v1177_v24 = vsel %vm921_vm4, %v487_v47, %v1049_v57  ;;  %v817_v0 = vadd.f32 %v2604_v61, %v1739_v56  ;;  %v491_v1 = vpop.f32.mrb[53].mxu0  ;;  %v811_v2 = vpop.f32.mrb[53].mxu1 }
 0x163   :  { %v1241_v62 = vsel %vm985_vm5, %v807_v48, %v1113_v58  ;;  %1305 = vst [vmem:[%s2781_s3 + $0x198] sm:$0xff] %v1177_v24  ;;  %v1176_v3 = vsel %vm920_vm6, %v482_v53, %v1048_v59  ;;  %v492_v5 = vadd.f32 %v2604_v61, %v491_v1  ;;  %v812_v6 = vadd.f32 %v2604_v61, %v811_v2  ;;  %v1646_v7 = vpop.f32.mrb[54].mxu0  ;;  %v1742_v8 = vpop.f32.mrb[54].mxu1 }
 0x164   :  { %1369 = vst [vmem:[%s2781_s3 + $0x398] sm:$0xff] %v1241_v62  ;;  %v1240_v4 = vsel %vm984_vm7, %v802_v54, %v1112_v60  ;;  %1304 = vst [vmem:[%s2781_s3 + $0x190] sm:$0xff] %v1176_v3  ;;  %vm923_vm8 = vcmp.ge.f32.partialorder %v497_v63, 0.0  ;;  %v1051_v9 = vmul.f32 0.2, %v497_v63  ;;  %vm987_vm9 = vcmp.ge.f32.partialorder %v817_v0, 0.0 }
 0x165   :  { %1368 = vst [vmem:[%s2781_s3 + $0x390] sm:$0xff] %v1240_v4  ;;  %v1115_v10 = vmul.f32 0.2, %v817_v0  ;;  %vm922_vm10 = vcmp.ge.f32.partialorder %v492_v5, 0.0  ;;  %v1050_v11 = vmul.f32 0.2, %v492_v5  ;;  %v507_v15 = vadd.f32 %v2604_v61, %v1646_v7 }
 0x166   :  { %vm986_vm11 = vcmp.ge.f32.partialorder %v812_v6, 0.0  ;;  %v1114_v12 = vmul.f32 0.2, %v812_v6  ;;  %v1179_v13 = vsel %vm923_vm8, %v497_v63, %v1051_v9  ;;  %v827_v16 = vadd.f32 %v2604_v61, %v1742_v8  ;;  %v501_v17 = vpop.f32.mrb[55].mxu0  ;;  %v821_v18 = vpop.f32.mrb[55].mxu1 }
 0x167   :  { %v1243_v14 = vsel %vm987_vm9, %v817_v0, %v1115_v10  ;;  %1307 = vst [vmem:[%s2781_s3 + $0x1a8] sm:$0xff] %v1179_v13  ;;  %v1178_v19 = vsel %vm922_vm10, %v492_v5, %v1050_v11  ;;  %v502_v21 = vadd.f32 %v2604_v61, %v501_v17  ;;  %v822_v22 = vadd.f32 %v2604_v61, %v821_v18  ;;  %v1649_v23 = vpop.f32.mrb[56].mxu0  ;;  %v1745_v25 = vpop.f32.mrb[56].mxu1 }
 0x168   :  { %1371 = vst [vmem:[%s2781_s3 + $0x3a8] sm:$0xff] %v1243_v14  ;;  %v1242_v20 = vsel %vm986_vm11, %v812_v6, %v1114_v12  ;;  %1306 = vst [vmem:[%s2781_s3 + $0x1a0] sm:$0xff] %v1178_v19  ;;  %vm925_vm12 = vcmp.ge.f32.partialorder %v507_v15, 0.0  ;;  %v1053_v26 = vmul.f32 0.2, %v507_v15  ;;  %vm989_vm13 = vcmp.ge.f32.partialorder %v827_v16, 0.0 }
 0x169   :  { %1370 = vst [vmem:[%s2781_s3 + $0x3a0] sm:$0xff] %v1242_v20  ;;  %v1117_v27 = vmul.f32 0.2, %v827_v16  ;;  %vm924_vm14 = vcmp.ge.f32.partialorder %v502_v21, 0.0  ;;  %v1052_v28 = vmul.f32 0.2, %v502_v21  ;;  %v517_v32 = vadd.f32 %v2604_v61, %v1649_v23 }
 0x16a   :  { %vm988_vm15 = vcmp.ge.f32.partialorder %v822_v22, 0.0  ;;  %v1116_v29 = vmul.f32 0.2, %v822_v22  ;;  %v1181_v30 = vsel %vm925_vm12, %v507_v15, %v1053_v26  ;;  %v837_v33 = vadd.f32 %v2604_v61, %v1745_v25  ;;  %v511_v34 = vpop.f32.mrb[57].mxu0  ;;  %v831_v35 = vpop.f32.mrb[57].mxu1 }
 0x16b   :  { %v1245_v31 = vsel %vm989_vm13, %v827_v16, %v1117_v27  ;;  %1309 = vst [vmem:[%s2781_s3 + $0x1b8] sm:$0xff] %v1181_v30  ;;  %v1180_v36 = vsel %vm924_vm14, %v502_v21, %v1052_v28  ;;  %v512_v38 = vadd.f32 %v2604_v61, %v511_v34  ;;  %v832_v39 = vadd.f32 %v2604_v61, %v831_v35  ;;  %v1652_v40 = vpop.f32.mrb[58].mxu0  ;;  %v1748_v41 = vpop.f32.mrb[58].mxu1 }
 0x16c   :  { %1373 = vst [vmem:[%s2781_s3 + $0x3b8] sm:$0xff] %v1245_v31  ;;  %v1244_v37 = vsel %vm988_vm15, %v822_v22, %v1116_v29  ;;  %1308 = vst [vmem:[%s2781_s3 + $0x1b0] sm:$0xff] %v1180_v36  ;;  %vm927_vm0 = vcmp.ge.f32.partialorder %v517_v32, 0.0  ;;  %v1055_v42 = vmul.f32 0.2, %v517_v32  ;;  %vm991_vm1 = vcmp.ge.f32.partialorder %v837_v33, 0.0 }
 0x16d   :  { %1372 = vst [vmem:[%s2781_s3 + $0x3b0] sm:$0xff] %v1244_v37  ;;  %v1119_v43 = vmul.f32 0.2, %v837_v33  ;;  %vm926_vm2 = vcmp.ge.f32.partialorder %v512_v38, 0.0  ;;  %v1054_v44 = vmul.f32 0.2, %v512_v38  ;;  %v527_v48 = vadd.f32 %v2604_v61, %v1652_v40 }
 0x16e   :  { %vm990_vm3 = vcmp.ge.f32.partialorder %v832_v39, 0.0  ;;  %v1118_v45 = vmul.f32 0.2, %v832_v39  ;;  %v1183_v46 = vsel %vm927_vm0, %v517_v32, %v1055_v42  ;;  %v847_v49 = vadd.f32 %v2604_v61, %v1748_v41  ;;  %v521_v50 = vpop.f32.mrb[59].mxu0  ;;  %v841_v51 = vpop.f32.mrb[59].mxu1 }
 0x16f   :  { %v1247_v47 = vsel %vm991_vm1, %v837_v33, %v1119_v43  ;;  %1311 = vst [vmem:[%s2781_s3 + $0x1c8] sm:$0xff] %v1183_v46  ;;  %v1182_v52 = vsel %vm926_vm2, %v512_v38, %v1054_v44  ;;  %v522_v54 = vadd.f32 %v2604_v61, %v521_v50  ;;  %v842_v55 = vadd.f32 %v2604_v61, %v841_v51  ;;  %v1655_v56 = vpop.f32.mrb[60].mxu0  ;;  %v1751_v57 = vpop.f32.mrb[60].mxu1 }
 0x170   :  { %1375 = vst [vmem:[%s2781_s3 + $0x3c8] sm:$0xff] %v1247_v47  ;;  %v1246_v53 = vsel %vm990_vm3, %v832_v39, %v1118_v45  ;;  %1310 = vst [vmem:[%s2781_s3 + $0x1c0] sm:$0xff] %v1182_v52  ;;  %vm929_vm4 = vcmp.ge.f32.partialorder %v527_v48, 0.0  ;;  %v1057_v58 = vmul.f32 0.2, %v527_v48  ;;  %vm993_vm5 = vcmp.ge.f32.partialorder %v847_v49, 0.0 }
 0x171   :  { %1374 = vst [vmem:[%s2781_s3 + $0x3c0] sm:$0xff] %v1246_v53  ;;  %v1121_v59 = vmul.f32 0.2, %v847_v49  ;;  %vm928_vm6 = vcmp.ge.f32.partialorder %v522_v54, 0.0  ;;  %v1056_v60 = vmul.f32 0.2, %v522_v54  ;;  %v537_v0 = vadd.f32 %v2604_v61, %v1655_v56 }
 0x172   :  { %vm992_vm7 = vcmp.ge.f32.partialorder %v842_v55, 0.0  ;;  %v1120_v24 = vmul.f32 0.2, %v842_v55  ;;  %v1185_v62 = vsel %vm929_vm4, %v527_v48, %v1057_v58  ;;  %v857_v1 = vadd.f32 %v2604_v61, %v1751_v57  ;;  %v531_v2 = vpop.f32.mrb[61].mxu0  ;;  %v851_v3 = vpop.f32.mrb[61].mxu1 }
 0x173   :  { %v1249_v63 = vsel %vm993_vm5, %v847_v49, %v1121_v59  ;;  %1313 = vst [vmem:[%s2781_s3 + $0x1d8] sm:$0xff] %v1185_v62  ;;  %v1184_v4 = vsel %vm928_vm6, %v522_v54, %v1056_v60  ;;  %v532_v6 = vadd.f32 %v2604_v61, %v531_v2  ;;  %v852_v7 = vadd.f32 %v2604_v61, %v851_v3  ;;  %v1658_v8 = vpop.f32.mrb[62].mxu0  ;;  %v1754_v9 = vpop.f32.mrb[62].mxu1 }
 0x174   :  { %1377 = vst [vmem:[%s2781_s3 + $0x3d8] sm:$0xff] %v1249_v63  ;;  %v1248_v5 = vsel %vm992_vm7, %v842_v55, %v1120_v24  ;;  %1312 = vst [vmem:[%s2781_s3 + $0x1d0] sm:$0xff] %v1184_v4  ;;  %vm931_vm8 = vcmp.ge.f32.partialorder %v537_v0, 0.0  ;;  %v1059_v10 = vmul.f32 0.2, %v537_v0  ;;  %vm995_vm9 = vcmp.ge.f32.partialorder %v857_v1, 0.0 }
 0x175   :  { %1376 = vst [vmem:[%s2781_s3 + $0x3d0] sm:$0xff] %v1248_v5  ;;  %v1123_v11 = vmul.f32 0.2, %v857_v1  ;;  %vm930_vm10 = vcmp.ge.f32.partialorder %v532_v6, 0.0  ;;  %v1058_v12 = vmul.f32 0.2, %v532_v6  ;;  %v547_v16 = vadd.f32 %v2604_v61, %v1658_v8 }
 0x176   :  { %vm994_vm11 = vcmp.ge.f32.partialorder %v852_v7, 0.0  ;;  %v1122_v13 = vmul.f32 0.2, %v852_v7  ;;  %v1187_v14 = vsel %vm931_vm8, %v537_v0, %v1059_v10  ;;  %v867_v17 = vadd.f32 %v2604_v61, %v1754_v9  ;;  %v541_v18 = vpop.f32.mrb[63].mxu0  ;;  %v861_v19 = vpop.f32.mrb[63].mxu1 }
 0x177   :  { %v1251_v15 = vsel %vm995_vm9, %v857_v1, %v1123_v11  ;;  %1315 = vst [vmem:[%s2781_s3 + $0x1e8] sm:$0xff] %v1187_v14  ;;  %v1186_v20 = vsel %vm930_vm10, %v532_v6, %v1058_v12  ;;  %v542_v22 = vadd.f32 %v2604_v61, %v541_v18  ;;  %v862_v23 = vadd.f32 %v2604_v61, %v861_v19 }
 0x178   :  { %1379 = vst [vmem:[%s2781_s3 + $0x3e8] sm:$0xff] %v1251_v15  ;;  %v1250_v21 = vsel %vm994_vm11, %v852_v7, %v1122_v13  ;;  %1314 = vst [vmem:[%s2781_s3 + $0x1e0] sm:$0xff] %v1186_v20  ;;  %vm933_vm12 = vcmp.ge.f32.partialorder %v547_v16, 0.0  ;;  %v1061_v25 = vmul.f32 0.2, %v547_v16  ;;  %vm997_vm13 = vcmp.ge.f32.partialorder %v867_v17, 0.0 }
 0x179   :  { %1378 = vst [vmem:[%s2781_s3 + $0x3e0] sm:$0xff] %v1250_v21  ;;  %v1125_v26 = vmul.f32 0.2, %v867_v17  ;;  %vm932_vm14 = vcmp.ge.f32.partialorder %v542_v22, 0.0  ;;  %v1060_v27 = vmul.f32 0.2, %v542_v22 }
 0x17a   :  { %vm996_vm15 = vcmp.ge.f32.partialorder %v862_v23, 0.0  ;;  %v1124_v28 = vmul.f32 0.2, %v862_v23  ;;  %v1189_v29 = vsel %vm933_vm12, %v547_v16, %v1061_v25 }
 0x17b   :  { %v1253_v30 = vsel %vm997_vm13, %v867_v17, %v1125_v26  ;;  %1317 = vst [vmem:[%s2781_s3 + $0x1f8] sm:$0xff] %v1189_v29  ;;  %v1188_v61 = vsel %vm932_vm14, %v542_v22, %v1060_v27 }
 0x17c   :  { %1381 = vst [vmem:[%s2781_s3 + $0x3f8] sm:$0xff] %v1253_v30  ;;  %v1252_v31 = vsel %vm996_vm15, %v862_v23, %v1124_v28  ;;  %1316 = vst [vmem:[%s2781_s3 + $0x1f0] sm:$0xff] %v1188_v61 }
 0x17d   :  { %1380 = vst [vmem:[%s2781_s3 + $0x3f0] sm:$0xff] %v1252_v31 }

// kernel: encoder_forward.5
= control target key start
LH: loop header
LB: loop body
LE: loop exit
PB: predicated region body
PF: predicated region fallthrough
CT: control target
= control target key end

     0   :  { %s708_s1 = inlined_call_operand.vmem [shape: f32[256,128], index: 1, kind: input, shape index: {}]   ;;  %s709_s0 = inlined_call_operand.vmem [shape: f32[128,256], index: 0, kind: input, shape index: {}]   ;;  %s710_s2 = inlined_call_operand.vmem [shape: f32[1,128], index: 2, kind: input, shape index: {}]   ;;  %s711_s3 = inlined_call_operand.vmem [shape: f32[128,128], index: 3, kind: output, shape index: {}]  }
   0x1   :  { %v62_v0 = vld [vmem:[%s708_s1 + $0x80] sm:$0xff]  ;;  %v63_v1 = vld [vmem:[%s708_s1 + $0x88] sm:$0xff]  ;;  %v64_v5 = vld [vmem:[%s708_s1 + $0x90] sm:$0xff] }
   0x2   :  { %v46_v2 = vld [vmem:[%s708_s1] sm:$0xff]  ;;  %v379_v3 = vpack.c.bf16 %v63_v1, %v62_v0  ;;  %v47_v4 = vld [vmem:[%s708_s1 + $0x8] sm:$0xff]  ;;  %v65_v6 = vld [vmem:[%s708_s1 + $0x98] sm:$0xff] }
   0x3   :  { %v381_v7 = vpack.c.bf16 %v47_v4, %v46_v2  ;;  %v383_v8 = vpack.c.bf16 %v65_v6, %v64_v5  ;;  %v48_v9 = vld [vmem:[%s708_s1 + $0x10] sm:$0xff]  ;;  %v49_v10 = vld [vmem:[%s708_s1 + $0x18] sm:$0xff]  ;;  %v66_v11 = vld [vmem:[%s708_s1 + $0xa0] sm:$0xff] }
   0x4   :  { %380 = vmatprep.subr.bf16.mxu0 %v379_v3  ;;  %411 = vmatprep.subr.bf16.mxu1 %v379_v3  ;;  %v67_v12 = vld [vmem:[%s708_s1 + $0xa8] sm:$0xff]  ;;  %v385_v13 = vpack.c.bf16 %v49_v10, %v48_v9  ;;  %v50_v15 = vld [vmem:[%s708_s1 + $0x20] sm:$0xff]  ;;  %v68_v17 = vld [vmem:[%s708_s1 + $0xb0] sm:$0xff] }
   0x5   :  { %382 = vmatpush3.bf16.msra.mxu0 %v381_v7  ;;  %419 = vmatpush3.bf16.msra.mxu1 %v381_v7  ;;  %v387_v14 = vpack.c.bf16 %v67_v12, %v66_v11  ;;  %v51_v16 = vld [vmem:[%s708_s1 + $0x28] sm:$0xff]  ;;  %v69_v18 = vld [vmem:[%s708_s1 + $0xb8] sm:$0xff]  ;;  %v52_v21 = vld [vmem:[%s708_s1 + $0x30] sm:$0xff] }
   0x6   :  { %384 = vmatprep.subr.bf16.mxu0 %v383_v8  ;;  %412 = vmatprep.subr.bf16.mxu1 %v383_v8  ;;  %v389_v19 = vpack.c.bf16 %v51_v16, %v50_v15  ;;  %v391_v20 = vpack.c.bf16 %v69_v18, %v68_v17  ;;  %v53_v22 = vld [vmem:[%s708_s1 + $0x38] sm:$0xff]  ;;  %v70_v23 = vld [vmem:[%s708_s1 + $0xc0] sm:$0xff]  ;;  %v71_v24 = vld [vmem:[%s708_s1 + $0xc8] sm:$0xff] }
   0x7   :  { %v15_v25 = vld [vmem:[%s709_s0 + $0x8] sm:$0xff]  ;;  %v393_v27 = vpack.c.bf16 %v53_v22, %v52_v21  ;;  %v395_v28 = vpack.c.bf16 %v71_v24, %v70_v23  ;;  %v54_v29 = vld [vmem:[%s708_s1 + $0x40] sm:$0xff]  ;;  %v72_v31 = vld [vmem:[%s708_s1 + $0xd0] sm:$0xff] }
   0x8   :  { %149 = vmatprep.mubr.f32.mxu0 %v15_v25  ;;  %v31_v26 = vld [vmem:[%s709_s0 + $0x88] sm:$0xff]  ;;  %v73_v32 = vld [vmem:[%s708_s1 + $0xd8] sm:$0xff]  ;;  %v56_v35 = vld [vmem:[%s708_s1 + $0x50] sm:$0xff] }
   0x9   :  { %386 = vmatpush3.bf16.msra.mxu0 %v385_v13  ;;  %420 = vmatpush3.bf16.msra.mxu1 %v385_v13  ;;  %v55_v30 = vld [vmem:[%s708_s1 + $0x48] sm:$0xff]  ;;  %v399_v34 = vpack.c.bf16 %v73_v32, %v72_v31  ;;  %v57_v36 = vld [vmem:[%s708_s1 + $0x58] sm:$0xff]  ;;  %v74_v37 = vld [vmem:[%s708_s1 + $0xe0] sm:$0xff] }
   0xa   :  { %388 = vmatprep.subr.bf16.mxu0 %v387_v14  ;;  %413 = vmatprep.subr.bf16.mxu1 %v387_v14  ;;  %v397_v33 = vpack.c.bf16 %v55_v30, %v54_v29  ;;  %v75_v38 = vld [vmem:[%s708_s1 + $0xe8] sm:$0xff]  ;;  %v401_v39 = vpack.c.bf16 %v57_v36, %v56_v35  ;;  %v58_v41 = vld [vmem:[%s708_s1 + $0x60] sm:$0xff]  ;;  %v76_v43 = vld [vmem:[%s708_s1 + $0xf0] sm:$0xff] }
   0xb   :  { %189 = vmatprep.mubr.f32.mxu1 %v31_v26  ;;  %v403_v40 = vpack.c.bf16 %v75_v38, %v74_v37  ;;  %v59_v42 = vld [vmem:[%s708_s1 + $0x68] sm:$0xff]  ;;  %v77_v44 = vld [vmem:[%s708_s1 + $0xf8] sm:$0xff]  ;;  %v60_v47 = vld [vmem:[%s708_s1 + $0x70] sm:$0xff] }
   0xc   :  { %v405_v45 = vpack.c.bf16 %v59_v42, %v58_v41  ;;  %v407_v46 = vpack.c.bf16 %v77_v44, %v76_v43  ;;  %v61_v48 = vld [vmem:[%s708_s1 + $0x78] sm:$0xff]  ;;  %v14_v50 = vld [vmem:[%s709_s0] sm:$0xff]  ;;  %v16_v54 = vld [vmem:[%s709_s0 + $0x10] sm:$0xff] }
   0xd   :  { %390 = vmatpush3.bf16.msra.mxu0 %v389_v19  ;;  %421 = vmatpush3.bf16.msra.mxu1 %v389_v19  ;;  %v409_v49 = vpack.c.bf16 %v61_v48, %v60_v47  ;;  %v30_v51 = vld [vmem:[%s709_s0 + $0x80] sm:$0xff]  ;;  %v17_v52 = vld [vmem:[%s709_s0 + $0x18] sm:$0xff]  ;;  %v32_v55 = vld [vmem:[%s709_s0 + $0x90] sm:$0xff] }
   0xe   :  { %392 = vmatprep.subr.bf16.mxu0 %v391_v20  ;;  %414 = vmatprep.subr.bf16.mxu1 %v391_v20  ;;  %v33_v53 = vld [vmem:[%s709_s0 + $0x98] sm:$0xff]  ;;  %v19_v56 = vld [vmem:[%s709_s0 + $0x28] sm:$0xff]  ;;  %v18_v58 = vld [vmem:[%s709_s0 + $0x20] sm:$0xff] }
   0xf   :  { %v35_v57 = vld [vmem:[%s709_s0 + $0xa8] sm:$0xff]  ;;  %v34_v59 = vld [vmem:[%s709_s0 + $0xa0] sm:$0xff]  ;;  %v21_v60 = vld [vmem:[%s709_s0 + $0x38] sm:$0xff] }
  0x10   :  { %v37_v61 = vld [vmem:[%s709_s0 + $0xb8] sm:$0xff]  ;;  %v20_v62 = vld [vmem:[%s709_s0 + $0x30] sm:$0xff]  ;;  %v23_v0 = vld [vmem:[%s709_s0 + $0x48] sm:$0xff] }
  0x11   :  { %394 = vmatpush3.bf16.msra.mxu0 %v393_v27  ;;  %422 = vmatpush3.bf16.msra.mxu1 %v393_v27  ;;  %v36_v63 = vld [vmem:[%s709_s0 + $0xb0] sm:$0xff]  ;;  %v39_v1 = vld [vmem:[%s709_s0 + $0xc8] sm:$0xff]  ;;  %v22_v2 = vld [vmem:[%s709_s0 + $0x40] sm:$0xff] }
  0x12   :  { %396 = vmatprep.subr.bf16.mxu0 %v395_v28  ;;  %415 = vmatprep.subr.bf16.mxu1 %v395_v28  ;;  %v38_v3 = vld [vmem:[%s709_s0 + $0xc0] sm:$0xff]  ;;  %v25_v4 = vld [vmem:[%s709_s0 + $0x58] sm:$0xff]  ;;  %v24_v6 = vld [vmem:[%s709_s0 + $0x50] sm:$0xff] }
  0x13   :  { %v41_v5 = vld [vmem:[%s709_s0 + $0xd8] sm:$0xff]  ;;  %v40_v7 = vld [vmem:[%s709_s0 + $0xd0] sm:$0xff]  ;;  %v27_v8 = vld [vmem:[%s709_s0 + $0x68] sm:$0xff] }
  0x14   :  { %v43_v9 = vld [vmem:[%s709_s0 + $0xe8] sm:$0xff]  ;;  %v26_v10 = vld [vmem:[%s709_s0 + $0x60] sm:$0xff]  ;;  %v29_v12 = vld [vmem:[%s709_s0 + $0x78] sm:$0xff] }
  0x15   :  { %398 = vmatpush3.bf16.msra.mxu0 %v397_v33  ;;  %423 = vmatpush3.bf16.msra.mxu1 %v397_v33  ;;  %v42_v11 = vld [vmem:[%s709_s0 + $0xe0] sm:$0xff]  ;;  %v45_v13 = vld [vmem:[%s709_s0 + $0xf8] sm:$0xff]  ;;  %v28_v14 = vld [vmem:[%s709_s0 + $0x70] sm:$0xff] }
  0x16   :  { %400 = vmatprep.subr.bf16.mxu0 %v399_v34  ;;  %416 = vmatprep.subr.bf16.mxu1 %v399_v34  ;;  %v44_v15 = vld [vmem:[%s709_s0 + $0xf0] sm:$0xff]  ;;  %v642_v18 = vld [vmem:[%s710_s2] ss:$0 sm:$0xff] }
  0x19   :  { %402 = vmatpush3.bf16.msra.mxu0 %v401_v39  ;;  %424 = vmatpush3.bf16.msra.mxu1 %v401_v39 }
  0x1a   :  { %404 = vmatprep.subr.bf16.mxu0 %v403_v40  ;;  %417 = vmatprep.subr.bf16.mxu1 %v403_v40 }
  0x1d   :  { %406 = vmatpush3.bf16.msra.mxu0 %v405_v45  ;;  %425 = vmatpush3.bf16.msra.mxu1 %v405_v45 }
  0x1e   :  { %408 = vmatprep.subr.bf16.mxu0 %v407_v46  ;;  %418 = vmatprep.subr.bf16.mxu1 %v407_v46 }
  0x21   :  { %410 = vmatpush3.bf16.msra.mxu0 %v409_v49  ;;  %426 = vmatpush3.bf16.msra.mxu1 %v409_v49 }
  0x24   :  { %150 = vmatmul.mubr.f32.vlgmr.msra.gmra.mrb[0].mxu0 %v14_v50  ;;  %190 = vmatmul.mubr.f32.vlgmr.msra.gmra.mrb[0].mxu1 %v30_v51 }
  0x25   :  { %154 = vmatprep.mubr.f32.mxu0 %v17_v52  ;;  %194 = vmatprep.mubr.f32.mxu1 %v33_v53 }
  0x28   :  { %155 = vmatmul.mubr.f32.gmra.mrb[2].mxu0 %v16_v54  ;;  %195 = vmatmul.mubr.f32.gmra.mrb[2].mxu1 %v32_v55 }
  0x29   :  { %159 = vmatprep.mubr.f32.mxu0 %v19_v56  ;;  %199 = vmatprep.mubr.f32.mxu1 %v35_v57 }
  0x2c   :  { %160 = vmatmul.mubr.f32.gmra.mrb[4].mxu0 %v18_v58  ;;  %200 = vmatmul.mubr.f32.gmra.mrb[4].mxu1 %v34_v59 }
  0x2d   :  { %164 = vmatprep.mubr.f32.mxu0 %v21_v60  ;;  %204 = vmatprep.mubr.f32.mxu1 %v37_v61 }
  0x30   :  { %165 = vmatmul.mubr.f32.gmra.mrb[6].mxu0 %v20_v62  ;;  %205 = vmatmul.mubr.f32.gmra.mrb[6].mxu1 %v36_v63 }
  0x31   :  { %169 = vmatprep.mubr.f32.mxu0 %v23_v0  ;;  %209 = vmatprep.mubr.f32.mxu1 %v39_v1 }
  0x34   :  { %170 = vmatmul.mubr.f32.gmra.mrb[8].mxu0 %v22_v2  ;;  %210 = vmatmul.mubr.f32.gmra.mrb[8].mxu1 %v38_v3 }
  0x35   :  { %174 = vmatprep.mubr.f32.mxu0 %v25_v4  ;;  %214 = vmatprep.mubr.f32.mxu1 %v41_v5 }
  0x38   :  { %175 = vmatmul.mubr.f32.gmra.mrb[10].mxu0 %v24_v6  ;;  %215 = vmatmul.mubr.f32.gmra.mrb[10].mxu1 %v40_v7 }
  0x39   :  { %179 = vmatprep.mubr.f32.mxu0 %v27_v8  ;;  %219 = vmatprep.mubr.f32.mxu1 %v43_v9 }
  0x3c   :  { %180 = vmatmul.mubr.f32.gmra.mrb[12].mxu0 %v26_v10  ;;  %220 = vmatmul.mubr.f32.gmra.mrb[12].mxu1 %v42_v11 }
  0x3d   :  { %184 = vmatprep.mubr.f32.mxu0 %v29_v12  ;;  %224 = vmatprep.mubr.f32.mxu1 %v45_v13 }
  0x40   :  { %185 = vmatmul.mubr.f32.gmra.mrb[14].mxu0 %v28_v14  ;;  %225 = vmatmul.mubr.f32.gmra.mrb[14].mxu1 %v44_v15 }
  0xf7   :  { %v331_v16 = vpop.f32.mrb[0].mxu0  ;;  %v355_v17 = vpop.f32.mrb[0].mxu1 }
  0xf8   :  { %v332_v19 = vpop.f32.mrb[1].mxu0  ;;  %v356_v20 = vpop.f32.mrb[1].mxu1 }
  0xf9   :  { %v333_v21 = vadd.f32 %v332_v19, %v331_v16  ;;  %v357_v22 = vadd.f32 %v356_v20, %v355_v17 }
  0xfb   :  { %v152_v23 = vadd.f32 %v333_v21, %v642_v18  ;;  %v192_v24 = vadd.f32 %v357_v22, %v642_v18  ;;  %v334_v25 = vpop.f32.mrb[2].mxu0  ;;  %v358_v26 = vpop.f32.mrb[2].mxu1 }
  0xfc   :  { %v335_v27 = vpop.f32.mrb[3].mxu0  ;;  %v359_v28 = vpop.f32.mrb[3].mxu1 }
  0xfd   :  { %vm230_vm0 = vcmp.ge.f32.partialorder %v152_v23, 0.0  ;;  %v246_v29 = vmul.f32 0.2, %v152_v23  ;;  %vm238_vm1 = vcmp.ge.f32.partialorder %v192_v24, 0.0  ;;  %v254_v30 = vmul.f32 0.2, %v192_v24 }
  0xfe   :  { %v336_v31 = vadd.f32 %v335_v27, %v334_v25  ;;  %v360_v32 = vadd.f32 %v359_v28, %v358_v26 }
  0xff   :  { %v262_v33 = vsel %vm230_vm0, %v152_v23, %v246_v29  ;;  %v270_v34 = vsel %vm238_vm1, %v192_v24, %v254_v30  ;;  %v337_v35 = vpop.f32.mrb[4].mxu0  ;;  %v361_v36 = vpop.f32.mrb[4].mxu1 }
 0x100   :  { %278 = vst [vmem:[%s711_s3] sm:$0xff] %v262_v33  ;;  %286 = vst [vmem:[%s711_s3 + $0x40] sm:$0xff] %v270_v34  ;;  %v157_v37 = vadd.f32 %v336_v31, %v642_v18  ;;  %v197_v38 = vadd.f32 %v360_v32, %v642_v18  ;;  %v338_v39 = vpop.f32.mrb[5].mxu0  ;;  %v362_v40 = vpop.f32.mrb[5].mxu1 }
 0x101   :  { %v339_v41 = vadd.f32 %v338_v39, %v337_v35  ;;  %v363_v42 = vadd.f32 %v362_v40, %v361_v36 }
 0x102   :  { %vm231_vm2 = vcmp.ge.f32.partialorder %v157_v37, 0.0  ;;  %v247_v43 = vmul.f32 0.2, %v157_v37  ;;  %vm239_vm3 = vcmp.ge.f32.partialorder %v197_v38, 0.0  ;;  %v255_v44 = vmul.f32 0.2, %v197_v38 }
 0x103   :  { %v162_v45 = vadd.f32 %v339_v41, %v642_v18  ;;  %v202_v46 = vadd.f32 %v363_v42, %v642_v18  ;;  %v340_v47 = vpop.f32.mrb[6].mxu0  ;;  %v364_v48 = vpop.f32.mrb[6].mxu1 }
 0x104   :  { %v263_v49 = vsel %vm231_vm2, %v157_v37, %v247_v43  ;;  %v271_v50 = vsel %vm239_vm3, %v197_v38, %v255_v44  ;;  %v341_v51 = vpop.f32.mrb[7].mxu0  ;;  %v365_v52 = vpop.f32.mrb[7].mxu1 }
 0x105   :  { %279 = vst [vmem:[%s711_s3 + $0x8] sm:$0xff] %v263_v49  ;;  %287 = vst [vmem:[%s711_s3 + $0x48] sm:$0xff] %v271_v50  ;;  %vm232_vm4 = vcmp.ge.f32.partialorder %v162_v45, 0.0  ;;  %v248_v53 = vmul.f32 0.2, %v162_v45  ;;  %vm240_vm5 = vcmp.ge.f32.partialorder %v202_v46, 0.0  ;;  %v342_v55 = vadd.f32 %v341_v51, %v340_v47 }
 0x106   :  { %v256_v54 = vmul.f32 0.2, %v202_v46  ;;  %v366_v56 = vadd.f32 %v365_v52, %v364_v48 }
 0x107   :  { %v264_v57 = vsel %vm232_vm4, %v162_v45, %v248_v53  ;;  %v343_v59 = vpop.f32.mrb[8].mxu0  ;;  %v367_v60 = vpop.f32.mrb[8].mxu1  ;;  %v167_v61 = vadd.f32 %v342_v55, %v642_v18 }
 0x108   :  { %v272_v58 = vsel %vm240_vm5, %v202_v46, %v256_v54  ;;  %280 = vst [vmem:[%s711_s3 + $0x10] sm:$0xff] %v264_v57  ;;  %v207_v62 = vadd.f32 %v366_v56, %v642_v18  ;;  %v344_v63 = vpop.f32.mrb[9].mxu0  ;;  %v368_v0 = vpop.f32.mrb[9].mxu1 }
 0x109   :  { %288 = vst [vmem:[%s711_s3 + $0x50] sm:$0xff] %v272_v58  ;;  %v345_v1 = vadd.f32 %v344_v63, %v343_v59  ;;  %v369_v2 = vadd.f32 %v368_v0, %v367_v60  ;;  %vm233_vm6 = vcmp.ge.f32.partialorder %v167_v61, 0.0  ;;  %v249_v3 = vmul.f32 0.2, %v167_v61 }
 0x10a   :  { %vm241_vm7 = vcmp.ge.f32.partialorder %v207_v62, 0.0  ;;  %v257_v4 = vmul.f32 0.2, %v207_v62 }
 0x10b   :  { %v172_v5 = vadd.f32 %v345_v1, %v642_v18  ;;  %v212_v6 = vadd.f32 %v369_v2, %v642_v18  ;;  %v346_v7 = vpop.f32.mrb[10].mxu0  ;;  %v370_v8 = vpop.f32.mrb[10].mxu1  ;;  %v265_v9 = vsel %vm233_vm6, %v167_v61, %v249_v3 }
 0x10c   :  { %v273_v10 = vsel %vm241_vm7, %v207_v62, %v257_v4  ;;  %v347_v11 = vpop.f32.mrb[11].mxu0  ;;  %v371_v12 = vpop.f32.mrb[11].mxu1  ;;  %281 = vst [vmem:[%s711_s3 + $0x18] sm:$0xff] %v265_v9 }
 0x10d   :  { %289 = vst [vmem:[%s711_s3 + $0x58] sm:$0xff] %v273_v10  ;;  %vm234_vm8 = vcmp.ge.f32.partialorder %v172_v5, 0.0  ;;  %v250_v13 = vmul.f32 0.2, %v172_v5  ;;  %vm242_vm9 = vcmp.ge.f32.partialorder %v212_v6, 0.0  ;;  %v348_v15 = vadd.f32 %v347_v11, %v346_v7 }
 0x10e   :  { %v258_v14 = vmul.f32 0.2, %v212_v6  ;;  %v372_v16 = vadd.f32 %v371_v12, %v370_v8 }
 0x10f   :  { %v266_v17 = vsel %vm234_vm8, %v172_v5, %v250_v13  ;;  %v349_v20 = vpop.f32.mrb[12].mxu0  ;;  %v373_v21 = vpop.f32.mrb[12].mxu1  ;;  %v177_v22 = vadd.f32 %v348_v15, %v642_v18 }
 0x110   :  { %v274_v19 = vsel %vm242_vm9, %v212_v6, %v258_v14  ;;  %282 = vst [vmem:[%s711_s3 + $0x20] sm:$0xff] %v266_v17  ;;  %v217_v23 = vadd.f32 %v372_v16, %v642_v18  ;;  %v350_v24 = vpop.f32.mrb[13].mxu0  ;;  %v374_v25 = vpop.f32.mrb[13].mxu1 }
 0x111   :  { %290 = vst [vmem:[%s711_s3 + $0x60] sm:$0xff] %v274_v19  ;;  %v351_v26 = vadd.f32 %v350_v24, %v349_v20  ;;  %v375_v27 = vadd.f32 %v374_v25, %v373_v21  ;;  %vm235_vm10 = vcmp.ge.f32.partialorder %v177_v22, 0.0  ;;  %v251_v28 = vmul.f32 0.2, %v177_v22 }
 0x112   :  { %vm243_vm11 = vcmp.ge.f32.partialorder %v217_v23, 0.0  ;;  %v259_v29 = vmul.f32 0.2, %v217_v23 }
 0x113   :  { %v182_v30 = vadd.f32 %v351_v26, %v642_v18  ;;  %v222_v31 = vadd.f32 %v375_v27, %v642_v18  ;;  %v352_v32 = vpop.f32.mrb[14].mxu0  ;;  %v376_v33 = vpop.f32.mrb[14].mxu1  ;;  %v267_v34 = vsel %vm235_vm10, %v177_v22, %v251_v28 }
 0x114   :  { %v275_v35 = vsel %vm243_vm11, %v217_v23, %v259_v29  ;;  %v353_v36 = vpop.f32.mrb[15].mxu0  ;;  %v377_v37 = vpop.f32.mrb[15].mxu1  ;;  %283 = vst [vmem:[%s711_s3 + $0x28] sm:$0xff] %v267_v34 }
 0x115   :  { %291 = vst [vmem:[%s711_s3 + $0x68] sm:$0xff] %v275_v35  ;;  %vm236_vm12 = vcmp.ge.f32.partialorder %v182_v30, 0.0  ;;  %v252_v38 = vmul.f32 0.2, %v182_v30  ;;  %vm244_vm13 = vcmp.ge.f32.partialorder %v222_v31, 0.0  ;;  %v354_v40 = vadd.f32 %v353_v36, %v352_v32 }
 0x116   :  { %v260_v39 = vmul.f32 0.2, %v222_v31  ;;  %v378_v41 = vadd.f32 %v377_v37, %v376_v33 }
 0x117   :  { %v268_v42 = vsel %vm236_vm12, %v182_v30, %v252_v38  ;;  %v187_v44 = vadd.f32 %v354_v40, %v642_v18 }
 0x118   :  { %v276_v43 = vsel %vm244_vm13, %v222_v31, %v260_v39  ;;  %284 = vst [vmem:[%s711_s3 + $0x30] sm:$0xff] %v268_v42  ;;  %v227_v45 = vadd.f32 %v378_v41, %v642_v18 }
 0x119   :  { %292 = vst [vmem:[%s711_s3 + $0x70] sm:$0xff] %v276_v43  ;;  %vm237_vm14 = vcmp.ge.f32.partialorder %v187_v44, 0.0  ;;  %v253_v46 = vmul.f32 0.2, %v187_v44 }
 0x11a   :  { %vm245_vm15 = vcmp.ge.f32.partialorder %v227_v45, 0.0  ;;  %v261_v47 = vmul.f32 0.2, %v227_v45 }
 0x11b   :  { %v269_v48 = vsel %vm237_vm14, %v187_v44, %v253_v46 }
 0x11c   :  { %v277_v49 = vsel %vm245_vm15, %v227_v45, %v261_v47  ;;  %285 = vst [vmem:[%s711_s3 + $0x38] sm:$0xff] %v269_v48 }
 0x11d   :  { %293 = vst [vmem:[%s711_s3 + $0x78] sm:$0xff] %v277_v49 }

// kernel: encoder_forward.6
= control target key start
LH: loop header
LB: loop body
LE: loop exit
PB: predicated region body
PF: predicated region fallthrough
CT: control target
= control target key end

     0   :  { %s641_s1 = inlined_call_operand.vmem [shape: f32[512,128], index: 1, kind: input, shape index: {}]   ;;  %s642_s0 = inlined_call_operand.vmem [shape: f32[16,512], index: 0, kind: input, shape index: {}]   ;;  %s643_s2 = inlined_call_operand.vmem [shape: f32[1,128], index: 2, kind: input, shape index: {}]   ;;  %s644_s3 = inlined_call_operand.vmem [shape: f32[16,128], index: 3, kind: output, shape index: {}]  }
   0x1   :  { %v38_v0 = vld [vmem:[%s641_s1 + $0x80] sm:$0xff]  ;;  %v39_v1 = vld [vmem:[%s641_s1 + $0x88] sm:$0xff]  ;;  %v40_v11 = vld [vmem:[%s641_s1 + $0x90] sm:$0xff] }
   0x2   :  { %v22_v2 = vld [vmem:[%s641_s1] sm:$0xff]  ;;  %v332_v3 = vpack.c.bf16 %v39_v1, %v38_v0  ;;  %v23_v4 = vld [vmem:[%s641_s1 + $0x8] sm:$0xff]  ;;  %v41_v13 = vld [vmem:[%s641_s1 + $0x98] sm:$0xff] }
   0x3   :  { %v70_v5 = vld [vmem:[%s641_s1 + $0x180] sm:$0xff]  ;;  %v71_v6 = vld [vmem:[%s641_s1 + $0x188] sm:$0xff]  ;;  %v334_v7 = vpack.c.bf16 %v23_v4, %v22_v2  ;;  %v24_v14 = vld [vmem:[%s641_s1 + $0x10] sm:$0xff]  ;;  %v336_v16 = vpack.c.bf16 %v41_v13, %v40_v11 }
   0x4   :  { %v364_v8 = vpack.c.bf16 %v71_v6, %v70_v5  ;;  %v54_v9 = vld [vmem:[%s641_s1 + $0x100] sm:$0xff]  ;;  %v55_v10 = vld [vmem:[%s641_s1 + $0x108] sm:$0xff]  ;;  %333 = vmatprep.subr.bf16.mxu0 %v332_v3  ;;  %v25_v15 = vld [vmem:[%s641_s1 + $0x18] sm:$0xff] }
   0x5   :  { %v366_v12 = vpack.c.bf16 %v55_v10, %v54_v9  ;;  %335 = vmatpush3.bf16.msra.mxu0 %v334_v7  ;;  %v338_v17 = vpack.c.bf16 %v25_v15, %v24_v14  ;;  %v72_v18 = vld [vmem:[%s641_s1 + $0x190] sm:$0xff]  ;;  %v73_v19 = vld [vmem:[%s641_s1 + $0x198] sm:$0xff]  ;;  %v42_v23 = vld [vmem:[%s641_s1 + $0xa0] sm:$0xff] }
   0x6   :  { %365 = vmatprep.subr.bf16.mxu1 %v364_v8  ;;  %v56_v20 = vld [vmem:[%s641_s1 + $0x110] sm:$0xff]  ;;  %v368_v21 = vpack.c.bf16 %v73_v19, %v72_v18  ;;  %v57_v22 = vld [vmem:[%s641_s1 + $0x118] sm:$0xff]  ;;  %v43_v24 = vld [vmem:[%s641_s1 + $0xa8] sm:$0xff]  ;;  %337 = vmatprep.subr.bf16.mxu0 %v336_v16 }
   0x7   :  { %367 = vmatpush3.bf16.msra.mxu1 %v366_v12  ;;  %v370_v25 = vpack.c.bf16 %v57_v22, %v56_v20  ;;  %v340_v26 = vpack.c.bf16 %v43_v24, %v42_v23  ;;  %v26_v27 = vld [vmem:[%s641_s1 + $0x20] sm:$0xff]  ;;  %v27_v28 = vld [vmem:[%s641_s1 + $0x28] sm:$0xff]  ;;  %v44_v35 = vld [vmem:[%s641_s1 + $0xb0] sm:$0xff] }
   0x8   :  { %v74_v29 = vld [vmem:[%s641_s1 + $0x1a0] sm:$0xff]  ;;  %369 = vmatprep.subr.bf16.mxu1 %v368_v21  ;;  %v75_v30 = vld [vmem:[%s641_s1 + $0x1a8] sm:$0xff]  ;;  %v342_v33 = vpack.c.bf16 %v27_v28, %v26_v27  ;;  %v45_v36 = vld [vmem:[%s641_s1 + $0xb8] sm:$0xff] }
   0x9   :  { %v58_v31 = vld [vmem:[%s641_s1 + $0x120] sm:$0xff]  ;;  %v59_v32 = vld [vmem:[%s641_s1 + $0x128] sm:$0xff]  ;;  %339 = vmatpush3.bf16.msra.mxu0 %v338_v17  ;;  %v372_v34 = vpack.c.bf16 %v75_v30, %v74_v29  ;;  %v28_v37 = vld [vmem:[%s641_s1 + $0x30] sm:$0xff]  ;;  %v344_v39 = vpack.c.bf16 %v45_v36, %v44_v35 }
   0xa   :  { %341 = vmatprep.subr.bf16.mxu0 %v340_v26  ;;  %v374_v38 = vpack.c.bf16 %v59_v32, %v58_v31  ;;  %v29_v40 = vld [vmem:[%s641_s1 + $0x38] sm:$0xff]  ;;  %v76_v41 = vld [vmem:[%s641_s1 + $0x1b0] sm:$0xff]  ;;  %v46_v46 = vld [vmem:[%s641_s1 + $0xc0] sm:$0xff] }
   0xb   :  { %371 = vmatpush3.bf16.msra.mxu1 %v370_v25  ;;  %v77_v42 = vld [vmem:[%s641_s1 + $0x1b8] sm:$0xff]  ;;  %v60_v44 = vld [vmem:[%s641_s1 + $0x130] sm:$0xff]  ;;  %v47_v47 = vld [vmem:[%s641_s1 + $0xc8] sm:$0xff]  ;;  %v346_v48 = vpack.c.bf16 %v29_v40, %v28_v37 }
   0xc   :  { %373 = vmatprep.subr.bf16.mxu1 %v372_v34  ;;  %v376_v43 = vpack.c.bf16 %v77_v42, %v76_v41  ;;  %v61_v45 = vld [vmem:[%s641_s1 + $0x138] sm:$0xff]  ;;  %v78_v49 = vld [vmem:[%s641_s1 + $0x1c0] sm:$0xff]  ;;  %v79_v50 = vld [vmem:[%s641_s1 + $0x1c8] sm:$0xff]  ;;  %v348_v52 = vpack.c.bf16 %v47_v47, %v46_v46 }
   0xd   :  { %343 = vmatpush3.bf16.msra.mxu0 %v342_v33  ;;  %v378_v51 = vpack.c.bf16 %v61_v45, %v60_v44  ;;  %v30_v53 = vld [vmem:[%s641_s1 + $0x40] sm:$0xff]  ;;  %v31_v54 = vld [vmem:[%s641_s1 + $0x48] sm:$0xff]  ;;  %v380_v56 = vpack.c.bf16 %v79_v50, %v78_v49  ;;  %v48_v58 = vld [vmem:[%s641_s1 + $0xd0] sm:$0xff] }
   0xe   :  { %345 = vmatprep.subr.bf16.mxu0 %v344_v39  ;;  %v62_v55 = vld [vmem:[%s641_s1 + $0x140] sm:$0xff]  ;;  %v63_v57 = vld [vmem:[%s641_s1 + $0x148] sm:$0xff]  ;;  %v49_v59 = vld [vmem:[%s641_s1 + $0xd8] sm:$0xff]  ;;  %v350_v62 = vpack.c.bf16 %v31_v54, %v30_v53 }
   0xf   :  { %375 = vmatpush3.bf16.msra.mxu1 %v374_v38  ;;  %v80_v60 = vld [vmem:[%s641_s1 + $0x1d0] sm:$0xff]  ;;  %v81_v61 = vld [vmem:[%s641_s1 + $0x1d8] sm:$0xff]  ;;  %v382_v63 = vpack.c.bf16 %v63_v57, %v62_v55  ;;  %v352_v0 = vpack.c.bf16 %v49_v59, %v48_v58  ;;  %v50_v6 = vld [vmem:[%s641_s1 + $0xe0] sm:$0xff] }
  0x10   :  { %377 = vmatprep.subr.bf16.mxu1 %v376_v43  ;;  %v32_v1 = vld [vmem:[%s641_s1 + $0x50] sm:$0xff]  ;;  %v33_v2 = vld [vmem:[%s641_s1 + $0x58] sm:$0xff]  ;;  %v384_v4 = vpack.c.bf16 %v81_v61, %v80_v60  ;;  %v51_v7 = vld [vmem:[%s641_s1 + $0xe8] sm:$0xff] }
  0x11   :  { %347 = vmatpush3.bf16.msra.mxu0 %v346_v48  ;;  %v64_v3 = vld [vmem:[%s641_s1 + $0x150] sm:$0xff]  ;;  %v65_v5 = vld [vmem:[%s641_s1 + $0x158] sm:$0xff]  ;;  %v82_v8 = vld [vmem:[%s641_s1 + $0x1e0] sm:$0xff]  ;;  %v354_v10 = vpack.c.bf16 %v33_v2, %v32_v1  ;;  %v356_v14 = vpack.c.bf16 %v51_v7, %v50_v6 }
  0x12   :  { %349 = vmatprep.subr.bf16.mxu0 %v348_v52  ;;  %v83_v9 = vld [vmem:[%s641_s1 + $0x1e8] sm:$0xff]  ;;  %v34_v11 = vld [vmem:[%s641_s1 + $0x60] sm:$0xff]  ;;  %v386_v13 = vpack.c.bf16 %v65_v5, %v64_v3  ;;  %v52_v19 = vld [vmem:[%s641_s1 + $0xf0] sm:$0xff] }
  0x13   :  { %379 = vmatpush3.bf16.msra.mxu1 %v378_v51  ;;  %v35_v12 = vld [vmem:[%s641_s1 + $0x68] sm:$0xff]  ;;  %v66_v15 = vld [vmem:[%s641_s1 + $0x160] sm:$0xff]  ;;  %v388_v18 = vpack.c.bf16 %v83_v9, %v82_v8  ;;  %v53_v20 = vld [vmem:[%s641_s1 + $0xf8] sm:$0xff] }
  0x14   :  { %381 = vmatprep.subr.bf16.mxu1 %v380_v56  ;;  %v67_v16 = vld [vmem:[%s641_s1 + $0x168] sm:$0xff]  ;;  %v17_v21 = vld [vmem:[%s642_s0 + $0x18] sm:$0xff]  ;;  %v84_v22 = vld [vmem:[%s641_s1 + $0x1f0] sm:$0xff]  ;;  %v358_v24 = vpack.c.bf16 %v35_v12, %v34_v11  ;;  %v360_v26 = vpack.c.bf16 %v53_v20, %v52_v19 }
  0x15   :  { %351 = vmatpush3.bf16.msra.mxu0 %v350_v62  ;;  %v15_v17 = vld [vmem:[%s642_s0 + $0x8] sm:$0xff]  ;;  %v85_v23 = vld [vmem:[%s641_s1 + $0x1f8] sm:$0xff]  ;;  %232 = vmatprep.mubr.f32.mxu1 %v17_v21  ;;  %v390_v25 = vpack.c.bf16 %v67_v16, %v66_v15  ;;  %v36_v27 = vld [vmem:[%s641_s1 + $0x70] sm:$0xff] }
  0x16   :  { %353 = vmatprep.subr.bf16.mxu0 %v352_v0  ;;  %157 = vmatprep.mubr.f32.mxu0 %v15_v17  ;;  %v37_v28 = vld [vmem:[%s641_s1 + $0x78] sm:$0xff]  ;;  %v392_v29 = vpack.c.bf16 %v85_v23, %v84_v22  ;;  %v68_v30 = vld [vmem:[%s641_s1 + $0x170] sm:$0xff]  ;;  %v14_v34 = vld [vmem:[%s642_s0] sm:$0xff] }
  0x17   :  { %383 = vmatpush3.bf16.msra.mxu1 %v382_v63  ;;  %v69_v31 = vld [vmem:[%s641_s1 + $0x178] sm:$0xff]  ;;  %v362_v32 = vpack.c.bf16 %v37_v28, %v36_v27  ;;  %v16_v35 = vld [vmem:[%s642_s0 + $0x10] sm:$0xff]  ;;  %v19_v36 = vld [vmem:[%s642_s0 + $0x28] sm:$0xff] }
  0x18   :  { %385 = vmatprep.subr.bf16.mxu1 %v384_v4  ;;  %v394_v33 = vpack.c.bf16 %v69_v31, %v68_v30  ;;  %v21_v37 = vld [vmem:[%s642_s0 + $0x38] sm:$0xff]  ;;  %v18_v38 = vld [vmem:[%s642_s0 + $0x20] sm:$0xff]  ;;  %v20_v39 = vld [vmem:[%s642_s0 + $0x30] sm:$0xff] }
  0x19   :  { %355 = vmatpush3.bf16.msra.mxu0 %v354_v10  ;;  %v255_v41 = vld [vmem:[%s643_s2] ss:$0 sm:$0xff] }
  0x1a   :  { %357 = vmatprep.subr.bf16.mxu0 %v356_v14 }
  0x1b   :  { %387 = vmatpush3.bf16.msra.mxu1 %v386_v13 }
  0x1c   :  { %389 = vmatprep.subr.bf16.mxu1 %v388_v18 }
  0x1d   :  { %359 = vmatpush3.bf16.msra.mxu0 %v358_v24 }
  0x1e   :  { %361 = vmatprep.subr.bf16.mxu0 %v360_v26 }
  0x1f   :  { %391 = vmatpush3.bf16.msra.mxu1 %v390_v25 }
  0x20   :  { %393 = vmatprep.subr.bf16.mxu1 %v392_v29 }
  0x21   :  { %363 = vmatpush3.bf16.msra.mxu0 %v362_v32 }
  0x23   :  { %395 = vmatpush3.bf16.msra.mxu1 %v394_v33 }
  0x24   :  { %158 = vmatmul.mubr.f32.vlgmr.msra.gmra.mrb[0].mxu0 %v14_v34 }
  0x25   :  { %162 = vmatprep.mubr.f32.mxu0 %v19_v36 }
  0x26   :  { %233 = vmatmul.mubr.f32.vlgmr.msra.gmra.mrb[0].mxu1 %v16_v35 }
  0x27   :  { %237 = vmatprep.mubr.f32.mxu1 %v21_v37 }
  0x28   :  { %163 = vmatmul.mubr.f32.gmra.mrb[2].mxu0 %v18_v38 }
  0x2a   :  { %238 = vmatmul.mubr.f32.gmra.mrb[2].mxu1 %v20_v39 }
  0xf7   :  { %v288_v40 = vpop.f32.mrb[0].mxu0 }
  0xf8   :  { %v289_v42 = vpop.f32.mrb[1].mxu0 }
  0xf9   :  { %v326_v43 = vpop.f32.mrb[0].mxu1  ;;  %v290_v44 = vadd.f32 %v289_v42, %v288_v40 }
  0xfa   :  { %v327_v45 = vpop.f32.mrb[1].mxu1 }
  0xfb   :  { %v328_v46 = vadd.f32 %v327_v45, %v326_v43  ;;  %v160_v47 = vadd.f32 %v290_v44, %v255_v41  ;;  %v291_v48 = vpop.f32.mrb[2].mxu0 }
  0xfc   :  { %v292_v49 = vpop.f32.mrb[3].mxu0 }
  0xfd   :  { %v329_v50 = vpop.f32.mrb[2].mxu1  ;;  %v235_v51 = vadd.f32 %v328_v46, %v160_v47  ;;  %v293_v52 = vadd.f32 %v292_v49, %v291_v48 }
  0xfe   :  { %v330_v53 = vpop.f32.mrb[3].mxu1 }
  0xff   :  { %v331_v54 = vadd.f32 %v330_v53, %v329_v50  ;;  %vm243_vm0 = vcmp.ge.f32.partialorder %v235_v51, 0.0  ;;  %v245_v55 = vmul.f32 0.2, %v235_v51  ;;  %v165_v56 = vadd.f32 %v293_v52, %v255_v41 }
 0x101   :  { %v247_v57 = vsel %vm243_vm0, %v235_v51, %v245_v55  ;;  %v240_v58 = vadd.f32 %v331_v54, %v165_v56 }
 0x102   :  { %249 = vst [vmem:[%s644_s3] sm:$0xff] %v247_v57 }
 0x103   :  { %vm244_vm1 = vcmp.ge.f32.partialorder %v240_v58, 0.0  ;;  %v246_v59 = vmul.f32 0.2, %v240_v58 }
 0x105   :  { %v248_v60 = vsel %vm244_vm1, %v240_v58, %v246_v59 }
 0x106   :  { %250 = vst [vmem:[%s644_s3 + $0x8] sm:$0xff] %v248_v60 }

// kernel: encoder_forward.7
= control target key start
LH: loop header
LB: loop body
LE: loop exit
PB: predicated region body
PF: predicated region fallthrough
CT: control target
= control target key end

     0   :  { %s1714_s1 = inlined_call_operand.vmem [shape: f32[1024,256], index: 1, kind: input, shape index: {}]   ;;  %s1715_s0 = inlined_call_operand.vmem [shape: f32[8,1024], index: 0, kind: input, shape index: {}]   ;;  %s1716_s2 = inlined_call_operand.vmem [shape: f32[1,256], index: 2, kind: input, shape index: {}]   ;;  %s1717_s5 = inlined_call_operand.vmem [shape: f32[8,128], index: 5, kind: output, shape index: {1}]   ;;  %s1718_s6 = inlined_call_operand.vmem [shape: f32[8,128], index: 6, kind: output, shape index: {2}]   ;;  %s1719_s3 = inlined_call_operand.vmem [shape: f32[8,128], index: 3, kind: input, shape index: {}]   ;;  %s1720_s4 = inlined_call_operand.vmem [shape: f32[8,128], index: 4, kind: output, shape index: {0}]  }
   0x1   :  { %v29_v0 = vld [vmem:[%s1714_s1 + $0x8] sm:$0xff]  ;;  %v31_v1 = vld [vmem:[%s1714_s1 + $0x18] sm:$0xff]  ;;  %v28_v5 = vld [vmem:[%s1714_s1] sm:$0xff] }
   0x2   :  { %v157_v2 = vld [vmem:[%s1714_s1 + $0x408] sm:$0xff]  ;;  %v606_v3 = vpack.c.bf16 %v31_v1, %v29_v0  ;;  %v159_v4 = vld [vmem:[%s1714_s1 + $0x418] sm:$0xff]  ;;  %v30_v6 = vld [vmem:[%s1714_s1 + $0x10] sm:$0xff] }
   0x3   :  { %v734_v7 = vpack.c.bf16 %v159_v4, %v157_v2  ;;  %v608_v8 = vpack.c.bf16 %v30_v6, %v28_v5  ;;  %v156_v9 = vld [vmem:[%s1714_s1 + $0x400] sm:$0xff]  ;;  %v158_v10 = vld [vmem:[%s1714_s1 + $0x410] sm:$0xff]  ;;  %v33_v11 = vld [vmem:[%s1714_s1 + $0x28] sm:$0xff] }
   0x4   :  { %607 = vmatprep.subr.bf16.mxu1 %v606_v3  ;;  %v736_v12 = vpack.c.bf16 %v158_v10, %v156_v9  ;;  %v35_v13 = vld [vmem:[%s1714_s1 + $0x38] sm:$0xff]  ;;  %v161_v14 = vld [vmem:[%s1714_s1 + $0x428] sm:$0xff]  ;;  %v32_v18 = vld [vmem:[%s1714_s1 + $0x20] sm:$0xff] }
   0x5   :  { %v163_v15 = vld [vmem:[%s1714_s1 + $0x438] sm:$0xff]  ;;  %735 = vmatprep.subr.bf16.mxu0 %v734_v7  ;;  %609 = vmatpush1.bf16.msra.mxu1 %v608_v8  ;;  %v610_v16 = vpack.c.bf16 %v35_v13, %v33_v11  ;;  %v34_v19 = vld [vmem:[%s1714_s1 + $0x30] sm:$0xff]  ;;  %v160_v20 = vld [vmem:[%s1714_s1 + $0x420] sm:$0xff] }
   0x6   :  { %v738_v17 = vpack.c.bf16 %v163_v15, %v161_v14  ;;  %737 = vmatpush1.bf16.msra.mxu0 %v736_v12  ;;  %v612_v21 = vpack.c.bf16 %v34_v19, %v32_v18  ;;  %v162_v22 = vld [vmem:[%s1714_s1 + $0x430] sm:$0xff]  ;;  %v37_v23 = vld [vmem:[%s1714_s1 + $0x48] sm:$0xff]  ;;  %v39_v24 = vld [vmem:[%s1714_s1 + $0x58] sm:$0xff] }
   0x7   :  { %611 = vmatprep.subr.bf16.mxu1 %v610_v16  ;;  %v740_v25 = vpack.c.bf16 %v162_v22, %v160_v20  ;;  %v614_v26 = vpack.c.bf16 %v39_v24, %v37_v23  ;;  %v165_v27 = vld [vmem:[%s1714_s1 + $0x448] sm:$0xff]  ;;  %v167_v28 = vld [vmem:[%s1714_s1 + $0x458] sm:$0xff]  ;;  %v36_v29 = vld [vmem:[%s1714_s1 + $0x40] sm:$0xff] }
   0x8   :  { %739 = vmatprep.subr.bf16.mxu0 %v738_v17  ;;  %v742_v30 = vpack.c.bf16 %v167_v28, %v165_v27  ;;  %v38_v31 = vld [vmem:[%s1714_s1 + $0x50] sm:$0xff]  ;;  %v164_v32 = vld [vmem:[%s1714_s1 + $0x440] sm:$0xff]  ;;  %v41_v35 = vld [vmem:[%s1714_s1 + $0x68] sm:$0xff] }
   0x9   :  { %v166_v33 = vld [vmem:[%s1714_s1 + $0x450] sm:$0xff]  ;;  %613 = vmatpush1.bf16.msra.mxu1 %v612_v21  ;;  %v616_v34 = vpack.c.bf16 %v38_v31, %v36_v29  ;;  %v43_v36 = vld [vmem:[%s1714_s1 + $0x78] sm:$0xff]  ;;  %v169_v37 = vld [vmem:[%s1714_s1 + $0x468] sm:$0xff] }
   0xa   :  { %741 = vmatpush1.bf16.msra.mxu0 %v740_v25  ;;  %615 = vmatprep.subr.bf16.mxu1 %v614_v26  ;;  %v744_v38 = vpack.c.bf16 %v166_v33, %v164_v32  ;;  %v618_v39 = vpack.c.bf16 %v43_v36, %v41_v35  ;;  %v171_v40 = vld [vmem:[%s1714_s1 + $0x478] sm:$0xff]  ;;  %v40_v41 = vld [vmem:[%s1714_s1 + $0x60] sm:$0xff]  ;;  %v42_v42 = vld [vmem:[%s1714_s1 + $0x70] sm:$0xff] }
   0xb   :  { %743 = vmatprep.subr.bf16.mxu0 %v742_v30  ;;  %v746_v43 = vpack.c.bf16 %v171_v40, %v169_v37  ;;  %v168_v44 = vld [vmem:[%s1714_s1 + $0x460] sm:$0xff]  ;;  %v170_v45 = vld [vmem:[%s1714_s1 + $0x470] sm:$0xff]  ;;  %v45_v46 = vld [vmem:[%s1714_s1 + $0x88] sm:$0xff]  ;;  %v620_v50 = vpack.c.bf16 %v42_v42, %v40_v41 }
   0xc   :  { %v47_v47 = vld [vmem:[%s1714_s1 + $0x98] sm:$0xff]  ;;  %v173_v48 = vld [vmem:[%s1714_s1 + $0x488] sm:$0xff]  ;;  %v748_v51 = vpack.c.bf16 %v170_v45, %v168_v44  ;;  %v44_v53 = vld [vmem:[%s1714_s1 + $0x80] sm:$0xff] }
   0xd   :  { %v175_v49 = vld [vmem:[%s1714_s1 + $0x498] sm:$0xff]  ;;  %617 = vmatpush1.bf16.msra.mxu1 %v616_v34  ;;  %v622_v52 = vpack.c.bf16 %v47_v47, %v45_v46  ;;  %v46_v54 = vld [vmem:[%s1714_s1 + $0x90] sm:$0xff]  ;;  %v172_v55 = vld [vmem:[%s1714_s1 + $0x480] sm:$0xff] }
   0xe   :  { %745 = vmatpush1.bf16.msra.mxu0 %v744_v38  ;;  %619 = vmatprep.subr.bf16.mxu1 %v618_v39  ;;  %v750_v56 = vpack.c.bf16 %v175_v49, %v173_v48  ;;  %v174_v57 = vld [vmem:[%s1714_s1 + $0x490] sm:$0xff]  ;;  %v49_v58 = vld [vmem:[%s1714_s1 + $0xa8] sm:$0xff]  ;;  %v51_v59 = vld [vmem:[%s1714_s1 + $0xb8] sm:$0xff]  ;;  %v624_v62 = vpack.c.bf16 %v46_v54, %v44_v53 }
   0xf   :  { %747 = vmatprep.subr.bf16.mxu0 %v746_v43  ;;  %v177_v60 = vld [vmem:[%s1714_s1 + $0x4a8] sm:$0xff]  ;;  %v179_v61 = vld [vmem:[%s1714_s1 + $0x4b8] sm:$0xff]  ;;  %v752_v63 = vpack.c.bf16 %v174_v57, %v172_v55  ;;  %v626_v0 = vpack.c.bf16 %v51_v59, %v49_v58  ;;  %v48_v1 = vld [vmem:[%s1714_s1 + $0xa0] sm:$0xff] }
  0x10   :  { %v50_v2 = vld [vmem:[%s1714_s1 + $0xb0] sm:$0xff]  ;;  %v176_v3 = vld [vmem:[%s1714_s1 + $0x4a0] sm:$0xff]  ;;  %v754_v4 = vpack.c.bf16 %v179_v61, %v177_v60  ;;  %v53_v6 = vld [vmem:[%s1714_s1 + $0xc8] sm:$0xff] }
  0x11   :  { %621 = vmatpush1.bf16.msra.mxu1 %v620_v50  ;;  %v178_v5 = vld [vmem:[%s1714_s1 + $0x4b0] sm:$0xff]  ;;  %v55_v7 = vld [vmem:[%s1714_s1 + $0xd8] sm:$0xff]  ;;  %v181_v8 = vld [vmem:[%s1714_s1 + $0x4c8] sm:$0xff]  ;;  %v628_v10 = vpack.c.bf16 %v50_v2, %v48_v1 }
  0x12   :  { %749 = vmatpush1.bf16.msra.mxu0 %v748_v51  ;;  %623 = vmatprep.subr.bf16.mxu1 %v622_v52  ;;  %v183_v9 = vld [vmem:[%s1714_s1 + $0x4d8] sm:$0xff]  ;;  %v756_v11 = vpack.c.bf16 %v178_v5, %v176_v3  ;;  %v630_v12 = vpack.c.bf16 %v55_v7, %v53_v6  ;;  %v52_v13 = vld [vmem:[%s1714_s1 + $0xc0] sm:$0xff]  ;;  %v54_v14 = vld [vmem:[%s1714_s1 + $0xd0] sm:$0xff] }
  0x13   :  { %751 = vmatprep.subr.bf16.mxu0 %v750_v56  ;;  %v180_v15 = vld [vmem:[%s1714_s1 + $0x4c0] sm:$0xff]  ;;  %v758_v16 = vpack.c.bf16 %v183_v9, %v181_v8  ;;  %v182_v17 = vld [vmem:[%s1714_s1 + $0x4d0] sm:$0xff]  ;;  %v57_v18 = vld [vmem:[%s1714_s1 + $0xe8] sm:$0xff]  ;;  %v632_v22 = vpack.c.bf16 %v54_v14, %v52_v13 }
  0x14   :  { %v59_v19 = vld [vmem:[%s1714_s1 + $0xf8] sm:$0xff]  ;;  %v185_v20 = vld [vmem:[%s1714_s1 + $0x4e8] sm:$0xff]  ;;  %v760_v23 = vpack.c.bf16 %v182_v17, %v180_v15  ;;  %v56_v25 = vld [vmem:[%s1714_s1 + $0xe0] sm:$0xff] }
  0x15   :  { %625 = vmatpush1.bf16.msra.mxu1 %v624_v62  ;;  %v187_v21 = vld [vmem:[%s1714_s1 + $0x4f8] sm:$0xff]  ;;  %v634_v24 = vpack.c.bf16 %v59_v19, %v57_v18  ;;  %v58_v26 = vld [vmem:[%s1714_s1 + $0xf0] sm:$0xff]  ;;  %v184_v27 = vld [vmem:[%s1714_s1 + $0x4e0] sm:$0xff] }
  0x16   :  { %753 = vmatpush1.bf16.msra.mxu0 %v752_v63  ;;  %627 = vmatprep.subr.bf16.mxu1 %v626_v0  ;;  %v762_v28 = vpack.c.bf16 %v187_v21, %v185_v20  ;;  %v186_v29 = vld [vmem:[%s1714_s1 + $0x4f0] sm:$0xff]  ;;  %v61_v30 = vld [vmem:[%s1714_s1 + $0x108] sm:$0xff]  ;;  %v63_v31 = vld [vmem:[%s1714_s1 + $0x118] sm:$0xff]  ;;  %v636_v34 = vpack.c.bf16 %v58_v26, %v56_v25 }
  0x17   :  { %755 = vmatprep.subr.bf16.mxu0 %v754_v4  ;;  %v189_v32 = vld [vmem:[%s1714_s1 + $0x508] sm:$0xff]  ;;  %v191_v33 = vld [vmem:[%s1714_s1 + $0x518] sm:$0xff]  ;;  %v764_v35 = vpack.c.bf16 %v186_v29, %v184_v27  ;;  %v638_v36 = vpack.c.bf16 %v63_v31, %v61_v30  ;;  %v60_v37 = vld [vmem:[%s1714_s1 + $0x100] sm:$0xff] }
  0x18   :  { %v62_v38 = vld [vmem:[%s1714_s1 + $0x110] sm:$0xff]  ;;  %v188_v39 = vld [vmem:[%s1714_s1 + $0x500] sm:$0xff]  ;;  %v766_v40 = vpack.c.bf16 %v191_v33, %v189_v32  ;;  %v65_v42 = vld [vmem:[%s1714_s1 + $0x128] sm:$0xff] }
  0x19   :  { %629 = vmatpush1.bf16.msra.mxu1 %v628_v10  ;;  %v190_v41 = vld [vmem:[%s1714_s1 + $0x510] sm:$0xff]  ;;  %v67_v43 = vld [vmem:[%s1714_s1 + $0x138] sm:$0xff]  ;;  %v193_v44 = vld [vmem:[%s1714_s1 + $0x528] sm:$0xff]  ;;  %v640_v46 = vpack.c.bf16 %v62_v38, %v60_v37 }
  0x1a   :  { %757 = vmatpush1.bf16.msra.mxu0 %v756_v11  ;;  %631 = vmatprep.subr.bf16.mxu1 %v630_v12  ;;  %v195_v45 = vld [vmem:[%s1714_s1 + $0x538] sm:$0xff]  ;;  %v768_v47 = vpack.c.bf16 %v190_v41, %v188_v39  ;;  %v642_v48 = vpack.c.bf16 %v67_v43, %v65_v42  ;;  %v64_v49 = vld [vmem:[%s1714_s1 + $0x120] sm:$0xff]  ;;  %v66_v50 = vld [vmem:[%s1714_s1 + $0x130] sm:$0xff] }
  0x1b   :  { %759 = vmatprep.subr.bf16.mxu0 %v758_v16  ;;  %v192_v51 = vld [vmem:[%s1714_s1 + $0x520] sm:$0xff]  ;;  %v770_v52 = vpack.c.bf16 %v195_v45, %v193_v44  ;;  %v194_v53 = vld [vmem:[%s1714_s1 + $0x530] sm:$0xff]  ;;  %v69_v54 = vld [vmem:[%s1714_s1 + $0x148] sm:$0xff]  ;;  %v644_v58 = vpack.c.bf16 %v66_v50, %v64_v49 }
  0x1c   :  { %v71_v55 = vld [vmem:[%s1714_s1 + $0x158] sm:$0xff]  ;;  %v197_v56 = vld [vmem:[%s1714_s1 + $0x548] sm:$0xff]  ;;  %v772_v59 = vpack.c.bf16 %v194_v53, %v192_v51  ;;  %v68_v61 = vld [vmem:[%s1714_s1 + $0x140] sm:$0xff] }
  0x1d   :  { %633 = vmatpush1.bf16.msra.mxu1 %v632_v22  ;;  %v199_v57 = vld [vmem:[%s1714_s1 + $0x558] sm:$0xff]  ;;  %v646_v60 = vpack.c.bf16 %v71_v55, %v69_v54  ;;  %v70_v62 = vld [vmem:[%s1714_s1 + $0x150] sm:$0xff]  ;;  %v196_v63 = vld [vmem:[%s1714_s1 + $0x540] sm:$0xff] }
  0x1e   :  { %761 = vmatpush1.bf16.msra.mxu0 %v760_v23  ;;  %635 = vmatprep.subr.bf16.mxu1 %v634_v24  ;;  %v774_v0 = vpack.c.bf16 %v199_v57, %v197_v56  ;;  %v198_v1 = vld [vmem:[%s1714_s1 + $0x550] sm:$0xff]  ;;  %v73_v2 = vld [vmem:[%s1714_s1 + $0x168] sm:$0xff]  ;;  %v75_v3 = vld [vmem:[%s1714_s1 + $0x178] sm:$0xff]  ;;  %v648_v6 = vpack.c.bf16 %v70_v62, %v68_v61 }
  0x1f   :  { %763 = vmatprep.subr.bf16.mxu0 %v762_v28  ;;  %v201_v4 = vld [vmem:[%s1714_s1 + $0x568] sm:$0xff]  ;;  %v203_v5 = vld [vmem:[%s1714_s1 + $0x578] sm:$0xff]  ;;  %v72_v7 = vld [vmem:[%s1714_s1 + $0x160] sm:$0xff]  ;;  %v776_v8 = vpack.c.bf16 %v198_v1, %v196_v63  ;;  %v650_v9 = vpack.c.bf16 %v75_v3, %v73_v2 }
  0x20   :  { %v74_v10 = vld [vmem:[%s1714_s1 + $0x170] sm:$0xff]  ;;  %v200_v11 = vld [vmem:[%s1714_s1 + $0x560] sm:$0xff]  ;;  %v778_v13 = vpack.c.bf16 %v203_v5, %v201_v4  ;;  %v77_v14 = vld [vmem:[%s1714_s1 + $0x188] sm:$0xff] }
  0x21   :  { %637 = vmatpush1.bf16.msra.mxu1 %v636_v34  ;;  %v202_v12 = vld [vmem:[%s1714_s1 + $0x570] sm:$0xff]  ;;  %v79_v15 = vld [vmem:[%s1714_s1 + $0x198] sm:$0xff]  ;;  %v21_v16 = vld [vmem:[%s1715_s0 + $0x8] sm:$0xff]  ;;  %v652_v20 = vpack.c.bf16 %v74_v10, %v72_v7 }
  0x22   :  { %765 = vmatpush1.bf16.msra.mxu0 %v764_v35  ;;  %639 = vmatprep.subr.bf16.mxu1 %v638_v36  ;;  %v205_v17 = vld [vmem:[%s1714_s1 + $0x588] sm:$0xff]  ;;  %v207_v18 = vld [vmem:[%s1714_s1 + $0x598] sm:$0xff]  ;;  %v780_v21 = vpack.c.bf16 %v202_v12, %v200_v11  ;;  %v654_v22 = vpack.c.bf16 %v79_v15, %v77_v14  ;;  %v76_v23 = vld [vmem:[%s1714_s1 + $0x180] sm:$0xff] }
  0x23   :  { %767 = vmatprep.subr.bf16.mxu0 %v766_v40  ;;  %360 = vmatprep.mubr.f32.mxu1 %v21_v16  ;;  %v25_v19 = vld [vmem:[%s1715_s0 + $0x28] sm:$0xff]  ;;  %v78_v24 = vld [vmem:[%s1714_s1 + $0x190] sm:$0xff]  ;;  %v204_v25 = vld [vmem:[%s1714_s1 + $0x580] sm:$0xff]  ;;  %v782_v26 = vpack.c.bf16 %v207_v18, %v205_v17 }
  0x24   :  { %502 = vmatprep.mubr.f32.mxu0 %v25_v19  ;;  %v206_v27 = vld [vmem:[%s1714_s1 + $0x590] sm:$0xff]  ;;  %v81_v28 = vld [vmem:[%s1714_s1 + $0x1a8] sm:$0xff]  ;;  %v83_v29 = vld [vmem:[%s1714_s1 + $0x1b8] sm:$0xff]  ;;  %v656_v32 = vpack.c.bf16 %v78_v24, %v76_v23 }
  0x25   :  { %641 = vmatpush1.bf16.msra.mxu1 %v640_v46  ;;  %v209_v30 = vld [vmem:[%s1714_s1 + $0x5a8] sm:$0xff]  ;;  %v211_v31 = vld [vmem:[%s1714_s1 + $0x5b8] sm:$0xff]  ;;  %v784_v33 = vpack.c.bf16 %v206_v27, %v204_v25  ;;  %v658_v34 = vpack.c.bf16 %v83_v29, %v81_v28  ;;  %v80_v35 = vld [vmem:[%s1714_s1 + $0x1a0] sm:$0xff] }
  0x26   :  { %769 = vmatpush1.bf16.msra.mxu0 %v768_v47  ;;  %643 = vmatprep.subr.bf16.mxu1 %v642_v48  ;;  %v82_v36 = vld [vmem:[%s1714_s1 + $0x1b0] sm:$0xff]  ;;  %v208_v37 = vld [vmem:[%s1714_s1 + $0x5a0] sm:$0xff]  ;;  %v786_v38 = vpack.c.bf16 %v211_v31, %v209_v30  ;;  %v85_v40 = vld [vmem:[%s1714_s1 + $0x1c8] sm:$0xff] }
  0x27   :  { %771 = vmatprep.subr.bf16.mxu0 %v770_v52  ;;  %v210_v39 = vld [vmem:[%s1714_s1 + $0x5b0] sm:$0xff]  ;;  %v87_v41 = vld [vmem:[%s1714_s1 + $0x1d8] sm:$0xff]  ;;  %v213_v42 = vld [vmem:[%s1714_s1 + $0x5c8] sm:$0xff]  ;;  %v660_v44 = vpack.c.bf16 %v82_v36, %v80_v35 }
  0x28   :  { %v215_v43 = vld [vmem:[%s1714_s1 + $0x5d8] sm:$0xff]  ;;  %v788_v45 = vpack.c.bf16 %v210_v39, %v208_v37  ;;  %v662_v46 = vpack.c.bf16 %v87_v41, %v85_v40  ;;  %v84_v47 = vld [vmem:[%s1714_s1 + $0x1c0] sm:$0xff]  ;;  %v86_v48 = vld [vmem:[%s1714_s1 + $0x1d0] sm:$0xff] }
  0x29   :  { %645 = vmatpush1.bf16.msra.mxu1 %v644_v58  ;;  %v212_v49 = vld [vmem:[%s1714_s1 + $0x5c0] sm:$0xff]  ;;  %v790_v50 = vpack.c.bf16 %v215_v43, %v213_v42  ;;  %v214_v51 = vld [vmem:[%s1714_s1 + $0x5d0] sm:$0xff]  ;;  %v89_v52 = vld [vmem:[%s1714_s1 + $0x1e8] sm:$0xff]  ;;  %v664_v56 = vpack.c.bf16 %v86_v48, %v84_v47 }
  0x2a   :  { %773 = vmatpush1.bf16.msra.mxu0 %v772_v59  ;;  %647 = vmatprep.subr.bf16.mxu1 %v646_v60  ;;  %v91_v53 = vld [vmem:[%s1714_s1 + $0x1f8] sm:$0xff]  ;;  %v217_v54 = vld [vmem:[%s1714_s1 + $0x5e8] sm:$0xff]  ;;  %v792_v57 = vpack.c.bf16 %v214_v51, %v212_v49  ;;  %v88_v59 = vld [vmem:[%s1714_s1 + $0x1e0] sm:$0xff] }
  0x2b   :  { %775 = vmatprep.subr.bf16.mxu0 %v774_v0  ;;  %v219_v55 = vld [vmem:[%s1714_s1 + $0x5f8] sm:$0xff]  ;;  %v666_v58 = vpack.c.bf16 %v91_v53, %v89_v52  ;;  %v90_v60 = vld [vmem:[%s1714_s1 + $0x1f0] sm:$0xff]  ;;  %v216_v61 = vld [vmem:[%s1714_s1 + $0x5e0] sm:$0xff] }
  0x2c   :  { %v794_v62 = vpack.c.bf16 %v219_v55, %v217_v54  ;;  %v218_v63 = vld [vmem:[%s1714_s1 + $0x5f0] sm:$0xff]  ;;  %v93_v0 = vld [vmem:[%s1714_s1 + $0x208] sm:$0xff]  ;;  %v95_v1 = vld [vmem:[%s1714_s1 + $0x218] sm:$0xff]  ;;  %v668_v4 = vpack.c.bf16 %v90_v60, %v88_v59 }
  0x2d   :  { %649 = vmatpush1.bf16.msra.mxu1 %v648_v6  ;;  %v221_v2 = vld [vmem:[%s1714_s1 + $0x608] sm:$0xff]  ;;  %v223_v3 = vld [vmem:[%s1714_s1 + $0x618] sm:$0xff]  ;;  %v796_v5 = vpack.c.bf16 %v218_v63, %v216_v61  ;;  %v670_v6 = vpack.c.bf16 %v95_v1, %v93_v0  ;;  %v92_v7 = vld [vmem:[%s1714_s1 + $0x200] sm:$0xff] }
  0x2e   :  { %777 = vmatpush1.bf16.msra.mxu0 %v776_v8  ;;  %651 = vmatprep.subr.bf16.mxu1 %v650_v9  ;;  %v94_v8 = vld [vmem:[%s1714_s1 + $0x210] sm:$0xff]  ;;  %v220_v9 = vld [vmem:[%s1714_s1 + $0x600] sm:$0xff]  ;;  %v798_v10 = vpack.c.bf16 %v223_v3, %v221_v2  ;;  %v97_v12 = vld [vmem:[%s1714_s1 + $0x228] sm:$0xff] }
  0x2f   :  { %779 = vmatprep.subr.bf16.mxu0 %v778_v13  ;;  %v222_v11 = vld [vmem:[%s1714_s1 + $0x610] sm:$0xff]  ;;  %v99_v13 = vld [vmem:[%s1714_s1 + $0x238] sm:$0xff]  ;;  %v225_v14 = vld [vmem:[%s1714_s1 + $0x628] sm:$0xff]  ;;  %v672_v17 = vpack.c.bf16 %v94_v8, %v92_v7 }
  0x30   :  { %v227_v15 = vld [vmem:[%s1714_s1 + $0x638] sm:$0xff]  ;;  %v20_v16 = vld [vmem:[%s1715_s0] sm:$0xff]  ;;  %v800_v19 = vpack.c.bf16 %v222_v11, %v220_v9  ;;  %v226_v25 = vld [vmem:[%s1714_s1 + $0x630] sm:$0xff] }
  0x31   :  { %653 = vmatpush1.bf16.msra.mxu1 %v652_v20  ;;  %v24_v18 = vld [vmem:[%s1715_s0 + $0x20] sm:$0xff]  ;;  %v674_v20 = vpack.c.bf16 %v99_v13, %v97_v12  ;;  %v802_v24 = vpack.c.bf16 %v227_v15, %v225_v14  ;;  %v103_v27 = vld [vmem:[%s1714_s1 + $0x258] sm:$0xff]  ;;  %v229_v28 = vld [vmem:[%s1714_s1 + $0x648] sm:$0xff] }
  0x32   :  { %781 = vmatpush1.bf16.msra.mxu0 %v780_v21  ;;  %655 = vmatprep.subr.bf16.mxu1 %v654_v22  ;;  %v96_v21 = vld [vmem:[%s1714_s1 + $0x220] sm:$0xff]  ;;  %v98_v22 = vld [vmem:[%s1714_s1 + $0x230] sm:$0xff]  ;;  %v231_v29 = vld [vmem:[%s1714_s1 + $0x658] sm:$0xff] }
  0x33   :  { %783 = vmatprep.subr.bf16.mxu0 %v782_v26  ;;  %v224_v23 = vld [vmem:[%s1714_s1 + $0x620] sm:$0xff]  ;;  %v101_v26 = vld [vmem:[%s1714_s1 + $0x248] sm:$0xff]  ;;  %v676_v30 = vpack.c.bf16 %v98_v22, %v96_v21  ;;  %v806_v36 = vpack.c.bf16 %v231_v29, %v229_v28  ;;  %v230_v37 = vld [vmem:[%s1714_s1 + $0x650] sm:$0xff] }
  0x34   :  { %v804_v31 = vpack.c.bf16 %v226_v25, %v224_v23  ;;  %v228_v35 = vld [vmem:[%s1714_s1 + $0x640] sm:$0xff]  ;;  %v107_v39 = vld [vmem:[%s1714_s1 + $0x278] sm:$0xff]  ;;  %v233_v40 = vld [vmem:[%s1714_s1 + $0x668] sm:$0xff] }
  0x35   :  { %657 = vmatpush1.bf16.msra.mxu1 %v656_v32  ;;  %v678_v32 = vpack.c.bf16 %v103_v27, %v101_v26  ;;  %v235_v41 = vld [vmem:[%s1714_s1 + $0x678] sm:$0xff]  ;;  %v808_v43 = vpack.c.bf16 %v230_v37, %v228_v35  ;;  %v232_v47 = vld [vmem:[%s1714_s1 + $0x660] sm:$0xff]  ;;  %v234_v49 = vld [vmem:[%s1714_s1 + $0x670] sm:$0xff] }
  0x36   :  { %785 = vmatpush1.bf16.msra.mxu0 %v784_v33  ;;  %659 = vmatprep.subr.bf16.mxu1 %v658_v34  ;;  %v100_v33 = vld [vmem:[%s1714_s1 + $0x240] sm:$0xff]  ;;  %v102_v34 = vld [vmem:[%s1714_s1 + $0x250] sm:$0xff]  ;;  %v810_v48 = vpack.c.bf16 %v235_v41, %v233_v40  ;;  %v111_v51 = vld [vmem:[%s1714_s1 + $0x298] sm:$0xff]  ;;  %v812_v55 = vpack.c.bf16 %v234_v49, %v232_v47 }
  0x37   :  { %787 = vmatprep.subr.bf16.mxu0 %v786_v38  ;;  %v105_v38 = vld [vmem:[%s1714_s1 + $0x268] sm:$0xff]  ;;  %v680_v42 = vpack.c.bf16 %v102_v34, %v100_v33  ;;  %v239_v53 = vld [vmem:[%s1714_s1 + $0x698] sm:$0xff]  ;;  %v236_v59 = vld [vmem:[%s1714_s1 + $0x680] sm:$0xff] }
  0x38   :  { %v237_v52 = vld [vmem:[%s1714_s1 + $0x688] sm:$0xff]  ;;  %v238_v61 = vld [vmem:[%s1714_s1 + $0x690] sm:$0xff]  ;;  %v115_v63 = vld [vmem:[%s1714_s1 + $0x2b8] sm:$0xff] }
  0x39   :  { %661 = vmatpush1.bf16.msra.mxu1 %v660_v44  ;;  %v682_v44 = vpack.c.bf16 %v107_v39, %v105_v38  ;;  %v814_v60 = vpack.c.bf16 %v239_v53, %v237_v52  ;;  %v241_v0 = vld [vmem:[%s1714_s1 + $0x6a8] sm:$0xff]  ;;  %v243_v1 = vld [vmem:[%s1714_s1 + $0x6b8] sm:$0xff]  ;;  %v816_v3 = vpack.c.bf16 %v238_v61, %v236_v59  ;;  %v240_v7 = vld [vmem:[%s1714_s1 + $0x6a0] sm:$0xff] }
  0x3a   :  { %789 = vmatpush1.bf16.msra.mxu0 %v788_v45  ;;  %663 = vmatprep.subr.bf16.mxu1 %v662_v46  ;;  %v104_v45 = vld [vmem:[%s1714_s1 + $0x260] sm:$0xff]  ;;  %v106_v46 = vld [vmem:[%s1714_s1 + $0x270] sm:$0xff]  ;;  %v818_v8 = vpack.c.bf16 %v243_v1, %v241_v0  ;;  %v119_v11 = vld [vmem:[%s1714_s1 + $0x2d8] sm:$0xff] }
  0x3b   :  { %791 = vmatprep.subr.bf16.mxu0 %v790_v50  ;;  %v109_v50 = vld [vmem:[%s1714_s1 + $0x288] sm:$0xff]  ;;  %v684_v54 = vpack.c.bf16 %v106_v46, %v104_v45  ;;  %v242_v9 = vld [vmem:[%s1714_s1 + $0x6b0] sm:$0xff]  ;;  %v247_v13 = vld [vmem:[%s1714_s1 + $0x6d8] sm:$0xff] }
  0x3c   :  { %v245_v12 = vld [vmem:[%s1714_s1 + $0x6c8] sm:$0xff]  ;;  %v116_v15 = vld [vmem:[%s1714_s1 + $0x2c0] sm:$0xff]  ;;  %v123_v23 = vld [vmem:[%s1714_s1 + $0x2f8] sm:$0xff] }
  0x3d   :  { %665 = vmatpush1.bf16.msra.mxu1 %v664_v56  ;;  %v686_v56 = vpack.c.bf16 %v111_v51, %v109_v50  ;;  %v822_v21 = vpack.c.bf16 %v247_v13, %v245_v12  ;;  %v121_v22 = vld [vmem:[%s1714_s1 + $0x2e8] sm:$0xff]  ;;  %v251_v26 = vld [vmem:[%s1714_s1 + $0x6f8] sm:$0xff]  ;;  %v248_v33 = vld [vmem:[%s1714_s1 + $0x6e0] sm:$0xff] }
  0x3e   :  { %793 = vmatpush1.bf16.msra.mxu0 %v792_v57  ;;  %667 = vmatprep.subr.bf16.mxu1 %v666_v58  ;;  %v108_v57 = vld [vmem:[%s1714_s1 + $0x280] sm:$0xff]  ;;  %v110_v58 = vld [vmem:[%s1714_s1 + $0x290] sm:$0xff]  ;;  %v249_v25 = vld [vmem:[%s1714_s1 + $0x6e8] sm:$0xff] }
  0x3f   :  { %795 = vmatprep.subr.bf16.mxu0 %v794_v62  ;;  %v113_v62 = vld [vmem:[%s1714_s1 + $0x2a8] sm:$0xff]  ;;  %v688_v2 = vpack.c.bf16 %v110_v58, %v108_v57  ;;  %v27_v27 = vld [vmem:[%s1715_s0 + $0x38] sm:$0xff]  ;;  %v826_v34 = vpack.c.bf16 %v251_v26, %v249_v25  ;;  %v250_v35 = vld [vmem:[%s1714_s1 + $0x6f0] sm:$0xff] }
  0x40   :  { %v127_v37 = vld [vmem:[%s1714_s1 + $0x318] sm:$0xff]  ;;  %v253_v38 = vld [vmem:[%s1714_s1 + $0x708] sm:$0xff]  ;;  %v828_v41 = vpack.c.bf16 %v250_v35, %v248_v33  ;;  %v252_v45 = vld [vmem:[%s1714_s1 + $0x700] sm:$0xff] }
  0x41   :  { %669 = vmatpush1.bf16.msra.mxu1 %v668_v4  ;;  %v690_v4 = vpack.c.bf16 %v115_v63, %v113_v62  ;;  %v255_v39 = vld [vmem:[%s1714_s1 + $0x718] sm:$0xff]  ;;  %v254_v47 = vld [vmem:[%s1714_s1 + $0x710] sm:$0xff]  ;;  %v257_v50 = vld [vmem:[%s1714_s1 + $0x728] sm:$0xff] }
  0x42   :  { %797 = vmatpush1.bf16.msra.mxu0 %v796_v5  ;;  %671 = vmatprep.subr.bf16.mxu1 %v670_v6  ;;  %v112_v5 = vld [vmem:[%s1714_s1 + $0x2a0] sm:$0xff]  ;;  %v114_v6 = vld [vmem:[%s1714_s1 + $0x2b0] sm:$0xff]  ;;  %v830_v46 = vpack.c.bf16 %v255_v39, %v253_v38  ;;  %v131_v49 = vld [vmem:[%s1714_s1 + $0x338] sm:$0xff]  ;;  %v832_v53 = vpack.c.bf16 %v254_v47, %v252_v45 }
  0x43   :  { %799 = vmatprep.subr.bf16.mxu0 %v798_v10  ;;  %v117_v10 = vld [vmem:[%s1714_s1 + $0x2c8] sm:$0xff]  ;;  %v692_v14 = vpack.c.bf16 %v114_v6, %v112_v5  ;;  %v259_v51 = vld [vmem:[%s1714_s1 + $0x738] sm:$0xff]  ;;  %v256_v57 = vld [vmem:[%s1714_s1 + $0x720] sm:$0xff] }
  0x44   :  { %361 = vmatmul.mubr.f32.vlgmr.msra.gmra.mrb[0].mxu1 %v20_v16  ;;  %v820_v16 = vpack.c.bf16 %v242_v9, %v240_v7  ;;  %v834_v58 = vpack.c.bf16 %v259_v51, %v257_v50  ;;  %v258_v59 = vld [vmem:[%s1714_s1 + $0x730] sm:$0xff]  ;;  %v135_v61 = vld [vmem:[%s1714_s1 + $0x358] sm:$0xff]  ;;  %v261_v62 = vld [vmem:[%s1714_s1 + $0x748] sm:$0xff] }
  0x45   :  { %673 = vmatpush1.bf16.msra.mxu1 %v672_v17  ;;  %503 = vmatmul.mubr.f32.vlgmr.msra.gmra.mrb[0].mxu0 %v24_v18  ;;  %v694_v17 = vpack.c.bf16 %v119_v11, %v117_v10  ;;  %v118_v18 = vld [vmem:[%s1714_s1 + $0x2d0] sm:$0xff]  ;;  %v263_v63 = vld [vmem:[%s1714_s1 + $0x758] sm:$0xff]  ;;  %v836_v1 = vpack.c.bf16 %v258_v59, %v256_v57  ;;  %v260_v5 = vld [vmem:[%s1714_s1 + $0x740] sm:$0xff] }
  0x46   :  { %801 = vmatpush1.bf16.msra.mxu0 %v800_v19  ;;  %675 = vmatprep.subr.bf16.mxu1 %v674_v20  ;;  %v244_v19 = vld [vmem:[%s1714_s1 + $0x6c0] sm:$0xff]  ;;  %v246_v20 = vld [vmem:[%s1714_s1 + $0x6d0] sm:$0xff]  ;;  %v696_v28 = vpack.c.bf16 %v118_v18, %v116_v15  ;;  %v838_v6 = vpack.c.bf16 %v263_v63, %v261_v62  ;;  %v139_v9 = vld [vmem:[%s1714_s1 + $0x378] sm:$0xff] }
  0x47   :  { %803 = vmatprep.subr.bf16.mxu0 %v802_v24  ;;  %v23_v24 = vld [vmem:[%s1715_s0 + $0x18] sm:$0xff]  ;;  %573 = vmatprep.mubr.f32.mxu0 %v27_v27  ;;  %v824_v29 = vpack.c.bf16 %v246_v20, %v244_v19  ;;  %v262_v7 = vld [vmem:[%s1714_s1 + $0x750] sm:$0xff]  ;;  %v265_v10 = vld [vmem:[%s1714_s1 + $0x768] sm:$0xff] }
  0x48   :  { %431 = vmatprep.mubr.f32.mxu1 %v23_v24  ;;  %v267_v11 = vld [vmem:[%s1714_s1 + $0x778] sm:$0xff]  ;;  %v840_v13 = vpack.c.bf16 %v262_v7, %v260_v5  ;;  %v136_v15 = vld [vmem:[%s1714_s1 + $0x360] sm:$0xff]  ;;  %v266_v19 = vld [vmem:[%s1714_s1 + $0x770] sm:$0xff] }
  0x49   :  { %677 = vmatpush1.bf16.msra.mxu1 %v676_v30  ;;  %v698_v30 = vpack.c.bf16 %v123_v23, %v121_v22  ;;  %v842_v18 = vpack.c.bf16 %v267_v11, %v265_v10  ;;  %v141_v20 = vld [vmem:[%s1714_s1 + $0x388] sm:$0xff]  ;;  %v271_v23 = vld [vmem:[%s1714_s1 + $0x798] sm:$0xff]  ;;  %v140_v27 = vld [vmem:[%s1714_s1 + $0x380] sm:$0xff] }
  0x4a   :  { %805 = vmatpush1.bf16.msra.mxu0 %v804_v31  ;;  %679 = vmatprep.subr.bf16.mxu1 %v678_v32  ;;  %v120_v31 = vld [vmem:[%s1714_s1 + $0x2e0] sm:$0xff]  ;;  %v122_v32 = vld [vmem:[%s1714_s1 + $0x2f0] sm:$0xff]  ;;  %v269_v22 = vld [vmem:[%s1714_s1 + $0x788] sm:$0xff] }
  0x4b   :  { %807 = vmatprep.subr.bf16.mxu0 %v806_v36  ;;  %v125_v36 = vld [vmem:[%s1714_s1 + $0x308] sm:$0xff]  ;;  %v700_v40 = vpack.c.bf16 %v122_v32, %v120_v31  ;;  %v270_v31 = vld [vmem:[%s1714_s1 + $0x790] sm:$0xff]  ;;  %v147_v33 = vld [vmem:[%s1714_s1 + $0x3b8] sm:$0xff] }
  0x4c   :  { %v145_v32 = vld [vmem:[%s1714_s1 + $0x3a8] sm:$0xff]  ;;  %v275_v35 = vld [vmem:[%s1714_s1 + $0x7b8] sm:$0xff]  ;;  %v144_v39 = vld [vmem:[%s1714_s1 + $0x3a0] sm:$0xff] }
  0x4d   :  { %681 = vmatpush1.bf16.msra.mxu1 %v680_v42  ;;  %v702_v42 = vpack.c.bf16 %v127_v37, %v125_v36  ;;  %v722_v38 = vpack.c.bf16 %v147_v33, %v145_v32  ;;  %v151_v45 = vld [vmem:[%s1714_s1 + $0x3d8] sm:$0xff]  ;;  %v148_v51 = vld [vmem:[%s1714_s1 + $0x3c0] sm:$0xff]  ;;  %v26_v7 = vld [vmem:[%s1715_s0 + $0x30] sm:$0xff] }
  0x4e   :  { %809 = vmatpush1.bf16.msra.mxu0 %v808_v43  ;;  %683 = vmatprep.subr.bf16.mxu1 %v682_v44  ;;  %v124_v43 = vld [vmem:[%s1714_s1 + $0x300] sm:$0xff]  ;;  %v126_v44 = vld [vmem:[%s1714_s1 + $0x310] sm:$0xff]  ;;  %v279_v47 = vld [vmem:[%s1714_s1 + $0x7d8] sm:$0xff] }
  0x4f   :  { %811 = vmatprep.subr.bf16.mxu0 %v810_v48  ;;  %v129_v48 = vld [vmem:[%s1714_s1 + $0x328] sm:$0xff]  ;;  %v704_v52 = vpack.c.bf16 %v126_v44, %v124_v43  ;;  %v274_v43 = vld [vmem:[%s1714_s1 + $0x7b0] sm:$0xff]  ;;  %v155_v57 = vld [vmem:[%s1714_s1 + $0x3f8] sm:$0xff] }
  0x50   :  { %v149_v44 = vld [vmem:[%s1714_s1 + $0x3c8] sm:$0xff]  ;;  %v283_v59 = vld [vmem:[%s1714_s1 + $0x7f8] sm:$0xff]  ;;  %v152_v63 = vld [vmem:[%s1714_s1 + $0x3e0] sm:$0xff] }
  0x51   :  { %685 = vmatpush1.bf16.msra.mxu1 %v684_v54  ;;  %v706_v54 = vpack.c.bf16 %v131_v49, %v129_v48  ;;  %v726_v50 = vpack.c.bf16 %v151_v45, %v149_v44  ;;  %v284_v11 = vld [vmem:[%s1716_s2] sm:$0x3] }
  0x52   :  { %813 = vmatpush1.bf16.msra.mxu0 %v812_v55  ;;  %687 = vmatprep.subr.bf16.mxu1 %v686_v56  ;;  %v128_v55 = vld [vmem:[%s1714_s1 + $0x320] sm:$0xff]  ;;  %v130_v56 = vld [vmem:[%s1714_s1 + $0x330] sm:$0xff] }
  0x53   :  { %815 = vmatprep.subr.bf16.mxu0 %v814_v60  ;;  %v133_v60 = vld [vmem:[%s1714_s1 + $0x348] sm:$0xff]  ;;  %v708_v0 = vpack.c.bf16 %v130_v56, %v128_v55  ;;  %v278_v55 = vld [vmem:[%s1714_s1 + $0x7d0] sm:$0xff] }
  0x54   :  { %v153_v56 = vld [vmem:[%s1714_s1 + $0x3e8] sm:$0xff] }
  0x55   :  { %689 = vmatpush1.bf16.msra.mxu1 %v688_v2  ;;  %v710_v2 = vpack.c.bf16 %v135_v61, %v133_v60  ;;  %v730_v62 = vpack.c.bf16 %v155_v57, %v153_v56 }
  0x56   :  { %817 = vmatpush1.bf16.msra.mxu0 %v816_v3  ;;  %691 = vmatprep.subr.bf16.mxu1 %v690_v4  ;;  %v132_v3 = vld [vmem:[%s1714_s1 + $0x340] sm:$0xff]  ;;  %v134_v4 = vld [vmem:[%s1714_s1 + $0x350] sm:$0xff] }
  0x57   :  { %819 = vmatprep.subr.bf16.mxu0 %v818_v8  ;;  %v137_v8 = vld [vmem:[%s1714_s1 + $0x368] sm:$0xff]  ;;  %v712_v12 = vpack.c.bf16 %v134_v4, %v132_v3  ;;  %v282_v3 = vld [vmem:[%s1714_s1 + $0x7f0] sm:$0xff] }
  0x59   :  { %693 = vmatpush1.bf16.msra.mxu1 %v692_v14  ;;  %v714_v14 = vpack.c.bf16 %v139_v9, %v137_v8  ;;  %v286_v8 = vlaneseq }
  0x5a   :  { %821 = vmatpush1.bf16.msra.mxu0 %v820_v16  ;;  %695 = vmatprep.subr.bf16.mxu1 %v694_v17  ;;  %v138_v16 = vld [vmem:[%s1714_s1 + $0x370] sm:$0xff]  ;;  %v264_v17 = vld [vmem:[%s1714_s1 + $0x760] sm:$0xff] }
  0x5b   :  { %823 = vmatprep.subr.bf16.mxu0 %v822_v21  ;;  %v143_v21 = vld [vmem:[%s1714_s1 + $0x398] sm:$0xff]  ;;  %v716_v24 = vpack.c.bf16 %v138_v16, %v136_v15  ;;  %v844_v25 = vpack.c.bf16 %v266_v19, %v264_v17  ;;  %v287_v9 = vshrl.u32 %v286_v8, 7 }
  0x5c   :  { %v718_v26 = vpack.c.bf16 %v143_v21, %v141_v20 }
  0x5d   :  { %697 = vmatpush1.bf16.msra.mxu1 %v696_v28  ;;  %v142_v28 = vld [vmem:[%s1714_s1 + $0x390] sm:$0xff]  ;;  %v288_v10 = vsub.s32 0, %v287_v9 }
  0x5e   :  { %825 = vmatpush1.bf16.msra.mxu0 %v824_v29  ;;  %699 = vmatprep.subr.bf16.mxu1 %v698_v30  ;;  %v268_v29 = vld [vmem:[%s1714_s1 + $0x780] sm:$0xff]  ;;  %v846_v30 = vpack.c.bf16 %v271_v23, %v269_v22  ;;  %v720_v36 = vpack.c.bf16 %v142_v28, %v140_v27 }
  0x5f   :  { %827 = vmatprep.subr.bf16.mxu0 %v826_v34  ;;  %v273_v34 = vld [vmem:[%s1714_s1 + $0x7a8] sm:$0xff]  ;;  %v848_v37 = vpack.c.bf16 %v270_v31, %v268_v29  ;;  %v586_v28 = vld [vmem:[%s1719_s3] sm:$0xff] }
  0x61   :  { %701 = vmatpush1.bf16.msra.mxu1 %v700_v40  ;;  %v146_v40 = vld [vmem:[%s1714_s1 + $0x3b0] sm:$0xff] }
  0x62   :  { %829 = vmatpush1.bf16.msra.mxu0 %v828_v41  ;;  %703 = vmatprep.subr.bf16.mxu1 %v702_v42  ;;  %v272_v41 = vld [vmem:[%s1714_s1 + $0x7a0] sm:$0xff]  ;;  %v850_v42 = vpack.c.bf16 %v275_v35, %v273_v34  ;;  %v724_v48 = vpack.c.bf16 %v146_v40, %v144_v39 }
  0x63   :  { %831 = vmatprep.subr.bf16.mxu0 %v830_v46  ;;  %v277_v46 = vld [vmem:[%s1714_s1 + $0x7c8] sm:$0xff]  ;;  %v852_v49 = vpack.c.bf16 %v274_v43, %v272_v41 }
  0x65   :  { %705 = vmatpush1.bf16.msra.mxu1 %v704_v52  ;;  %v150_v52 = vld [vmem:[%s1714_s1 + $0x3d0] sm:$0xff] }
  0x66   :  { %833 = vmatpush1.bf16.msra.mxu0 %v832_v53  ;;  %707 = vmatprep.subr.bf16.mxu1 %v706_v54  ;;  %v276_v53 = vld [vmem:[%s1714_s1 + $0x7c0] sm:$0xff]  ;;  %v854_v54 = vpack.c.bf16 %v279_v47, %v277_v46  ;;  %v728_v60 = vpack.c.bf16 %v150_v52, %v148_v51 }
  0x67   :  { %835 = vmatprep.subr.bf16.mxu0 %v834_v58  ;;  %v281_v58 = vld [vmem:[%s1714_s1 + $0x7e8] sm:$0xff]  ;;  %v856_v61 = vpack.c.bf16 %v278_v55, %v276_v53 }
  0x69   :  { %709 = vmatpush1.bf16.msra.mxu1 %v708_v0  ;;  %v154_v0 = vld [vmem:[%s1714_s1 + $0x3f0] sm:$0xff] }
  0x6a   :  { %837 = vmatpush1.bf16.msra.mxu0 %v836_v1  ;;  %711 = vmatprep.subr.bf16.mxu1 %v710_v2  ;;  %v858_v1 = vpack.c.bf16 %v283_v59, %v281_v58  ;;  %v280_v2 = vld [vmem:[%s1714_s1 + $0x7e0] sm:$0xff]  ;;  %v732_v4 = vpack.c.bf16 %v154_v0, %v152_v63 }
  0x6b   :  { %839 = vmatprep.subr.bf16.mxu0 %v838_v6  ;;  %v860_v5 = vpack.c.bf16 %v282_v3, %v280_v2  ;;  %v22_v6 = vld [vmem:[%s1715_s0 + $0x10] sm:$0xff] }
  0x6d   :  { %713 = vmatpush1.bf16.msra.mxu1 %v712_v12  ;;  %v292_v12 = vsub.s32 1, %v287_v9 }
  0x6e   :  { %841 = vmatpush1.bf16.msra.mxu0 %v840_v13  ;;  %715 = vmatprep.subr.bf16.mxu1 %v714_v14  ;;  %v289_v13 = vrot.slane %v284_v11, %v288_v10 }
  0x6f   :  { %843 = vmatprep.subr.bf16.mxu0 %v842_v18  ;;  %v293_v14 = vrot.slane %v284_v11, %v292_v12 }
  0x71   :  { %717 = vmatpush1.bf16.msra.mxu1 %v716_v24 }
  0x72   :  { %845 = vmatpush1.bf16.msra.mxu0 %v844_v25  ;;  %719 = vmatprep.subr.bf16.mxu1 %v718_v26 }
  0x73   :  { %847 = vmatprep.subr.bf16.mxu0 %v846_v30 }
  0x75   :  { %721 = vmatpush1.bf16.msra.mxu1 %v720_v36 }
  0x76   :  { %849 = vmatpush1.bf16.msra.mxu0 %v848_v37  ;;  %723 = vmatprep.subr.bf16.mxu1 %v722_v38 }
  0x77   :  { %851 = vmatprep.subr.bf16.mxu0 %v850_v42 }
  0x79   :  { %725 = vmatpush1.bf16.msra.mxu1 %v724_v48 }
  0x7a   :  { %853 = vmatpush1.bf16.msra.mxu0 %v852_v49  ;;  %727 = vmatprep.subr.bf16.mxu1 %v726_v50 }
  0x7b   :  { %855 = vmatprep.subr.bf16.mxu0 %v854_v54 }
  0x7d   :  { %729 = vmatpush1.bf16.msra.mxu1 %v728_v60 }
  0x7e   :  { %857 = vmatpush1.bf16.msra.mxu0 %v856_v61  ;;  %731 = vmatprep.subr.bf16.mxu1 %v730_v62 }
  0x7f   :  { %859 = vmatprep.subr.bf16.mxu0 %v858_v1 }
  0x81   :  { %733 = vmatpush1.bf16.msra.mxu1 %v732_v4 }
  0x82   :  { %861 = vmatpush1.bf16.msra.mxu0 %v860_v5 }
  0x84   :  { %432 = vmatmul.mubr.f32.vlgmr.msra.gmra.mrb[0].mxu1 %v22_v6 }
  0x85   :  { %574 = vmatmul.mubr.f32.vlgmr.msra.gmra.mrb[0].mxu0 %v26_v7 }
 0x157   :  { %v433_v15 = vpop.f32.mrb[0].mxu1 }
 0x158   :  { %v862_v16 = vadd.f32 %v433_v15, %v289_v13  ;;  %v575_v17 = vpop.f32.mrb[0].mxu0  ;;  %v435_v18 = vpop.f32.mrb[1].mxu1 }
 0x159   :  { %v864_v19 = vadd.f32 %v435_v18, %v293_v14  ;;  %v577_v20 = vpop.f32.mrb[1].mxu0 }
 0x15a   :  { %v863_v21 = vadd.f32 %v862_v16, %v575_v17 }
 0x15b   :  { %v865_v22 = vadd.f32 %v864_v19, %v577_v20 }
 0x15c   :  { %vm580_vm0 = vcmp.ge.f32.partialorder %v863_v21, 0.0  ;;  %v582_v23 = vmul.f32 0.2, %v863_v21 }
 0x15d   :  { %vm581_vm1 = vcmp.ge.f32.partialorder %v865_v22, 0.0  ;;  %v583_v24 = vmul.f32 0.2, %v865_v22 }
 0x15e   :  { %v584_v25 = vsel %vm580_vm0, %v863_v21, %v582_v23 }
 0x15f   :  { %592 = vst [vmem:[%s1717_s5] sm:$0xff] %v584_v25  ;;  %v585_v26 = vsel %vm581_vm1, %v865_v22, %v583_v24 }
 0x160   :  { %v587_v27 = vmul.f32 1.442695, %v585_v26  ;;  %593 = vst [vmem:[%s1718_s6] sm:$0xff] %v585_v26 }
 0x162   :  { %870 = vpow2.f32 %v587_v27 }
 0x16c   :  { %v871_v29 = vpop.eup %870 }
 0x16d   :  { %v589_v30 = vmul.f32 %v871_v29, %v586_v28 }
 0x16f   :  { %v590_v31 = vadd.f32 %v589_v30, %v584_v25 }
 0x171   :  { %591 = vst [vmem:[%s1720_s4] sm:$0xff] %v590_v31 }

</bundles_post_ra>
